<compile_context>
chip_gen: v5e
topology: v5e:2x2
jax: 0.10.0
libtpu: 0.0.40
codegen_flags: <defaults>
</compile_context>

<pallas_src>
import jax
import jax.numpy as jnp
from jax.experimental import pallas as pl
from jax.experimental.pallas import tpu as pltpu

# MXU operand dtype (accumulation stays f32 via preferred_element_type).
# bf16 is full-rate on v5e/v6e/v7x MXUs; element-wise math stays f32.
MATMUL_DTYPE = jnp.bfloat16


# ---------------------------------------------------------------------------
# Fused kernel: [GRU layer 0 -> ... -> GRU layer L-1 -> Linear], all in VMEM,
# for one batch block of Bb (multiple of 8) rows.
# ---------------------------------------------------------------------------
def _recovery_kernel(x_ref, t_ref, wih_ref, whh_ref, bi_ref, bhhn_ref,
                     wout_ref, bout_ref, out_ref, buf_ref, gi_ref):
    S, Bb, H = buf_ref.shape                 # (seq, batch-block, hidden)
    GP = gi_ref.shape[-1] // 3               # 128-aligned per-gate lane group
    L = wih_ref.shape[0]
    N = S * Bb

    def mm(a, b):
        return jnp.dot(a.astype(MATMUL_DTYPE), b.astype(MATMUL_DTYPE),
                       preferred_element_type=jnp.float32)

    t_vec = t_ref[...]                       # (Bb, 1) int32 sequence lengths

    for l in range(L):                       # static: num_layers is small
        # Hoisted input->hidden matmul for ALL time steps at once (one MXU
        # pass per layer), staged in a VMEM scratch ref.  Biases bih_{r,z,n}
        # and bhh_{r,z} are pre-folded into bi_ref by the wrapper.
        xin = x_ref[...] if l == 0 else buf_ref[...]
        gi_ref[...] = (mm(xin.reshape(N, H), wih_ref[l])
                       + bi_ref[l]).reshape(S, Bb, 3 * GP)

        # Hoist per-layer recurrent weights / bias out of the serial loop.
        whh_l = whh_ref[l]                                   # (H, 3*GP) bf16
        bhhn_l = jnp.broadcast_to(bhhn_ref[l], (Bb, H))      # hoisted broadcast

        def step(t, h):
            gi_t = gi_ref[t]                 # (Bb, 3*GP), whole (8,lane) tiles
            gh = mm(h, whh_l)                # ONE packed matmul per step
            r = jax.nn.sigmoid(gi_t[:, 0:H] + gh[:, 0:H])
            z = jax.nn.sigmoid(gi_t[:, GP:GP + H] + gh[:, GP:GP + H])
            n = jnp.tanh(gi_t[:, 2 * GP:2 * GP + H]
                         + r * (gh[:, 2 * GP:2 * GP + H] + bhhn_l))
            h_new = n + z * (h - n)          # == (1 - z) * n + z * h
            m = (t_vec > t).astype(jnp.float32)   # (Bb,1) in {0,1}
            h = h + m * (h_new - h)          # freeze state for t >= T[b]
            buf_ref[t] = m * h               # zero the padded time steps
            return h

        jax.lax.fori_loop(0, S, step, jnp.zeros((Bb, H), jnp.float32),
                          unroll=True)

    # Fused output projection onto a lane-dense (128-padded) slab.
    out_ref[...] = (mm(buf_ref[...].reshape(N, H), wout_ref[...])
                    + bout_ref[...]).reshape(S, Bb, out_ref.shape[-1]
                                             ).astype(out_ref.dtype)


# ---------------------------------------------------------------------------
# Recovery forward (wrapper glue)
# ---------------------------------------------------------------------------
def recovery_forward(params, x, T, *, block_b=8):
    """x: (B, S, hidden) f32, T: (B,) int lengths -> (B, S, output_size) f32.

    block_b must be a multiple of 8; raise it for large batches to amortize
    the per-step weight push (multiple blocks also feed v7x's 2nd core).
    """
    B, S, H = x.shape
    L = params["wih_r"].shape[0]
    out_size = params["w_out"].shape[1]
    n_pad = pl.cdiv(out_size, 128) * 128      # lane-dense output slab
    GP = pl.cdiv(H, 128) * 128                # per-gate 128-aligned lane group
    Bp = pl.cdiv(B, block_b) * block_b        # batch padded to 8-sublane blocks
    nblk = Bp // block_b

    # --- batch padding + block layout: (nblk, S, block_b, H) -----------------
    x_pad = jnp.zeros((Bp, S, H), jnp.float32).at[:B].set(x.astype(jnp.float32))
    x_blk = x_pad.reshape(nblk, block_b, S, H).transpose(0, 2, 1, 3)
    T_pad = jnp.zeros((Bp,), jnp.int32).at[:B].set(T.astype(jnp.int32))
    T_blk = T_pad.reshape(nblk, block_b, 1)   # padded rows: length 0 -> masked

    # --- pack gate weights along 128-aligned lane groups; fold biases --------
    def pack_w(r, z, n):
        w = jnp.zeros((L, H, 3 * GP), jnp.float32)
        w = (w.at[:, :, 0:H].set(r)
              .at[:, :, GP:GP + H].set(z)
              .at[:, :, 2 * GP:2 * GP + H].set(n))
        return w.astype(MATMUL_DTYPE)         # bf16 operands, half the VMEM/DMA

    wih_p = pack_w(params["wih_r"], params["wih_z"], params["wih_n"])
    whh_p = pack_w(params["whh_r"], params["whh_z"], params["whh_n"])
    bi_p = jnp.zeros((L, 1, 3 * GP), jnp.float32)
    bi_p = (bi_p.at[:, :, 0:H].set(params["bih_r"] + params["bhh_r"])
                 .at[:, :, GP:GP + H].set(params["bih_z"] + params["bhh_z"])
                 .at[:, :, 2 * GP:2 * GP + H].set(params["bih_n"]))
    bhh_n = params["bhh_n"]                   # (L, 1, H): must stay inside tanh
    w_out_p = (jnp.zeros((H, n_pad), jnp.float32)
               .at[:, :out_size].set(params["w_out"]).astype(MATMUL_DTYPE))
    b_out_p = jnp.zeros((1, n_pad), jnp.float32).at[:, :out_size].set(params["b_out"])

    in_specs = [
        pl.BlockSpec((None, S, block_b, H), lambda i: (i, 0, 0, 0)),      # x block
        pl.BlockSpec((None, block_b, 1), lambda i: (i, 0, 0)),            # lengths
        pl.BlockSpec((L, H, 3 * GP), lambda i: (0, 0, 0)),                # W_ih packed
        pl.BlockSpec((L, H, 3 * GP), lambda i: (0, 0, 0)),                # W_hh packed
        pl.BlockSpec((L, 1, 3 * GP), lambda i: (0, 0, 0)),                # folded biases
        pl.BlockSpec((L, 1, H), lambda i: (0, 0, 0)),                     # b_hh_n
        pl.BlockSpec((H, n_pad), lambda i: (0, 0)),                       # W_out padded
        pl.BlockSpec((1, n_pad), lambda i: (0, 0)),                       # b_out padded
    ]
    out_spec = pl.BlockSpec((None, S, block_b, n_pad), lambda i: (i, 0, 0, 0))

    out_blk = pl.pallas_call(
        _recovery_kernel,
        out_shape=jax.ShapeDtypeStruct((nblk, S, block_b, n_pad), jnp.float32),
        grid=(nblk,),
        in_specs=in_specs,
        out_specs=out_spec,
        scratch_shapes=[
            pltpu.VMEM((S, block_b, H), jnp.float32),          # inter-layer buffer
            pltpu.VMEM((S, block_b, 3 * GP), jnp.float32),     # staged gi = x @ W_ih
        ],
        compiler_params=pltpu.CompilerParams(
            dimension_semantics=("parallel",),                 # batch blocks
            vmem_limit_bytes=32 * 1024 * 1024),                # explicit budget
    )(x_blk, T_blk, wih_p, whh_p, bi_p, bhh_n, w_out_p, b_out_p)

    out = (out_blk[:, :, :, :out_size]
           .transpose(0, 2, 1, 3)
           .reshape(Bp, S, out_size)[:B])
    # TODO(synk): pad_packed_sequence trims the seq axis to max(T); that trim
    # is a dynamic shape under jit (the demo uses max(T) == S so it is a no-op).
    return out


# ---------------------------------------------------------------------------
# Deterministic parameter init (PyTorch-style uniform(-1/sqrt(H), 1/sqrt(H)))
# Per-gate, per-layer stacked; weights stored transposed so x @ W applies.
# ---------------------------------------------------------------------------
def init_params(key, hidden_size, output_size, num_layers):
    H, L = hidden_size, num_layers
    k = 1.0 / (hidden_size ** 0.5)

    def u(kk, shape):
        return jax.random.uniform(kk, shape, jnp.float32, -k, k)

    ks = jax.random.split(key, 14)
    params = {}
    for i, name in enumerate(["wih_r", "wih_z", "wih_n",
                              "whh_r", "whh_z", "whh_n"]):
        params[name] = u(ks[i], (L, H, H))
    for i, name in enumerate(["bih_r", "bih_z", "bih_n",
                              "bhh_r", "bhh_z", "bhh_n"]):
        params[name] = u(ks[6 + i], (L, 1, H))
    params["w_out"] = u(ks[12], (H, output_size))
    params["b_out"] = u(ks[13], (1, output_size))
    return params


# ---------------------------------------------------------------------------
# Pure-JAX reference (masked GRU with lax.scan).  Matmul operands use the same
# MATMUL_DTYPE as the kernel (f32 accumulation) so the comparison is tight;
# set MATMUL_DTYPE = jnp.float32 above to compare against full-f32 math.
# ---------------------------------------------------------------------------
def recovery_ref(params, x, T):
    B, S, H = x.shape
    L = params["wih_r"].shape[0]

    def mm(a, b):
        return jnp.dot(a.astype(MATMUL_DTYPE), b.astype(MATMUL_DTYPE),
                       preferred_element_type=jnp.float32)

    seq = jnp.transpose(x, (1, 0, 2))          # (S, B, H)
    for l in range(L):
        wih_r, wih_z, wih_n = params["wih_r"][l], params["wih_z"][l], params["wih_n"][l]
        whh_r, whh_z, whh_n = params["whh_r"][l], params["whh_z"][l], params["whh_n"][l]
        bih_r, bih_z, bih_n = params["bih_r"][l], params["bih_z"][l], params["bih_n"][l]
        bhh_r, bhh_z, bhh_n = params["bhh_r"][l], params["bhh_z"][l], params["bhh_n"][l]

        def step(h, inp, wih_r=wih_r, wih_z=wih_z, wih_n=wih_n,
                 whh_r=whh_r, whh_z=whh_z, whh_n=whh_n,
                 bih_r=bih_r, bih_z=bih_z, bih_n=bih_n,
                 bhh_r=bhh_r, bhh_z=bhh_z, bhh_n=bhh_n):
            xt, t = inp
            r = jax.nn.sigmoid(mm(xt, wih_r) + bih_r + mm(h, whh_r) + bhh_r)
            z = jax.nn.sigmoid(mm(xt, wih_z) + bih_z + mm(h, whh_z) + bhh_z)
            n = jnp.tanh(mm(xt, wih_n) + bih_n + r * (mm(h, whh_n) + bhh_n))
            h_new = (1.0 - z) * n + z * h
            m = (T > t)[:, None]
            h = jnp.where(m, h_new, h)
            return h, jnp.where(m, h, 0.0)

        h0 = jnp.zeros((B, H), jnp.float32)
        _, seq = jax.lax.scan(step, h0, (seq, jnp.arange(S)))
    H_o = jnp.transpose(seq, (1, 0, 2))
    return mm(H_o, params["w_out"]) + params["b_out"]


if __name__ == "__main__":
    B, S, hidden, output_size, num_layers = 4, 8, 32, 8, 2

    key = jax.random.PRNGKey(0)
    key, kx = jax.random.split(key)
    x = jax.random.normal(kx, (B, S, hidden), jnp.float32)
    T = jnp.array([8, 5, 8, 3], dtype=jnp.int32)   # max(T) == S
    params = init_params(key, hidden, output_size, num_layers)

    out = jax.block_until_ready(recovery_forward(params, x, T))
    assert out.shape == (B, S, output_size)

    ref = jax.block_until_ready(recovery_ref(params, x, T))
    assert jnp.allclose(out, ref, atol=2e-3, rtol=2e-3), (
        "Pallas output mismatch vs JAX reference")

    print("KERNEL_OK")
</pallas_src>

<mosaic_0001>
module attributes {stable_mosaic.version = 11 : i64} {
  func.func @_recovery_kernel(%arg0: i32, %arg1: memref<1x8x8x32xf32, #tpu.memory_space<vmem>>, %arg2: memref<1x8x1xi32, #tpu.memory_space<vmem>>, %arg3: memref<2x32x384xbf16, #tpu.memory_space<vmem>>, %arg4: memref<2x32x384xbf16, #tpu.memory_space<vmem>>, %arg5: memref<2x1x384xf32, #tpu.memory_space<vmem>>, %arg6: memref<2x1x32xf32, #tpu.memory_space<vmem>>, %arg7: memref<32x128xbf16, #tpu.memory_space<vmem>>, %arg8: memref<1x128xf32, #tpu.memory_space<vmem>>, %arg9: memref<1x8x8x128xf32, #tpu.memory_space<vmem>>, %arg10: memref<8x8x32xf32, #tpu.memory_space<vmem>>, %arg11: memref<8x8x384xf32, #tpu.memory_space<vmem>>) attributes {dimension_semantics = [#tpu.dimension_semantics<parallel>], iteration_bounds = array<i64: 1>, scalar_prefetch = 0 : i64, scratch_operands = 2 : i64, tpu.core_type = #tpu.core_type<tc>, window_params = [{transform_indices = @transform_0, window_bounds = array<i64: 1, 8, 8, 32>}, {transform_indices = @transform_1, window_bounds = array<i64: 1, 8, 1>}, {pipeline_mode = #tpu.pipeline_mode<synchronous>, transform_indices = @transform_2, window_bounds = array<i64: 2, 32, 384>}, {pipeline_mode = #tpu.pipeline_mode<synchronous>, transform_indices = @transform_3, window_bounds = array<i64: 2, 32, 384>}, {pipeline_mode = #tpu.pipeline_mode<synchronous>, transform_indices = @transform_4, window_bounds = array<i64: 2, 1, 384>}, {pipeline_mode = #tpu.pipeline_mode<synchronous>, transform_indices = @transform_5, window_bounds = array<i64: 2, 1, 32>}, {pipeline_mode = #tpu.pipeline_mode<synchronous>, transform_indices = @transform_6, window_bounds = array<i64: 32, 128>}, {pipeline_mode = #tpu.pipeline_mode<synchronous>, transform_indices = @transform_7, window_bounds = array<i64: 1, 128>}, {transform_indices = @transform_8, window_bounds = array<i64: 1, 8, 8, 128>}]} {
    %c0 = arith.constant 0 : index
    %c0_0 = arith.constant 0 : index
    %c0_1 = arith.constant 0 : index
    %0 = vector.load %arg2[%c0, %c0_0, %c0_1] : memref<1x8x1xi32, #tpu.memory_space<vmem>>, vector<1x8x1xi32>
    %1 = vector.shape_cast %0 : vector<1x8x1xi32> to vector<8x1xi32>
    %c0_2 = arith.constant 0 : index
    %c0_3 = arith.constant 0 : index
    %c0_4 = arith.constant 0 : index
    %c0_5 = arith.constant 0 : index
    %2 = vector.load %arg1[%c0_2, %c0_3, %c0_4, %c0_5] : memref<1x8x8x32xf32, #tpu.memory_space<vmem>>, vector<1x8x8x32xf32>
    %3 = vector.shape_cast %2 : vector<1x8x8x32xf32> to vector<8x8x32xf32>
    %4 = vector.shape_cast %3 : vector<8x8x32xf32> to vector<64x32xf32>
    %c0_6 = arith.constant 0 : index
    %c0_7 = arith.constant 0 : index
    %c0_8 = arith.constant 0 : index
    %5 = vector.load %arg3[%c0_6, %c0_7, %c0_8] : memref<2x32x384xbf16, #tpu.memory_space<vmem>>, vector<1x32x384xbf16>
    %6 = vector.shape_cast %5 : vector<1x32x384xbf16> to vector<32x384xbf16>
    %7 = arith.truncf %4 : vector<64x32xf32> to vector<64x32xbf16>
    %cst = arith.constant dense<0.000000e+00> : vector<64x384xf32>
    %8 = tpu.matmul %7, %6, %cst {dimension_numbers = #tpu.dot_dimension_numbers<[1], [0], [0], [1], [0, 0, 1, 1], [], []>} : vector<64x32xbf16>, vector<32x384xbf16>, vector<64x384xf32> -> vector<64x384xf32>
    %c0_9 = arith.constant 0 : index
    %c0_10 = arith.constant 0 : index
    %c0_11 = arith.constant 0 : index
    %9 = vector.load %arg5[%c0_9, %c0_10, %c0_11] : memref<2x1x384xf32, #tpu.memory_space<vmem>>, vector<1x1x384xf32>
    %10 = vector.shape_cast %9 : vector<1x1x384xf32> to vector<1x384xf32>
    %11 = vector.broadcast %10 : vector<1x384xf32> to vector<64x384xf32>
    %12 = arith.addf %8, %11 : vector<64x384xf32>
    %13 = vector.shape_cast %12 : vector<64x384xf32> to vector<8x8x384xf32>
    %c0_12 = arith.constant 0 : index
    %c0_13 = arith.constant 0 : index
    %c0_14 = arith.constant 0 : index
    %14 = vector.load %arg11[%c0_12, %c0_13, %c0_14] : memref<8x8x384xf32, #tpu.memory_space<vmem>>, vector<8x8x384xf32>
    tpu.vector_store %arg11[%c0_12, %c0_13, %c0_14], %13 {strides = array<i32>} : memref<8x8x384xf32, #tpu.memory_space<vmem>>, vector<8x8x384xf32>,
    %c0_15 = arith.constant 0 : index
    %c0_16 = arith.constant 0 : index
    %c0_17 = arith.constant 0 : index
    %15 = vector.load %arg4[%c0_15, %c0_16, %c0_17] : memref<2x32x384xbf16, #tpu.memory_space<vmem>>, vector<1x32x384xbf16>
    %16 = vector.shape_cast %15 : vector<1x32x384xbf16> to vector<32x384xbf16>
    %c0_18 = arith.constant 0 : index
    %c0_19 = arith.constant 0 : index
    %c0_20 = arith.constant 0 : index
    %17 = vector.load %arg6[%c0_18, %c0_19, %c0_20] : memref<2x1x32xf32, #tpu.memory_space<vmem>>, vector<1x1x32xf32>
    %18 = vector.shape_cast %17 : vector<1x1x32xf32> to vector<1x32xf32>
    %19 = vector.shape_cast %18 : vector<1x32xf32> to vector<1x32xf32>
    %20 = vector.broadcast %19 : vector<1x32xf32> to vector<8x32xf32>
    %cst_21 = arith.constant 0.000000e+00 : f32
    %21 = vector.broadcast %cst_21 : f32 to vector<8x32xf32>
    %c0_i32 = arith.constant 0 : i32
    %22 = arith.index_cast %c0_i32 : i32 to index
    %c0_22 = arith.constant 0 : index
    %c0_23 = arith.constant 0 : index
    %23 = vector.load %arg11[%22, %c0_22, %c0_23] : memref<8x8x384xf32, #tpu.memory_space<vmem>>, vector<1x8x384xf32>
    %24 = vector.shape_cast %23 : vector<1x8x384xf32> to vector<8x384xf32>
    %25 = arith.truncf %21 : vector<8x32xf32> to vector<8x32xbf16>
    %cst_24 = arith.constant dense<0.000000e+00> : vector<8x384xf32>
    %26 = tpu.matmul %25, %16, %cst_24 {dimension_numbers = #tpu.dot_dimension_numbers<[1], [0], [0], [1], [0, 0, 1, 1], [], []>} : vector<8x32xbf16>, vector<32x384xbf16>, vector<8x384xf32> -> vector<8x384xf32>
    %27 = vector.extract_strided_slice %24 {offsets = [0, 0], sizes = [8, 32], strides = [1, 1]} : vector<8x384xf32> to vector<8x32xf32>
    %28 = vector.extract_strided_slice %26 {offsets = [0, 0], sizes = [8, 32], strides = [1, 1]} : vector<8x384xf32> to vector<8x32xf32>
    %29 = arith.addf %27, %28 : vector<8x32xf32>
    %30 = arith.negf %29 : vector<8x32xf32>
    %31 = math.exp %30 : vector<8x32xf32>
    %cst_25 = arith.constant 1.000000e+00 : f32
    %32 = vector.broadcast %cst_25 : f32 to vector<8x32xf32>
    %33 = arith.addf %32, %31 : vector<8x32xf32>
    %34 = arith.divf %32, %33 : vector<8x32xf32>
    %35 = vector.extract_strided_slice %24 {offsets = [0, 128], sizes = [8, 32], strides = [1, 1]} : vector<8x384xf32> to vector<8x32xf32>
    %36 = vector.extract_strided_slice %26 {offsets = [0, 128], sizes = [8, 32], strides = [1, 1]} : vector<8x384xf32> to vector<8x32xf32>
    %37 = arith.addf %35, %36 : vector<8x32xf32>
    %38 = arith.negf %37 : vector<8x32xf32>
    %39 = math.exp %38 : vector<8x32xf32>
    %cst_26 = arith.constant 1.000000e+00 : f32
    %40 = vector.broadcast %cst_26 : f32 to vector<8x32xf32>
    %41 = arith.addf %40, %39 : vector<8x32xf32>
    %42 = arith.divf %40, %41 : vector<8x32xf32>
    %43 = vector.extract_strided_slice %24 {offsets = [0, 256], sizes = [8, 32], strides = [1, 1]} : vector<8x384xf32> to vector<8x32xf32>
    %44 = vector.extract_strided_slice %26 {offsets = [0, 256], sizes = [8, 32], strides = [1, 1]} : vector<8x384xf32> to vector<8x32xf32>
    %45 = arith.addf %44, %20 : vector<8x32xf32>
    %46 = arith.mulf %34, %45 : vector<8x32xf32>
    %47 = arith.addf %43, %46 : vector<8x32xf32>
    %48 = math.tanh %47 : vector<8x32xf32>
    %49 = arith.subf %21, %48 : vector<8x32xf32>
    %50 = arith.mulf %42, %49 : vector<8x32xf32>
    %51 = arith.addf %48, %50 : vector<8x32xf32>
    %52 = vector.broadcast %c0_i32 : i32 to vector<8x1xi32>
    %53 = arith.cmpi sgt, %1, %52 : vector<8x1xi32>
    %54 = arith.extui %53 : vector<8x1xi1> to vector<8x1xi32>
    %55 = arith.sitofp %54 : vector<8x1xi32> to vector<8x1xf32>
    %56 = arith.subf %51, %21 : vector<8x32xf32>
    %57 = vector.broadcast %55 : vector<8x1xf32> to vector<8x32xf32>
    %58 = arith.mulf %57, %56 : vector<8x32xf32>
    %59 = arith.addf %21, %58 : vector<8x32xf32>
    %60 = vector.broadcast %55 : vector<8x1xf32> to vector<8x32xf32>
    %61 = arith.mulf %60, %59 : vector<8x32xf32>
    %62 = arith.index_cast %c0_i32 : i32 to index
    %c0_27 = arith.constant 0 : index
    %c0_28 = arith.constant 0 : index
    %63 = vector.load %arg10[%62, %c0_27, %c0_28] : memref<8x8x32xf32, #tpu.memory_space<vmem>>, vector<1x8x32xf32>
    %64 = vector.shape_cast %63 : vector<1x8x32xf32> to vector<8x32xf32>
    %65 = vector.shape_cast %61 : vector<8x32xf32> to vector<1x8x32xf32>
    tpu.vector_store %arg10[%62, %c0_27, %c0_28], %65 {strides = array<i32>} : memref<8x8x32xf32, #tpu.memory_space<vmem>>, vector<1x8x32xf32>,
    %c1_i32 = arith.constant 1 : i32
    %66 = arith.index_cast %c1_i32 : i32 to index
    %c0_29 = arith.constant 0 : index
    %c0_30 = arith.constant 0 : index
    %67 = vector.load %arg11[%66, %c0_29, %c0_30] : memref<8x8x384xf32, #tpu.memory_space<vmem>>, vector<1x8x384xf32>
    %68 = vector.shape_cast %67 : vector<1x8x384xf32> to vector<8x384xf32>
    %69 = arith.truncf %59 : vector<8x32xf32> to vector<8x32xbf16>
    %cst_31 = arith.constant dense<0.000000e+00> : vector<8x384xf32>
    %70 = tpu.matmul %69, %16, %cst_31 {dimension_numbers = #tpu.dot_dimension_numbers<[1], [0], [0], [1], [0, 0, 1, 1], [], []>} : vector<8x32xbf16>, vector<32x384xbf16>, vector<8x384xf32> -> vector<8x384xf32>
    %71 = vector.extract_strided_slice %68 {offsets = [0, 0], sizes = [8, 32], strides = [1, 1]} : vector<8x384xf32> to vector<8x32xf32>
    %72 = vector.extract_strided_slice %70 {offsets = [0, 0], sizes = [8, 32], strides = [1, 1]} : vector<8x384xf32> to vector<8x32xf32>
    %73 = arith.addf %71, %72 : vector<8x32xf32>
    %74 = arith.negf %73 : vector<8x32xf32>
    %75 = math.exp %74 : vector<8x32xf32>
    %cst_32 = arith.constant 1.000000e+00 : f32
    %76 = vector.broadcast %cst_32 : f32 to vector<8x32xf32>
    %77 = arith.addf %76, %75 : vector<8x32xf32>
    %78 = arith.divf %76, %77 : vector<8x32xf32>
    %79 = vector.extract_strided_slice %68 {offsets = [0, 128], sizes = [8, 32], strides = [1, 1]} : vector<8x384xf32> to vector<8x32xf32>
    %80 = vector.extract_strided_slice %70 {offsets = [0, 128], sizes = [8, 32], strides = [1, 1]} : vector<8x384xf32> to vector<8x32xf32>
    %81 = arith.addf %79, %80 : vector<8x32xf32>
    %82 = arith.negf %81 : vector<8x32xf32>
    %83 = math.exp %82 : vector<8x32xf32>
    %cst_33 = arith.constant 1.000000e+00 : f32
    %84 = vector.broadcast %cst_33 : f32 to vector<8x32xf32>
    %85 = arith.addf %84, %83 : vector<8x32xf32>
    %86 = arith.divf %84, %85 : vector<8x32xf32>
    %87 = vector.extract_strided_slice %68 {offsets = [0, 256], sizes = [8, 32], strides = [1, 1]} : vector<8x384xf32> to vector<8x32xf32>
    %88 = vector.extract_strided_slice %70 {offsets = [0, 256], sizes = [8, 32], strides = [1, 1]} : vector<8x384xf32> to vector<8x32xf32>
    %89 = arith.addf %88, %20 : vector<8x32xf32>
    %90 = arith.mulf %78, %89 : vector<8x32xf32>
    %91 = arith.addf %87, %90 : vector<8x32xf32>
    %92 = math.tanh %91 : vector<8x32xf32>
    %93 = arith.subf %59, %92 : vector<8x32xf32>
    %94 = arith.mulf %86, %93 : vector<8x32xf32>
    %95 = arith.addf %92, %94 : vector<8x32xf32>
    %96 = vector.broadcast %c1_i32 : i32 to vector<8x1xi32>
    %97 = arith.cmpi sgt, %1, %96 : vector<8x1xi32>
    %98 = arith.extui %97 : vector<8x1xi1> to vector<8x1xi32>
    %99 = arith.sitofp %98 : vector<8x1xi32> to vector<8x1xf32>
    %100 = arith.subf %95, %59 : vector<8x32xf32>
    %101 = vector.broadcast %99 : vector<8x1xf32> to vector<8x32xf32>
    %102 = arith.mulf %101, %100 : vector<8x32xf32>
    %103 = arith.addf %59, %102 : vector<8x32xf32>
    %104 = vector.broadcast %99 : vector<8x1xf32> to vector<8x32xf32>
    %105 = arith.mulf %104, %103 : vector<8x32xf32>
    %106 = arith.index_cast %c1_i32 : i32 to index
    %c0_34 = arith.constant 0 : index
    %c0_35 = arith.constant 0 : index
    %107 = vector.load %arg10[%106, %c0_34, %c0_35] : memref<8x8x32xf32, #tpu.memory_space<vmem>>, vector<1x8x32xf32>
    %108 = vector.shape_cast %107 : vector<1x8x32xf32> to vector<8x32xf32>
    %109 = vector.shape_cast %105 : vector<8x32xf32> to vector<1x8x32xf32>
    tpu.vector_store %arg10[%106, %c0_34, %c0_35], %109 {strides = array<i32>} : memref<8x8x32xf32, #tpu.memory_space<vmem>>, vector<1x8x32xf32>,
    %c2_i32 = arith.constant 2 : i32
    %110 = arith.index_cast %c2_i32 : i32 to index
    %c0_36 = arith.constant 0 : index
    %c0_37 = arith.constant 0 : index
    %111 = vector.load %arg11[%110, %c0_36, %c0_37] : memref<8x8x384xf32, #tpu.memory_space<vmem>>, vector<1x8x384xf32>
    %112 = vector.shape_cast %111 : vector<1x8x384xf32> to vector<8x384xf32>
    %113 = arith.truncf %103 : vector<8x32xf32> to vector<8x32xbf16>
    %cst_38 = arith.constant dense<0.000000e+00> : vector<8x384xf32>
    %114 = tpu.matmul %113, %16, %cst_38 {dimension_numbers = #tpu.dot_dimension_numbers<[1], [0], [0], [1], [0, 0, 1, 1], [], []>} : vector<8x32xbf16>, vector<32x384xbf16>, vector<8x384xf32> -> vector<8x384xf32>
    %115 = vector.extract_strided_slice %112 {offsets = [0, 0], sizes = [8, 32], strides = [1, 1]} : vector<8x384xf32> to vector<8x32xf32>
    %116 = vector.extract_strided_slice %114 {offsets = [0, 0], sizes = [8, 32], strides = [1, 1]} : vector<8x384xf32> to vector<8x32xf32>
    %117 = arith.addf %115, %116 : vector<8x32xf32>
    %118 = arith.negf %117 : vector<8x32xf32>
    %119 = math.exp %118 : vector<8x32xf32>
    %cst_39 = arith.constant 1.000000e+00 : f32
    %120 = vector.broadcast %cst_39 : f32 to vector<8x32xf32>
    %121 = arith.addf %120, %119 : vector<8x32xf32>
    %122 = arith.divf %120, %121 : vector<8x32xf32>
    %123 = vector.extract_strided_slice %112 {offsets = [0, 128], sizes = [8, 32], strides = [1, 1]} : vector<8x384xf32> to vector<8x32xf32>
    %124 = vector.extract_strided_slice %114 {offsets = [0, 128], sizes = [8, 32], strides = [1, 1]} : vector<8x384xf32> to vector<8x32xf32>
    %125 = arith.addf %123, %124 : vector<8x32xf32>
    %126 = arith.negf %125 : vector<8x32xf32>
    %127 = math.exp %126 : vector<8x32xf32>
    %cst_40 = arith.constant 1.000000e+00 : f32
    %128 = vector.broadcast %cst_40 : f32 to vector<8x32xf32>
    %129 = arith.addf %128, %127 : vector<8x32xf32>
    %130 = arith.divf %128, %129 : vector<8x32xf32>
    %131 = vector.extract_strided_slice %112 {offsets = [0, 256], sizes = [8, 32], strides = [1, 1]} : vector<8x384xf32> to vector<8x32xf32>
    %132 = vector.extract_strided_slice %114 {offsets = [0, 256], sizes = [8, 32], strides = [1, 1]} : vector<8x384xf32> to vector<8x32xf32>
    %133 = arith.addf %132, %20 : vector<8x32xf32>
    %134 = arith.mulf %122, %133 : vector<8x32xf32>
    %135 = arith.addf %131, %134 : vector<8x32xf32>
    %136 = math.tanh %135 : vector<8x32xf32>
    %137 = arith.subf %103, %136 : vector<8x32xf32>
    %138 = arith.mulf %130, %137 : vector<8x32xf32>
    %139 = arith.addf %136, %138 : vector<8x32xf32>
    %140 = vector.broadcast %c2_i32 : i32 to vector<8x1xi32>
    %141 = arith.cmpi sgt, %1, %140 : vector<8x1xi32>
    %142 = arith.extui %141 : vector<8x1xi1> to vector<8x1xi32>
    %143 = arith.sitofp %142 : vector<8x1xi32> to vector<8x1xf32>
    %144 = arith.subf %139, %103 : vector<8x32xf32>
    %145 = vector.broadcast %143 : vector<8x1xf32> to vector<8x32xf32>
    %146 = arith.mulf %145, %144 : vector<8x32xf32>
    %147 = arith.addf %103, %146 : vector<8x32xf32>
    %148 = vector.broadcast %143 : vector<8x1xf32> to vector<8x32xf32>
    %149 = arith.mulf %148, %147 : vector<8x32xf32>
    %150 = arith.index_cast %c2_i32 : i32 to index
    %c0_41 = arith.constant 0 : index
    %c0_42 = arith.constant 0 : index
    %151 = vector.load %arg10[%150, %c0_41, %c0_42] : memref<8x8x32xf32, #tpu.memory_space<vmem>>, vector<1x8x32xf32>
    %152 = vector.shape_cast %151 : vector<1x8x32xf32> to vector<8x32xf32>
    %153 = vector.shape_cast %149 : vector<8x32xf32> to vector<1x8x32xf32>
    tpu.vector_store %arg10[%150, %c0_41, %c0_42], %153 {strides = array<i32>} : memref<8x8x32xf32, #tpu.memory_space<vmem>>, vector<1x8x32xf32>,
    %c3_i32 = arith.constant 3 : i32
    %154 = arith.index_cast %c3_i32 : i32 to index
    %c0_43 = arith.constant 0 : index
    %c0_44 = arith.constant 0 : index
    %155 = vector.load %arg11[%154, %c0_43, %c0_44] : memref<8x8x384xf32, #tpu.memory_space<vmem>>, vector<1x8x384xf32>
    %156 = vector.shape_cast %155 : vector<1x8x384xf32> to vector<8x384xf32>
    %157 = arith.truncf %147 : vector<8x32xf32> to vector<8x32xbf16>
    %cst_45 = arith.constant dense<0.000000e+00> : vector<8x384xf32>
    %158 = tpu.matmul %157, %16, %cst_45 {dimension_numbers = #tpu.dot_dimension_numbers<[1], [0], [0], [1], [0, 0, 1, 1], [], []>} : vector<8x32xbf16>, vector<32x384xbf16>, vector<8x384xf32> -> vector<8x384xf32>
    %159 = vector.extract_strided_slice %156 {offsets = [0, 0], sizes = [8, 32], strides = [1, 1]} : vector<8x384xf32> to vector<8x32xf32>
    %160 = vector.extract_strided_slice %158 {offsets = [0, 0], sizes = [8, 32], strides = [1, 1]} : vector<8x384xf32> to vector<8x32xf32>
    %161 = arith.addf %159, %160 : vector<8x32xf32>
    %162 = arith.negf %161 : vector<8x32xf32>
    %163 = math.exp %162 : vector<8x32xf32>
    %cst_46 = arith.constant 1.000000e+00 : f32
    %164 = vector.broadcast %cst_46 : f32 to vector<8x32xf32>
    %165 = arith.addf %164, %163 : vector<8x32xf32>
    %166 = arith.divf %164, %165 : vector<8x32xf32>
    %167 = vector.extract_strided_slice %156 {offsets = [0, 128], sizes = [8, 32], strides = [1, 1]} : vector<8x384xf32> to vector<8x32xf32>
    %168 = vector.extract_strided_slice %158 {offsets = [0, 128], sizes = [8, 32], strides = [1, 1]} : vector<8x384xf32> to vector<8x32xf32>
    %169 = arith.addf %167, %168 : vector<8x32xf32>
    %170 = arith.negf %169 : vector<8x32xf32>
    %171 = math.exp %170 : vector<8x32xf32>
    %cst_47 = arith.constant 1.000000e+00 : f32
    %172 = vector.broadcast %cst_47 : f32 to vector<8x32xf32>
    %173 = arith.addf %172, %171 : vector<8x32xf32>
    %174 = arith.divf %172, %173 : vector<8x32xf32>
    %175 = vector.extract_strided_slice %156 {offsets = [0, 256], sizes = [8, 32], strides = [1, 1]} : vector<8x384xf32> to vector<8x32xf32>
    %176 = vector.extract_strided_slice %158 {offsets = [0, 256], sizes = [8, 32], strides = [1, 1]} : vector<8x384xf32> to vector<8x32xf32>
    %177 = arith.addf %176, %20 : vector<8x32xf32>
    %178 = arith.mulf %166, %177 : vector<8x32xf32>
    %179 = arith.addf %175, %178 : vector<8x32xf32>
    %180 = math.tanh %179 : vector<8x32xf32>
    %181 = arith.subf %147, %180 : vector<8x32xf32>
    %182 = arith.mulf %174, %181 : vector<8x32xf32>
    %183 = arith.addf %180, %182 : vector<8x32xf32>
    %184 = vector.broadcast %c3_i32 : i32 to vector<8x1xi32>
    %185 = arith.cmpi sgt, %1, %184 : vector<8x1xi32>
    %186 = arith.extui %185 : vector<8x1xi1> to vector<8x1xi32>
    %187 = arith.sitofp %186 : vector<8x1xi32> to vector<8x1xf32>
    %188 = arith.subf %183, %147 : vector<8x32xf32>
    %189 = vector.broadcast %187 : vector<8x1xf32> to vector<8x32xf32>
    %190 = arith.mulf %189, %188 : vector<8x32xf32>
    %191 = arith.addf %147, %190 : vector<8x32xf32>
    %192 = vector.broadcast %187 : vector<8x1xf32> to vector<8x32xf32>
    %193 = arith.mulf %192, %191 : vector<8x32xf32>
    %194 = arith.index_cast %c3_i32 : i32 to index
    %c0_48 = arith.constant 0 : index
    %c0_49 = arith.constant 0 : index
    %195 = vector.load %arg10[%194, %c0_48, %c0_49] : memref<8x8x32xf32, #tpu.memory_space<vmem>>, vector<1x8x32xf32>
    %196 = vector.shape_cast %195 : vector<1x8x32xf32> to vector<8x32xf32>
    %197 = vector.shape_cast %193 : vector<8x32xf32> to vector<1x8x32xf32>
    tpu.vector_store %arg10[%194, %c0_48, %c0_49], %197 {strides = array<i32>} : memref<8x8x32xf32, #tpu.memory_space<vmem>>, vector<1x8x32xf32>,
    %c4_i32 = arith.constant 4 : i32
    %198 = arith.index_cast %c4_i32 : i32 to index
    %c0_50 = arith.constant 0 : index
    %c0_51 = arith.constant 0 : index
    %199 = vector.load %arg11[%198, %c0_50, %c0_51] : memref<8x8x384xf32, #tpu.memory_space<vmem>>, vector<1x8x384xf32>
    %200 = vector.shape_cast %199 : vector<1x8x384xf32> to vector<8x384xf32>
    %201 = arith.truncf %191 : vector<8x32xf32> to vector<8x32xbf16>
    %cst_52 = arith.constant dense<0.000000e+00> : vector<8x384xf32>
    %202 = tpu.matmul %201, %16, %cst_52 {dimension_numbers = #tpu.dot_dimension_numbers<[1], [0], [0], [1], [0, 0, 1, 1], [], []>} : vector<8x32xbf16>, vector<32x384xbf16>, vector<8x384xf32> -> vector<8x384xf32>
    %203 = vector.extract_strided_slice %200 {offsets = [0, 0], sizes = [8, 32], strides = [1, 1]} : vector<8x384xf32> to vector<8x32xf32>
    %204 = vector.extract_strided_slice %202 {offsets = [0, 0], sizes = [8, 32], strides = [1, 1]} : vector<8x384xf32> to vector<8x32xf32>
    %205 = arith.addf %203, %204 : vector<8x32xf32>
    %206 = arith.negf %205 : vector<8x32xf32>
    %207 = math.exp %206 : vector<8x32xf32>
    %cst_53 = arith.constant 1.000000e+00 : f32
    %208 = vector.broadcast %cst_53 : f32 to vector<8x32xf32>
    %209 = arith.addf %208, %207 : vector<8x32xf32>
    %210 = arith.divf %208, %209 : vector<8x32xf32>
    %211 = vector.extract_strided_slice %200 {offsets = [0, 128], sizes = [8, 32], strides = [1, 1]} : vector<8x384xf32> to vector<8x32xf32>
    %212 = vector.extract_strided_slice %202 {offsets = [0, 128], sizes = [8, 32], strides = [1, 1]} : vector<8x384xf32> to vector<8x32xf32>
    %213 = arith.addf %211, %212 : vector<8x32xf32>
    %214 = arith.negf %213 : vector<8x32xf32>
    %215 = math.exp %214 : vector<8x32xf32>
    %cst_54 = arith.constant 1.000000e+00 : f32
    %216 = vector.broadcast %cst_54 : f32 to vector<8x32xf32>
    %217 = arith.addf %216, %215 : vector<8x32xf32>
    %218 = arith.divf %216, %217 : vector<8x32xf32>
    %219 = vector.extract_strided_slice %200 {offsets = [0, 256], sizes = [8, 32], strides = [1, 1]} : vector<8x384xf32> to vector<8x32xf32>
    %220 = vector.extract_strided_slice %202 {offsets = [0, 256], sizes = [8, 32], strides = [1, 1]} : vector<8x384xf32> to vector<8x32xf32>
    %221 = arith.addf %220, %20 : vector<8x32xf32>
    %222 = arith.mulf %210, %221 : vector<8x32xf32>
    %223 = arith.addf %219, %222 : vector<8x32xf32>
    %224 = math.tanh %223 : vector<8x32xf32>
    %225 = arith.subf %191, %224 : vector<8x32xf32>
    %226 = arith.mulf %218, %225 : vector<8x32xf32>
    %227 = arith.addf %224, %226 : vector<8x32xf32>
    %228 = vector.broadcast %c4_i32 : i32 to vector<8x1xi32>
    %229 = arith.cmpi sgt, %1, %228 : vector<8x1xi32>
    %230 = arith.extui %229 : vector<8x1xi1> to vector<8x1xi32>
    %231 = arith.sitofp %230 : vector<8x1xi32> to vector<8x1xf32>
    %232 = arith.subf %227, %191 : vector<8x32xf32>
    %233 = vector.broadcast %231 : vector<8x1xf32> to vector<8x32xf32>
    %234 = arith.mulf %233, %232 : vector<8x32xf32>
    %235 = arith.addf %191, %234 : vector<8x32xf32>
    %236 = vector.broadcast %231 : vector<8x1xf32> to vector<8x32xf32>
    %237 = arith.mulf %236, %235 : vector<8x32xf32>
    %238 = arith.index_cast %c4_i32 : i32 to index
    %c0_55 = arith.constant 0 : index
    %c0_56 = arith.constant 0 : index
    %239 = vector.load %arg10[%238, %c0_55, %c0_56] : memref<8x8x32xf32, #tpu.memory_space<vmem>>, vector<1x8x32xf32>
    %240 = vector.shape_cast %239 : vector<1x8x32xf32> to vector<8x32xf32>
    %241 = vector.shape_cast %237 : vector<8x32xf32> to vector<1x8x32xf32>
    tpu.vector_store %arg10[%238, %c0_55, %c0_56], %241 {strides = array<i32>} : memref<8x8x32xf32, #tpu.memory_space<vmem>>, vector<1x8x32xf32>,
    %c5_i32 = arith.constant 5 : i32
    %242 = arith.index_cast %c5_i32 : i32 to index
    %c0_57 = arith.constant 0 : index
    %c0_58 = arith.constant 0 : index
    %243 = vector.load %arg11[%242, %c0_57, %c0_58] : memref<8x8x384xf32, #tpu.memory_space<vmem>>, vector<1x8x384xf32>
    %244 = vector.shape_cast %243 : vector<1x8x384xf32> to vector<8x384xf32>
    %245 = arith.truncf %235 : vector<8x32xf32> to vector<8x32xbf16>
    %cst_59 = arith.constant dense<0.000000e+00> : vector<8x384xf32>
    %246 = tpu.matmul %245, %16, %cst_59 {dimension_numbers = #tpu.dot_dimension_numbers<[1], [0], [0], [1], [0, 0, 1, 1], [], []>} : vector<8x32xbf16>, vector<32x384xbf16>, vector<8x384xf32> -> vector<8x384xf32>
    %247 = vector.extract_strided_slice %244 {offsets = [0, 0], sizes = [8, 32], strides = [1, 1]} : vector<8x384xf32> to vector<8x32xf32>
    %248 = vector.extract_strided_slice %246 {offsets = [0, 0], sizes = [8, 32], strides = [1, 1]} : vector<8x384xf32> to vector<8x32xf32>
    %249 = arith.addf %247, %248 : vector<8x32xf32>
    %250 = arith.negf %249 : vector<8x32xf32>
    %251 = math.exp %250 : vector<8x32xf32>
    %cst_60 = arith.constant 1.000000e+00 : f32
    %252 = vector.broadcast %cst_60 : f32 to vector<8x32xf32>
    %253 = arith.addf %252, %251 : vector<8x32xf32>
    %254 = arith.divf %252, %253 : vector<8x32xf32>
    %255 = vector.extract_strided_slice %244 {offsets = [0, 128], sizes = [8, 32], strides = [1, 1]} : vector<8x384xf32> to vector<8x32xf32>
    %256 = vector.extract_strided_slice %246 {offsets = [0, 128], sizes = [8, 32], strides = [1, 1]} : vector<8x384xf32> to vector<8x32xf32>
    %257 = arith.addf %255, %256 : vector<8x32xf32>
    %258 = arith.negf %257 : vector<8x32xf32>
    %259 = math.exp %258 : vector<8x32xf32>
    %cst_61 = arith.constant 1.000000e+00 : f32
    %260 = vector.broadcast %cst_61 : f32 to vector<8x32xf32>
    %261 = arith.addf %260, %259 : vector<8x32xf32>
    %262 = arith.divf %260, %261 : vector<8x32xf32>
    %263 = vector.extract_strided_slice %244 {offsets = [0, 256], sizes = [8, 32], strides = [1, 1]} : vector<8x384xf32> to vector<8x32xf32>
    %264 = vector.extract_strided_slice %246 {offsets = [0, 256], sizes = [8, 32], strides = [1, 1]} : vector<8x384xf32> to vector<8x32xf32>
    %265 = arith.addf %264, %20 : vector<8x32xf32>
    %266 = arith.mulf %254, %265 : vector<8x32xf32>
    %267 = arith.addf %263, %266 : vector<8x32xf32>
    %268 = math.tanh %267 : vector<8x32xf32>
    %269 = arith.subf %235, %268 : vector<8x32xf32>
    %270 = arith.mulf %262, %269 : vector<8x32xf32>
    %271 = arith.addf %268, %270 : vector<8x32xf32>
    %272 = vector.broadcast %c5_i32 : i32 to vector<8x1xi32>
    %273 = arith.cmpi sgt, %1, %272 : vector<8x1xi32>
    %274 = arith.extui %273 : vector<8x1xi1> to vector<8x1xi32>
    %275 = arith.sitofp %274 : vector<8x1xi32> to vector<8x1xf32>
    %276 = arith.subf %271, %235 : vector<8x32xf32>
    %277 = vector.broadcast %275 : vector<8x1xf32> to vector<8x32xf32>
    %278 = arith.mulf %277, %276 : vector<8x32xf32>
    %279 = arith.addf %235, %278 : vector<8x32xf32>
    %280 = vector.broadcast %275 : vector<8x1xf32> to vector<8x32xf32>
    %281 = arith.mulf %280, %279 : vector<8x32xf32>
    %282 = arith.index_cast %c5_i32 : i32 to index
    %c0_62 = arith.constant 0 : index
    %c0_63 = arith.constant 0 : index
    %283 = vector.load %arg10[%282, %c0_62, %c0_63] : memref<8x8x32xf32, #tpu.memory_space<vmem>>, vector<1x8x32xf32>
    %284 = vector.shape_cast %283 : vector<1x8x32xf32> to vector<8x32xf32>
    %285 = vector.shape_cast %281 : vector<8x32xf32> to vector<1x8x32xf32>
    tpu.vector_store %arg10[%282, %c0_62, %c0_63], %285 {strides = array<i32>} : memref<8x8x32xf32, #tpu.memory_space<vmem>>, vector<1x8x32xf32>,
    %c6_i32 = arith.constant 6 : i32
    %286 = arith.index_cast %c6_i32 : i32 to index
    %c0_64 = arith.constant 0 : index
    %c0_65 = arith.constant 0 : index
    %287 = vector.load %arg11[%286, %c0_64, %c0_65] : memref<8x8x384xf32, #tpu.memory_space<vmem>>, vector<1x8x384xf32>
    %288 = vector.shape_cast %287 : vector<1x8x384xf32> to vector<8x384xf32>
    %289 = arith.truncf %279 : vector<8x32xf32> to vector<8x32xbf16>
    %cst_66 = arith.constant dense<0.000000e+00> : vector<8x384xf32>
    %290 = tpu.matmul %289, %16, %cst_66 {dimension_numbers = #tpu.dot_dimension_numbers<[1], [0], [0], [1], [0, 0, 1, 1], [], []>} : vector<8x32xbf16>, vector<32x384xbf16>, vector<8x384xf32> -> vector<8x384xf32>
    %291 = vector.extract_strided_slice %288 {offsets = [0, 0], sizes = [8, 32], strides = [1, 1]} : vector<8x384xf32> to vector<8x32xf32>
    %292 = vector.extract_strided_slice %290 {offsets = [0, 0], sizes = [8, 32], strides = [1, 1]} : vector<8x384xf32> to vector<8x32xf32>
    %293 = arith.addf %291, %292 : vector<8x32xf32>
    %294 = arith.negf %293 : vector<8x32xf32>
    %295 = math.exp %294 : vector<8x32xf32>
    %cst_67 = arith.constant 1.000000e+00 : f32
    %296 = vector.broadcast %cst_67 : f32 to vector<8x32xf32>
    %297 = arith.addf %296, %295 : vector<8x32xf32>
    %298 = arith.divf %296, %297 : vector<8x32xf32>
    %299 = vector.extract_strided_slice %288 {offsets = [0, 128], sizes = [8, 32], strides = [1, 1]} : vector<8x384xf32> to vector<8x32xf32>
    %300 = vector.extract_strided_slice %290 {offsets = [0, 128], sizes = [8, 32], strides = [1, 1]} : vector<8x384xf32> to vector<8x32xf32>
    %301 = arith.addf %299, %300 : vector<8x32xf32>
    %302 = arith.negf %301 : vector<8x32xf32>
    %303 = math.exp %302 : vector<8x32xf32>
    %cst_68 = arith.constant 1.000000e+00 : f32
    %304 = vector.broadcast %cst_68 : f32 to vector<8x32xf32>
    %305 = arith.addf %304, %303 : vector<8x32xf32>
    %306 = arith.divf %304, %305 : vector<8x32xf32>
    %307 = vector.extract_strided_slice %288 {offsets = [0, 256], sizes = [8, 32], strides = [1, 1]} : vector<8x384xf32> to vector<8x32xf32>
    %308 = vector.extract_strided_slice %290 {offsets = [0, 256], sizes = [8, 32], strides = [1, 1]} : vector<8x384xf32> to vector<8x32xf32>
    %309 = arith.addf %308, %20 : vector<8x32xf32>
    %310 = arith.mulf %298, %309 : vector<8x32xf32>
    %311 = arith.addf %307, %310 : vector<8x32xf32>
    %312 = math.tanh %311 : vector<8x32xf32>
    %313 = arith.subf %279, %312 : vector<8x32xf32>
    %314 = arith.mulf %306, %313 : vector<8x32xf32>
    %315 = arith.addf %312, %314 : vector<8x32xf32>
    %316 = vector.broadcast %c6_i32 : i32 to vector<8x1xi32>
    %317 = arith.cmpi sgt, %1, %316 : vector<8x1xi32>
    %318 = arith.extui %317 : vector<8x1xi1> to vector<8x1xi32>
    %319 = arith.sitofp %318 : vector<8x1xi32> to vector<8x1xf32>
    %320 = arith.subf %315, %279 : vector<8x32xf32>
    %321 = vector.broadcast %319 : vector<8x1xf32> to vector<8x32xf32>
    %322 = arith.mulf %321, %320 : vector<8x32xf32>
    %323 = arith.addf %279, %322 : vector<8x32xf32>
    %324 = vector.broadcast %319 : vector<8x1xf32> to vector<8x32xf32>
    %325 = arith.mulf %324, %323 : vector<8x32xf32>
    %326 = arith.index_cast %c6_i32 : i32 to index
    %c0_69 = arith.constant 0 : index
    %c0_70 = arith.constant 0 : index
    %327 = vector.load %arg10[%326, %c0_69, %c0_70] : memref<8x8x32xf32, #tpu.memory_space<vmem>>, vector<1x8x32xf32>
    %328 = vector.shape_cast %327 : vector<1x8x32xf32> to vector<8x32xf32>
    %329 = vector.shape_cast %325 : vector<8x32xf32> to vector<1x8x32xf32>
    tpu.vector_store %arg10[%326, %c0_69, %c0_70], %329 {strides = array<i32>} : memref<8x8x32xf32, #tpu.memory_space<vmem>>, vector<1x8x32xf32>,
    %c7_i32 = arith.constant 7 : i32
    %330 = arith.index_cast %c7_i32 : i32 to index
    %c0_71 = arith.constant 0 : index
    %c0_72 = arith.constant 0 : index
    %331 = vector.load %arg11[%330, %c0_71, %c0_72] : memref<8x8x384xf32, #tpu.memory_space<vmem>>, vector<1x8x384xf32>
    %332 = vector.shape_cast %331 : vector<1x8x384xf32> to vector<8x384xf32>
    %333 = arith.truncf %323 : vector<8x32xf32> to vector<8x32xbf16>
    %cst_73 = arith.constant dense<0.000000e+00> : vector<8x384xf32>
    %334 = tpu.matmul %333, %16, %cst_73 {dimension_numbers = #tpu.dot_dimension_numbers<[1], [0], [0], [1], [0, 0, 1, 1], [], []>} : vector<8x32xbf16>, vector<32x384xbf16>, vector<8x384xf32> -> vector<8x384xf32>
    %335 = vector.extract_strided_slice %332 {offsets = [0, 0], sizes = [8, 32], strides = [1, 1]} : vector<8x384xf32> to vector<8x32xf32>
    %336 = vector.extract_strided_slice %334 {offsets = [0, 0], sizes = [8, 32], strides = [1, 1]} : vector<8x384xf32> to vector<8x32xf32>
    %337 = arith.addf %335, %336 : vector<8x32xf32>
    %338 = arith.negf %337 : vector<8x32xf32>
    %339 = math.exp %338 : vector<8x32xf32>
    %cst_74 = arith.constant 1.000000e+00 : f32
    %340 = vector.broadcast %cst_74 : f32 to vector<8x32xf32>
    %341 = arith.addf %340, %339 : vector<8x32xf32>
    %342 = arith.divf %340, %341 : vector<8x32xf32>
    %343 = vector.extract_strided_slice %332 {offsets = [0, 128], sizes = [8, 32], strides = [1, 1]} : vector<8x384xf32> to vector<8x32xf32>
    %344 = vector.extract_strided_slice %334 {offsets = [0, 128], sizes = [8, 32], strides = [1, 1]} : vector<8x384xf32> to vector<8x32xf32>
    %345 = arith.addf %343, %344 : vector<8x32xf32>
    %346 = arith.negf %345 : vector<8x32xf32>
    %347 = math.exp %346 : vector<8x32xf32>
    %cst_75 = arith.constant 1.000000e+00 : f32
    %348 = vector.broadcast %cst_75 : f32 to vector<8x32xf32>
    %349 = arith.addf %348, %347 : vector<8x32xf32>
    %350 = arith.divf %348, %349 : vector<8x32xf32>
    %351 = vector.extract_strided_slice %332 {offsets = [0, 256], sizes = [8, 32], strides = [1, 1]} : vector<8x384xf32> to vector<8x32xf32>
    %352 = vector.extract_strided_slice %334 {offsets = [0, 256], sizes = [8, 32], strides = [1, 1]} : vector<8x384xf32> to vector<8x32xf32>
    %353 = arith.addf %352, %20 : vector<8x32xf32>
    %354 = arith.mulf %342, %353 : vector<8x32xf32>
    %355 = arith.addf %351, %354 : vector<8x32xf32>
    %356 = math.tanh %355 : vector<8x32xf32>
    %357 = arith.subf %323, %356 : vector<8x32xf32>
    %358 = arith.mulf %350, %357 : vector<8x32xf32>
    %359 = arith.addf %356, %358 : vector<8x32xf32>
    %360 = vector.broadcast %c7_i32 : i32 to vector<8x1xi32>
    %361 = arith.cmpi sgt, %1, %360 : vector<8x1xi32>
    %362 = arith.extui %361 : vector<8x1xi1> to vector<8x1xi32>
    %363 = arith.sitofp %362 : vector<8x1xi32> to vector<8x1xf32>
    %364 = arith.subf %359, %323 : vector<8x32xf32>
    %365 = vector.broadcast %363 : vector<8x1xf32> to vector<8x32xf32>
    %366 = arith.mulf %365, %364 : vector<8x32xf32>
    %367 = arith.addf %323, %366 : vector<8x32xf32>
    %368 = vector.broadcast %363 : vector<8x1xf32> to vector<8x32xf32>
    %369 = arith.mulf %368, %367 : vector<8x32xf32>
    %370 = arith.index_cast %c7_i32 : i32 to index
    %c0_76 = arith.constant 0 : index
    %c0_77 = arith.constant 0 : index
    %371 = vector.load %arg10[%370, %c0_76, %c0_77] : memref<8x8x32xf32, #tpu.memory_space<vmem>>, vector<1x8x32xf32>
    %372 = vector.shape_cast %371 : vector<1x8x32xf32> to vector<8x32xf32>
    %373 = vector.shape_cast %369 : vector<8x32xf32> to vector<1x8x32xf32>
    tpu.vector_store %arg10[%370, %c0_76, %c0_77], %373 {strides = array<i32>} : memref<8x8x32xf32, #tpu.memory_space<vmem>>, vector<1x8x32xf32>,
    %c8_i32 = arith.constant 8 : i32
    %c0_78 = arith.constant 0 : index
    %c0_79 = arith.constant 0 : index
    %c0_80 = arith.constant 0 : index
    %374 = vector.load %arg10[%c0_78, %c0_79, %c0_80] : memref<8x8x32xf32, #tpu.memory_space<vmem>>, vector<8x8x32xf32>
    %375 = vector.shape_cast %374 : vector<8x8x32xf32> to vector<64x32xf32>
    %c1 = arith.constant 1 : index
    %c0_81 = arith.constant 0 : index
    %c0_82 = arith.constant 0 : index
    %376 = vector.load %arg3[%c1, %c0_81, %c0_82] : memref<2x32x384xbf16, #tpu.memory_space<vmem>>, vector<1x32x384xbf16>
    %377 = vector.shape_cast %376 : vector<1x32x384xbf16> to vector<32x384xbf16>
    %378 = arith.truncf %375 : vector<64x32xf32> to vector<64x32xbf16>
    %cst_83 = arith.constant dense<0.000000e+00> : vector<64x384xf32>
    %379 = tpu.matmul %378, %377, %cst_83 {dimension_numbers = #tpu.dot_dimension_numbers<[1], [0], [0], [1], [0, 0, 1, 1], [], []>} : vector<64x32xbf16>, vector<32x384xbf16>, vector<64x384xf32> -> vector<64x384xf32>
    %c1_84 = arith.constant 1 : index
    %c0_85 = arith.constant 0 : index
    %c0_86 = arith.constant 0 : index
    %380 = vector.load %arg5[%c1_84, %c0_85, %c0_86] : memref<2x1x384xf32, #tpu.memory_space<vmem>>, vector<1x1x384xf32>
    %381 = vector.shape_cast %380 : vector<1x1x384xf32> to vector<1x384xf32>
    %382 = vector.broadcast %381 : vector<1x384xf32> to vector<64x384xf32>
    %383 = arith.addf %379, %382 : vector<64x384xf32>
    %384 = vector.shape_cast %383 : vector<64x384xf32> to vector<8x8x384xf32>
    %c0_87 = arith.constant 0 : index
    %c0_88 = arith.constant 0 : index
    %c0_89 = arith.constant 0 : index
    %385 = vector.load %arg11[%c0_87, %c0_88, %c0_89] : memref<8x8x384xf32, #tpu.memory_space<vmem>>, vector<8x8x384xf32>
    tpu.vector_store %arg11[%c0_87, %c0_88, %c0_89], %384 {strides = array<i32>} : memref<8x8x384xf32, #tpu.memory_space<vmem>>, vector<8x8x384xf32>,
    %c1_90 = arith.constant 1 : index
    %c0_91 = arith.constant 0 : index
    %c0_92 = arith.constant 0 : index
    %386 = vector.load %arg4[%c1_90, %c0_91, %c0_92] : memref<2x32x384xbf16, #tpu.memory_space<vmem>>, vector<1x32x384xbf16>
    %387 = vector.shape_cast %386 : vector<1x32x384xbf16> to vector<32x384xbf16>
    %c1_93 = arith.constant 1 : index
    %c0_94 = arith.constant 0 : index
    %c0_95 = arith.constant 0 : index
    %388 = vector.load %arg6[%c1_93, %c0_94, %c0_95] : memref<2x1x32xf32, #tpu.memory_space<vmem>>, vector<1x1x32xf32>
    %389 = vector.shape_cast %388 : vector<1x1x32xf32> to vector<1x32xf32>
    %390 = vector.shape_cast %389 : vector<1x32xf32> to vector<1x32xf32>
    %391 = vector.broadcast %390 : vector<1x32xf32> to vector<8x32xf32>
    %cst_96 = arith.constant 0.000000e+00 : f32
    %392 = vector.broadcast %cst_96 : f32 to vector<8x32xf32>
    %c0_i32_97 = arith.constant 0 : i32
    %393 = arith.index_cast %c0_i32_97 : i32 to index
    %c0_98 = arith.constant 0 : index
    %c0_99 = arith.constant 0 : index
    %394 = vector.load %arg11[%393, %c0_98, %c0_99] : memref<8x8x384xf32, #tpu.memory_space<vmem>>, vector<1x8x384xf32>
    %395 = vector.shape_cast %394 : vector<1x8x384xf32> to vector<8x384xf32>
    %396 = arith.truncf %392 : vector<8x32xf32> to vector<8x32xbf16>
    %cst_100 = arith.constant dense<0.000000e+00> : vector<8x384xf32>
    %397 = tpu.matmul %396, %387, %cst_100 {dimension_numbers = #tpu.dot_dimension_numbers<[1], [0], [0], [1], [0, 0, 1, 1], [], []>} : vector<8x32xbf16>, vector<32x384xbf16>, vector<8x384xf32> -> vector<8x384xf32>
    %398 = vector.extract_strided_slice %395 {offsets = [0, 0], sizes = [8, 32], strides = [1, 1]} : vector<8x384xf32> to vector<8x32xf32>
    %399 = vector.extract_strided_slice %397 {offsets = [0, 0], sizes = [8, 32], strides = [1, 1]} : vector<8x384xf32> to vector<8x32xf32>
    %400 = arith.addf %398, %399 : vector<8x32xf32>
    %401 = arith.negf %400 : vector<8x32xf32>
    %402 = math.exp %401 : vector<8x32xf32>
    %cst_101 = arith.constant 1.000000e+00 : f32
    %403 = vector.broadcast %cst_101 : f32 to vector<8x32xf32>
    %404 = arith.addf %403, %402 : vector<8x32xf32>
    %405 = arith.divf %403, %404 : vector<8x32xf32>
    %406 = vector.extract_strided_slice %395 {offsets = [0, 128], sizes = [8, 32], strides = [1, 1]} : vector<8x384xf32> to vector<8x32xf32>
    %407 = vector.extract_strided_slice %397 {offsets = [0, 128], sizes = [8, 32], strides = [1, 1]} : vector<8x384xf32> to vector<8x32xf32>
    %408 = arith.addf %406, %407 : vector<8x32xf32>
    %409 = arith.negf %408 : vector<8x32xf32>
    %410 = math.exp %409 : vector<8x32xf32>
    %cst_102 = arith.constant 1.000000e+00 : f32
    %411 = vector.broadcast %cst_102 : f32 to vector<8x32xf32>
    %412 = arith.addf %411, %410 : vector<8x32xf32>
    %413 = arith.divf %411, %412 : vector<8x32xf32>
    %414 = vector.extract_strided_slice %395 {offsets = [0, 256], sizes = [8, 32], strides = [1, 1]} : vector<8x384xf32> to vector<8x32xf32>
    %415 = vector.extract_strided_slice %397 {offsets = [0, 256], sizes = [8, 32], strides = [1, 1]} : vector<8x384xf32> to vector<8x32xf32>
    %416 = arith.addf %415, %391 : vector<8x32xf32>
    %417 = arith.mulf %405, %416 : vector<8x32xf32>
    %418 = arith.addf %414, %417 : vector<8x32xf32>
    %419 = math.tanh %418 : vector<8x32xf32>
    %420 = arith.subf %392, %419 : vector<8x32xf32>
    %421 = arith.mulf %413, %420 : vector<8x32xf32>
    %422 = arith.addf %419, %421 : vector<8x32xf32>
    %423 = vector.broadcast %c0_i32_97 : i32 to vector<8x1xi32>
    %424 = arith.cmpi sgt, %1, %423 : vector<8x1xi32>
    %425 = arith.extui %424 : vector<8x1xi1> to vector<8x1xi32>
    %426 = arith.sitofp %425 : vector<8x1xi32> to vector<8x1xf32>
    %427 = arith.subf %422, %392 : vector<8x32xf32>
    %428 = vector.broadcast %426 : vector<8x1xf32> to vector<8x32xf32>
    %429 = arith.mulf %428, %427 : vector<8x32xf32>
    %430 = arith.addf %392, %429 : vector<8x32xf32>
    %431 = vector.broadcast %426 : vector<8x1xf32> to vector<8x32xf32>
    %432 = arith.mulf %431, %430 : vector<8x32xf32>
    %433 = arith.index_cast %c0_i32_97 : i32 to index
    %c0_103 = arith.constant 0 : index
    %c0_104 = arith.constant 0 : index
    %434 = vector.load %arg10[%433, %c0_103, %c0_104] : memref<8x8x32xf32, #tpu.memory_space<vmem>>, vector<1x8x32xf32>
    %435 = vector.shape_cast %434 : vector<1x8x32xf32> to vector<8x32xf32>
    %436 = vector.shape_cast %432 : vector<8x32xf32> to vector<1x8x32xf32>
    tpu.vector_store %arg10[%433, %c0_103, %c0_104], %436 {strides = array<i32>} : memref<8x8x32xf32, #tpu.memory_space<vmem>>, vector<1x8x32xf32>,
    %c1_i32_105 = arith.constant 1 : i32
    %437 = arith.index_cast %c1_i32_105 : i32 to index
    %c0_106 = arith.constant 0 : index
    %c0_107 = arith.constant 0 : index
    %438 = vector.load %arg11[%437, %c0_106, %c0_107] : memref<8x8x384xf32, #tpu.memory_space<vmem>>, vector<1x8x384xf32>
    %439 = vector.shape_cast %438 : vector<1x8x384xf32> to vector<8x384xf32>
    %440 = arith.truncf %430 : vector<8x32xf32> to vector<8x32xbf16>
    %cst_108 = arith.constant dense<0.000000e+00> : vector<8x384xf32>
    %441 = tpu.matmul %440, %387, %cst_108 {dimension_numbers = #tpu.dot_dimension_numbers<[1], [0], [0], [1], [0, 0, 1, 1], [], []>} : vector<8x32xbf16>, vector<32x384xbf16>, vector<8x384xf32> -> vector<8x384xf32>
    %442 = vector.extract_strided_slice %439 {offsets = [0, 0], sizes = [8, 32], strides = [1, 1]} : vector<8x384xf32> to vector<8x32xf32>
    %443 = vector.extract_strided_slice %441 {offsets = [0, 0], sizes = [8, 32], strides = [1, 1]} : vector<8x384xf32> to vector<8x32xf32>
    %444 = arith.addf %442, %443 : vector<8x32xf32>
    %445 = arith.negf %444 : vector<8x32xf32>
    %446 = math.exp %445 : vector<8x32xf32>
    %cst_109 = arith.constant 1.000000e+00 : f32
    %447 = vector.broadcast %cst_109 : f32 to vector<8x32xf32>
    %448 = arith.addf %447, %446 : vector<8x32xf32>
    %449 = arith.divf %447, %448 : vector<8x32xf32>
    %450 = vector.extract_strided_slice %439 {offsets = [0, 128], sizes = [8, 32], strides = [1, 1]} : vector<8x384xf32> to vector<8x32xf32>
    %451 = vector.extract_strided_slice %441 {offsets = [0, 128], sizes = [8, 32], strides = [1, 1]} : vector<8x384xf32> to vector<8x32xf32>
    %452 = arith.addf %450, %451 : vector<8x32xf32>
    %453 = arith.negf %452 : vector<8x32xf32>
    %454 = math.exp %453 : vector<8x32xf32>
    %cst_110 = arith.constant 1.000000e+00 : f32
    %455 = vector.broadcast %cst_110 : f32 to vector<8x32xf32>
    %456 = arith.addf %455, %454 : vector<8x32xf32>
    %457 = arith.divf %455, %456 : vector<8x32xf32>
    %458 = vector.extract_strided_slice %439 {offsets = [0, 256], sizes = [8, 32], strides = [1, 1]} : vector<8x384xf32> to vector<8x32xf32>
    %459 = vector.extract_strided_slice %441 {offsets = [0, 256], sizes = [8, 32], strides = [1, 1]} : vector<8x384xf32> to vector<8x32xf32>
    %460 = arith.addf %459, %391 : vector<8x32xf32>
    %461 = arith.mulf %449, %460 : vector<8x32xf32>
    %462 = arith.addf %458, %461 : vector<8x32xf32>
    %463 = math.tanh %462 : vector<8x32xf32>
    %464 = arith.subf %430, %463 : vector<8x32xf32>
    %465 = arith.mulf %457, %464 : vector<8x32xf32>
    %466 = arith.addf %463, %465 : vector<8x32xf32>
    %467 = vector.broadcast %c1_i32_105 : i32 to vector<8x1xi32>
    %468 = arith.cmpi sgt, %1, %467 : vector<8x1xi32>
    %469 = arith.extui %468 : vector<8x1xi1> to vector<8x1xi32>
    %470 = arith.sitofp %469 : vector<8x1xi32> to vector<8x1xf32>
    %471 = arith.subf %466, %430 : vector<8x32xf32>
    %472 = vector.broadcast %470 : vector<8x1xf32> to vector<8x32xf32>
    %473 = arith.mulf %472, %471 : vector<8x32xf32>
    %474 = arith.addf %430, %473 : vector<8x32xf32>
    %475 = vector.broadcast %470 : vector<8x1xf32> to vector<8x32xf32>
    %476 = arith.mulf %475, %474 : vector<8x32xf32>
    %477 = arith.index_cast %c1_i32_105 : i32 to index
    %c0_111 = arith.constant 0 : index
    %c0_112 = arith.constant 0 : index
    %478 = vector.load %arg10[%477, %c0_111, %c0_112] : memref<8x8x32xf32, #tpu.memory_space<vmem>>, vector<1x8x32xf32>
    %479 = vector.shape_cast %478 : vector<1x8x32xf32> to vector<8x32xf32>
    %480 = vector.shape_cast %476 : vector<8x32xf32> to vector<1x8x32xf32>
    tpu.vector_store %arg10[%477, %c0_111, %c0_112], %480 {strides = array<i32>} : memref<8x8x32xf32, #tpu.memory_space<vmem>>, vector<1x8x32xf32>,
    %c2_i32_113 = arith.constant 2 : i32
    %481 = arith.index_cast %c2_i32_113 : i32 to index
    %c0_114 = arith.constant 0 : index
    %c0_115 = arith.constant 0 : index
    %482 = vector.load %arg11[%481, %c0_114, %c0_115] : memref<8x8x384xf32, #tpu.memory_space<vmem>>, vector<1x8x384xf32>
    %483 = vector.shape_cast %482 : vector<1x8x384xf32> to vector<8x384xf32>
    %484 = arith.truncf %474 : vector<8x32xf32> to vector<8x32xbf16>
    %cst_116 = arith.constant dense<0.000000e+00> : vector<8x384xf32>
    %485 = tpu.matmul %484, %387, %cst_116 {dimension_numbers = #tpu.dot_dimension_numbers<[1], [0], [0], [1], [0, 0, 1, 1], [], []>} : vector<8x32xbf16>, vector<32x384xbf16>, vector<8x384xf32> -> vector<8x384xf32>
    %486 = vector.extract_strided_slice %483 {offsets = [0, 0], sizes = [8, 32], strides = [1, 1]} : vector<8x384xf32> to vector<8x32xf32>
    %487 = vector.extract_strided_slice %485 {offsets = [0, 0], sizes = [8, 32], strides = [1, 1]} : vector<8x384xf32> to vector<8x32xf32>
    %488 = arith.addf %486, %487 : vector<8x32xf32>
    %489 = arith.negf %488 : vector<8x32xf32>
    %490 = math.exp %489 : vector<8x32xf32>
    %cst_117 = arith.constant 1.000000e+00 : f32
    %491 = vector.broadcast %cst_117 : f32 to vector<8x32xf32>
    %492 = arith.addf %491, %490 : vector<8x32xf32>
    %493 = arith.divf %491, %492 : vector<8x32xf32>
    %494 = vector.extract_strided_slice %483 {offsets = [0, 128], sizes = [8, 32], strides = [1, 1]} : vector<8x384xf32> to vector<8x32xf32>
    %495 = vector.extract_strided_slice %485 {offsets = [0, 128], sizes = [8, 32], strides = [1, 1]} : vector<8x384xf32> to vector<8x32xf32>
    %496 = arith.addf %494, %495 : vector<8x32xf32>
    %497 = arith.negf %496 : vector<8x32xf32>
    %498 = math.exp %497 : vector<8x32xf32>
    %cst_118 = arith.constant 1.000000e+00 : f32
    %499 = vector.broadcast %cst_118 : f32 to vector<8x32xf32>
    %500 = arith.addf %499, %498 : vector<8x32xf32>
    %501 = arith.divf %499, %500 : vector<8x32xf32>
    %502 = vector.extract_strided_slice %483 {offsets = [0, 256], sizes = [8, 32], strides = [1, 1]} : vector<8x384xf32> to vector<8x32xf32>
    %503 = vector.extract_strided_slice %485 {offsets = [0, 256], sizes = [8, 32], strides = [1, 1]} : vector<8x384xf32> to vector<8x32xf32>
    %504 = arith.addf %503, %391 : vector<8x32xf32>
    %505 = arith.mulf %493, %504 : vector<8x32xf32>
    %506 = arith.addf %502, %505 : vector<8x32xf32>
    %507 = math.tanh %506 : vector<8x32xf32>
    %508 = arith.subf %474, %507 : vector<8x32xf32>
    %509 = arith.mulf %501, %508 : vector<8x32xf32>
    %510 = arith.addf %507, %509 : vector<8x32xf32>
    %511 = vector.broadcast %c2_i32_113 : i32 to vector<8x1xi32>
    %512 = arith.cmpi sgt, %1, %511 : vector<8x1xi32>
    %513 = arith.extui %512 : vector<8x1xi1> to vector<8x1xi32>
    %514 = arith.sitofp %513 : vector<8x1xi32> to vector<8x1xf32>
    %515 = arith.subf %510, %474 : vector<8x32xf32>
    %516 = vector.broadcast %514 : vector<8x1xf32> to vector<8x32xf32>
    %517 = arith.mulf %516, %515 : vector<8x32xf32>
    %518 = arith.addf %474, %517 : vector<8x32xf32>
    %519 = vector.broadcast %514 : vector<8x1xf32> to vector<8x32xf32>
    %520 = arith.mulf %519, %518 : vector<8x32xf32>
    %521 = arith.index_cast %c2_i32_113 : i32 to index
    %c0_119 = arith.constant 0 : index
    %c0_120 = arith.constant 0 : index
    %522 = vector.load %arg10[%521, %c0_119, %c0_120] : memref<8x8x32xf32, #tpu.memory_space<vmem>>, vector<1x8x32xf32>
    %523 = vector.shape_cast %522 : vector<1x8x32xf32> to vector<8x32xf32>
    %524 = vector.shape_cast %520 : vector<8x32xf32> to vector<1x8x32xf32>
    tpu.vector_store %arg10[%521, %c0_119, %c0_120], %524 {strides = array<i32>} : memref<8x8x32xf32, #tpu.memory_space<vmem>>, vector<1x8x32xf32>,
    %c3_i32_121 = arith.constant 3 : i32
    %525 = arith.index_cast %c3_i32_121 : i32 to index
    %c0_122 = arith.constant 0 : index
    %c0_123 = arith.constant 0 : index
    %526 = vector.load %arg11[%525, %c0_122, %c0_123] : memref<8x8x384xf32, #tpu.memory_space<vmem>>, vector<1x8x384xf32>
    %527 = vector.shape_cast %526 : vector<1x8x384xf32> to vector<8x384xf32>
    %528 = arith.truncf %518 : vector<8x32xf32> to vector<8x32xbf16>
    %cst_124 = arith.constant dense<0.000000e+00> : vector<8x384xf32>
    %529 = tpu.matmul %528, %387, %cst_124 {dimension_numbers = #tpu.dot_dimension_numbers<[1], [0], [0], [1], [0, 0, 1, 1], [], []>} : vector<8x32xbf16>, vector<32x384xbf16>, vector<8x384xf32> -> vector<8x384xf32>
    %530 = vector.extract_strided_slice %527 {offsets = [0, 0], sizes = [8, 32], strides = [1, 1]} : vector<8x384xf32> to vector<8x32xf32>
    %531 = vector.extract_strided_slice %529 {offsets = [0, 0], sizes = [8, 32], strides = [1, 1]} : vector<8x384xf32> to vector<8x32xf32>
    %532 = arith.addf %530, %531 : vector<8x32xf32>
    %533 = arith.negf %532 : vector<8x32xf32>
    %534 = math.exp %533 : vector<8x32xf32>
    %cst_125 = arith.constant 1.000000e+00 : f32
    %535 = vector.broadcast %cst_125 : f32 to vector<8x32xf32>
    %536 = arith.addf %535, %534 : vector<8x32xf32>
    %537 = arith.divf %535, %536 : vector<8x32xf32>
    %538 = vector.extract_strided_slice %527 {offsets = [0, 128], sizes = [8, 32], strides = [1, 1]} : vector<8x384xf32> to vector<8x32xf32>
    %539 = vector.extract_strided_slice %529 {offsets = [0, 128], sizes = [8, 32], strides = [1, 1]} : vector<8x384xf32> to vector<8x32xf32>
    %540 = arith.addf %538, %539 : vector<8x32xf32>
    %541 = arith.negf %540 : vector<8x32xf32>
    %542 = math.exp %541 : vector<8x32xf32>
    %cst_126 = arith.constant 1.000000e+00 : f32
    %543 = vector.broadcast %cst_126 : f32 to vector<8x32xf32>
    %544 = arith.addf %543, %542 : vector<8x32xf32>
    %545 = arith.divf %543, %544 : vector<8x32xf32>
    %546 = vector.extract_strided_slice %527 {offsets = [0, 256], sizes = [8, 32], strides = [1, 1]} : vector<8x384xf32> to vector<8x32xf32>
    %547 = vector.extract_strided_slice %529 {offsets = [0, 256], sizes = [8, 32], strides = [1, 1]} : vector<8x384xf32> to vector<8x32xf32>
    %548 = arith.addf %547, %391 : vector<8x32xf32>
    %549 = arith.mulf %537, %548 : vector<8x32xf32>
    %550 = arith.addf %546, %549 : vector<8x32xf32>
    %551 = math.tanh %550 : vector<8x32xf32>
    %552 = arith.subf %518, %551 : vector<8x32xf32>
    %553 = arith.mulf %545, %552 : vector<8x32xf32>
    %554 = arith.addf %551, %553 : vector<8x32xf32>
    %555 = vector.broadcast %c3_i32_121 : i32 to vector<8x1xi32>
    %556 = arith.cmpi sgt, %1, %555 : vector<8x1xi32>
    %557 = arith.extui %556 : vector<8x1xi1> to vector<8x1xi32>
    %558 = arith.sitofp %557 : vector<8x1xi32> to vector<8x1xf32>
    %559 = arith.subf %554, %518 : vector<8x32xf32>
    %560 = vector.broadcast %558 : vector<8x1xf32> to vector<8x32xf32>
    %561 = arith.mulf %560, %559 : vector<8x32xf32>
    %562 = arith.addf %518, %561 : vector<8x32xf32>
    %563 = vector.broadcast %558 : vector<8x1xf32> to vector<8x32xf32>
    %564 = arith.mulf %563, %562 : vector<8x32xf32>
    %565 = arith.index_cast %c3_i32_121 : i32 to index
    %c0_127 = arith.constant 0 : index
    %c0_128 = arith.constant 0 : index
    %566 = vector.load %arg10[%565, %c0_127, %c0_128] : memref<8x8x32xf32, #tpu.memory_space<vmem>>, vector<1x8x32xf32>
    %567 = vector.shape_cast %566 : vector<1x8x32xf32> to vector<8x32xf32>
    %568 = vector.shape_cast %564 : vector<8x32xf32> to vector<1x8x32xf32>
    tpu.vector_store %arg10[%565, %c0_127, %c0_128], %568 {strides = array<i32>} : memref<8x8x32xf32, #tpu.memory_space<vmem>>, vector<1x8x32xf32>,
    %c4_i32_129 = arith.constant 4 : i32
    %569 = arith.index_cast %c4_i32_129 : i32 to index
    %c0_130 = arith.constant 0 : index
    %c0_131 = arith.constant 0 : index
    %570 = vector.load %arg11[%569, %c0_130, %c0_131] : memref<8x8x384xf32, #tpu.memory_space<vmem>>, vector<1x8x384xf32>
    %571 = vector.shape_cast %570 : vector<1x8x384xf32> to vector<8x384xf32>
    %572 = arith.truncf %562 : vector<8x32xf32> to vector<8x32xbf16>
    %cst_132 = arith.constant dense<0.000000e+00> : vector<8x384xf32>
    %573 = tpu.matmul %572, %387, %cst_132 {dimension_numbers = #tpu.dot_dimension_numbers<[1], [0], [0], [1], [0, 0, 1, 1], [], []>} : vector<8x32xbf16>, vector<32x384xbf16>, vector<8x384xf32> -> vector<8x384xf32>
    %574 = vector.extract_strided_slice %571 {offsets = [0, 0], sizes = [8, 32], strides = [1, 1]} : vector<8x384xf32> to vector<8x32xf32>
    %575 = vector.extract_strided_slice %573 {offsets = [0, 0], sizes = [8, 32], strides = [1, 1]} : vector<8x384xf32> to vector<8x32xf32>
    %576 = arith.addf %574, %575 : vector<8x32xf32>
    %577 = arith.negf %576 : vector<8x32xf32>
    %578 = math.exp %577 : vector<8x32xf32>
    %cst_133 = arith.constant 1.000000e+00 : f32
    %579 = vector.broadcast %cst_133 : f32 to vector<8x32xf32>
    %580 = arith.addf %579, %578 : vector<8x32xf32>
    %581 = arith.divf %579, %580 : vector<8x32xf32>
    %582 = vector.extract_strided_slice %571 {offsets = [0, 128], sizes = [8, 32], strides = [1, 1]} : vector<8x384xf32> to vector<8x32xf32>
    %583 = vector.extract_strided_slice %573 {offsets = [0, 128], sizes = [8, 32], strides = [1, 1]} : vector<8x384xf32> to vector<8x32xf32>
    %584 = arith.addf %582, %583 : vector<8x32xf32>
    %585 = arith.negf %584 : vector<8x32xf32>
    %586 = math.exp %585 : vector<8x32xf32>
    %cst_134 = arith.constant 1.000000e+00 : f32
    %587 = vector.broadcast %cst_134 : f32 to vector<8x32xf32>
    %588 = arith.addf %587, %586 : vector<8x32xf32>
    %589 = arith.divf %587, %588 : vector<8x32xf32>
    %590 = vector.extract_strided_slice %571 {offsets = [0, 256], sizes = [8, 32], strides = [1, 1]} : vector<8x384xf32> to vector<8x32xf32>
    %591 = vector.extract_strided_slice %573 {offsets = [0, 256], sizes = [8, 32], strides = [1, 1]} : vector<8x384xf32> to vector<8x32xf32>
    %592 = arith.addf %591, %391 : vector<8x32xf32>
    %593 = arith.mulf %581, %592 : vector<8x32xf32>
    %594 = arith.addf %590, %593 : vector<8x32xf32>
    %595 = math.tanh %594 : vector<8x32xf32>
    %596 = arith.subf %562, %595 : vector<8x32xf32>
    %597 = arith.mulf %589, %596 : vector<8x32xf32>
    %598 = arith.addf %595, %597 : vector<8x32xf32>
    %599 = vector.broadcast %c4_i32_129 : i32 to vector<8x1xi32>
    %600 = arith.cmpi sgt, %1, %599 : vector<8x1xi32>
    %601 = arith.extui %600 : vector<8x1xi1> to vector<8x1xi32>
    %602 = arith.sitofp %601 : vector<8x1xi32> to vector<8x1xf32>
    %603 = arith.subf %598, %562 : vector<8x32xf32>
    %604 = vector.broadcast %602 : vector<8x1xf32> to vector<8x32xf32>
    %605 = arith.mulf %604, %603 : vector<8x32xf32>
    %606 = arith.addf %562, %605 : vector<8x32xf32>
    %607 = vector.broadcast %602 : vector<8x1xf32> to vector<8x32xf32>
    %608 = arith.mulf %607, %606 : vector<8x32xf32>
    %609 = arith.index_cast %c4_i32_129 : i32 to index
    %c0_135 = arith.constant 0 : index
    %c0_136 = arith.constant 0 : index
    %610 = vector.load %arg10[%609, %c0_135, %c0_136] : memref<8x8x32xf32, #tpu.memory_space<vmem>>, vector<1x8x32xf32>
    %611 = vector.shape_cast %610 : vector<1x8x32xf32> to vector<8x32xf32>
    %612 = vector.shape_cast %608 : vector<8x32xf32> to vector<1x8x32xf32>
    tpu.vector_store %arg10[%609, %c0_135, %c0_136], %612 {strides = array<i32>} : memref<8x8x32xf32, #tpu.memory_space<vmem>>, vector<1x8x32xf32>,
    %c5_i32_137 = arith.constant 5 : i32
    %613 = arith.index_cast %c5_i32_137 : i32 to index
    %c0_138 = arith.constant 0 : index
    %c0_139 = arith.constant 0 : index
    %614 = vector.load %arg11[%613, %c0_138, %c0_139] : memref<8x8x384xf32, #tpu.memory_space<vmem>>, vector<1x8x384xf32>
    %615 = vector.shape_cast %614 : vector<1x8x384xf32> to vector<8x384xf32>
    %616 = arith.truncf %606 : vector<8x32xf32> to vector<8x32xbf16>
    %cst_140 = arith.constant dense<0.000000e+00> : vector<8x384xf32>
    %617 = tpu.matmul %616, %387, %cst_140 {dimension_numbers = #tpu.dot_dimension_numbers<[1], [0], [0], [1], [0, 0, 1, 1], [], []>} : vector<8x32xbf16>, vector<32x384xbf16>, vector<8x384xf32> -> vector<8x384xf32>
    %618 = vector.extract_strided_slice %615 {offsets = [0, 0], sizes = [8, 32], strides = [1, 1]} : vector<8x384xf32> to vector<8x32xf32>
    %619 = vector.extract_strided_slice %617 {offsets = [0, 0], sizes = [8, 32], strides = [1, 1]} : vector<8x384xf32> to vector<8x32xf32>
    %620 = arith.addf %618, %619 : vector<8x32xf32>
    %621 = arith.negf %620 : vector<8x32xf32>
    %622 = math.exp %621 : vector<8x32xf32>
    %cst_141 = arith.constant 1.000000e+00 : f32
    %623 = vector.broadcast %cst_141 : f32 to vector<8x32xf32>
    %624 = arith.addf %623, %622 : vector<8x32xf32>
    %625 = arith.divf %623, %624 : vector<8x32xf32>
    %626 = vector.extract_strided_slice %615 {offsets = [0, 128], sizes = [8, 32], strides = [1, 1]} : vector<8x384xf32> to vector<8x32xf32>
    %627 = vector.extract_strided_slice %617 {offsets = [0, 128], sizes = [8, 32], strides = [1, 1]} : vector<8x384xf32> to vector<8x32xf32>
    %628 = arith.addf %626, %627 : vector<8x32xf32>
    %629 = arith.negf %628 : vector<8x32xf32>
    %630 = math.exp %629 : vector<8x32xf32>
    %cst_142 = arith.constant 1.000000e+00 : f32
    %631 = vector.broadcast %cst_142 : f32 to vector<8x32xf32>
    %632 = arith.addf %631, %630 : vector<8x32xf32>
    %633 = arith.divf %631, %632 : vector<8x32xf32>
    %634 = vector.extract_strided_slice %615 {offsets = [0, 256], sizes = [8, 32], strides = [1, 1]} : vector<8x384xf32> to vector<8x32xf32>
    %635 = vector.extract_strided_slice %617 {offsets = [0, 256], sizes = [8, 32], strides = [1, 1]} : vector<8x384xf32> to vector<8x32xf32>
    %636 = arith.addf %635, %391 : vector<8x32xf32>
    %637 = arith.mulf %625, %636 : vector<8x32xf32>
    %638 = arith.addf %634, %637 : vector<8x32xf32>
    %639 = math.tanh %638 : vector<8x32xf32>
    %640 = arith.subf %606, %639 : vector<8x32xf32>
    %641 = arith.mulf %633, %640 : vector<8x32xf32>
    %642 = arith.addf %639, %641 : vector<8x32xf32>
    %643 = vector.broadcast %c5_i32_137 : i32 to vector<8x1xi32>
    %644 = arith.cmpi sgt, %1, %643 : vector<8x1xi32>
    %645 = arith.extui %644 : vector<8x1xi1> to vector<8x1xi32>
    %646 = arith.sitofp %645 : vector<8x1xi32> to vector<8x1xf32>
    %647 = arith.subf %642, %606 : vector<8x32xf32>
    %648 = vector.broadcast %646 : vector<8x1xf32> to vector<8x32xf32>
    %649 = arith.mulf %648, %647 : vector<8x32xf32>
    %650 = arith.addf %606, %649 : vector<8x32xf32>
    %651 = vector.broadcast %646 : vector<8x1xf32> to vector<8x32xf32>
    %652 = arith.mulf %651, %650 : vector<8x32xf32>
    %653 = arith.index_cast %c5_i32_137 : i32 to index
    %c0_143 = arith.constant 0 : index
    %c0_144 = arith.constant 0 : index
    %654 = vector.load %arg10[%653, %c0_143, %c0_144] : memref<8x8x32xf32, #tpu.memory_space<vmem>>, vector<1x8x32xf32>
    %655 = vector.shape_cast %654 : vector<1x8x32xf32> to vector<8x32xf32>
    %656 = vector.shape_cast %652 : vector<8x32xf32> to vector<1x8x32xf32>
    tpu.vector_store %arg10[%653, %c0_143, %c0_144], %656 {strides = array<i32>} : memref<8x8x32xf32, #tpu.memory_space<vmem>>, vector<1x8x32xf32>,
    %c6_i32_145 = arith.constant 6 : i32
    %657 = arith.index_cast %c6_i32_145 : i32 to index
    %c0_146 = arith.constant 0 : index
    %c0_147 = arith.constant 0 : index
    %658 = vector.load %arg11[%657, %c0_146, %c0_147] : memref<8x8x384xf32, #tpu.memory_space<vmem>>, vector<1x8x384xf32>
    %659 = vector.shape_cast %658 : vector<1x8x384xf32> to vector<8x384xf32>
    %660 = arith.truncf %650 : vector<8x32xf32> to vector<8x32xbf16>
    %cst_148 = arith.constant dense<0.000000e+00> : vector<8x384xf32>
    %661 = tpu.matmul %660, %387, %cst_148 {dimension_numbers = #tpu.dot_dimension_numbers<[1], [0], [0], [1], [0, 0, 1, 1], [], []>} : vector<8x32xbf16>, vector<32x384xbf16>, vector<8x384xf32> -> vector<8x384xf32>
    %662 = vector.extract_strided_slice %659 {offsets = [0, 0], sizes = [8, 32], strides = [1, 1]} : vector<8x384xf32> to vector<8x32xf32>
    %663 = vector.extract_strided_slice %661 {offsets = [0, 0], sizes = [8, 32], strides = [1, 1]} : vector<8x384xf32> to vector<8x32xf32>
    %664 = arith.addf %662, %663 : vector<8x32xf32>
    %665 = arith.negf %664 : vector<8x32xf32>
    %666 = math.exp %665 : vector<8x32xf32>
    %cst_149 = arith.constant 1.000000e+00 : f32
    %667 = vector.broadcast %cst_149 : f32 to vector<8x32xf32>
    %668 = arith.addf %667, %666 : vector<8x32xf32>
    %669 = arith.divf %667, %668 : vector<8x32xf32>
    %670 = vector.extract_strided_slice %659 {offsets = [0, 128], sizes = [8, 32], strides = [1, 1]} : vector<8x384xf32> to vector<8x32xf32>
    %671 = vector.extract_strided_slice %661 {offsets = [0, 128], sizes = [8, 32], strides = [1, 1]} : vector<8x384xf32> to vector<8x32xf32>
    %672 = arith.addf %670, %671 : vector<8x32xf32>
    %673 = arith.negf %672 : vector<8x32xf32>
    %674 = math.exp %673 : vector<8x32xf32>
    %cst_150 = arith.constant 1.000000e+00 : f32
    %675 = vector.broadcast %cst_150 : f32 to vector<8x32xf32>
    %676 = arith.addf %675, %674 : vector<8x32xf32>
    %677 = arith.divf %675, %676 : vector<8x32xf32>
    %678 = vector.extract_strided_slice %659 {offsets = [0, 256], sizes = [8, 32], strides = [1, 1]} : vector<8x384xf32> to vector<8x32xf32>
    %679 = vector.extract_strided_slice %661 {offsets = [0, 256], sizes = [8, 32], strides = [1, 1]} : vector<8x384xf32> to vector<8x32xf32>
    %680 = arith.addf %679, %391 : vector<8x32xf32>
    %681 = arith.mulf %669, %680 : vector<8x32xf32>
    %682 = arith.addf %678, %681 : vector<8x32xf32>
    %683 = math.tanh %682 : vector<8x32xf32>
    %684 = arith.subf %650, %683 : vector<8x32xf32>
    %685 = arith.mulf %677, %684 : vector<8x32xf32>
    %686 = arith.addf %683, %685 : vector<8x32xf32>
    %687 = vector.broadcast %c6_i32_145 : i32 to vector<8x1xi32>
    %688 = arith.cmpi sgt, %1, %687 : vector<8x1xi32>
    %689 = arith.extui %688 : vector<8x1xi1> to vector<8x1xi32>
    %690 = arith.sitofp %689 : vector<8x1xi32> to vector<8x1xf32>
    %691 = arith.subf %686, %650 : vector<8x32xf32>
    %692 = vector.broadcast %690 : vector<8x1xf32> to vector<8x32xf32>
    %693 = arith.mulf %692, %691 : vector<8x32xf32>
    %694 = arith.addf %650, %693 : vector<8x32xf32>
    %695 = vector.broadcast %690 : vector<8x1xf32> to vector<8x32xf32>
    %696 = arith.mulf %695, %694 : vector<8x32xf32>
    %697 = arith.index_cast %c6_i32_145 : i32 to index
    %c0_151 = arith.constant 0 : index
    %c0_152 = arith.constant 0 : index
    %698 = vector.load %arg10[%697, %c0_151, %c0_152] : memref<8x8x32xf32, #tpu.memory_space<vmem>>, vector<1x8x32xf32>
    %699 = vector.shape_cast %698 : vector<1x8x32xf32> to vector<8x32xf32>
    %700 = vector.shape_cast %696 : vector<8x32xf32> to vector<1x8x32xf32>
    tpu.vector_store %arg10[%697, %c0_151, %c0_152], %700 {strides = array<i32>} : memref<8x8x32xf32, #tpu.memory_space<vmem>>, vector<1x8x32xf32>,
    %c7_i32_153 = arith.constant 7 : i32
    %701 = arith.index_cast %c7_i32_153 : i32 to index
    %c0_154 = arith.constant 0 : index
    %c0_155 = arith.constant 0 : index
    %702 = vector.load %arg11[%701, %c0_154, %c0_155] : memref<8x8x384xf32, #tpu.memory_space<vmem>>, vector<1x8x384xf32>
    %703 = vector.shape_cast %702 : vector<1x8x384xf32> to vector<8x384xf32>
    %704 = arith.truncf %694 : vector<8x32xf32> to vector<8x32xbf16>
    %cst_156 = arith.constant dense<0.000000e+00> : vector<8x384xf32>
    %705 = tpu.matmul %704, %387, %cst_156 {dimension_numbers = #tpu.dot_dimension_numbers<[1], [0], [0], [1], [0, 0, 1, 1], [], []>} : vector<8x32xbf16>, vector<32x384xbf16>, vector<8x384xf32> -> vector<8x384xf32>
    %706 = vector.extract_strided_slice %703 {offsets = [0, 0], sizes = [8, 32], strides = [1, 1]} : vector<8x384xf32> to vector<8x32xf32>
    %707 = vector.extract_strided_slice %705 {offsets = [0, 0], sizes = [8, 32], strides = [1, 1]} : vector<8x384xf32> to vector<8x32xf32>
    %708 = arith.addf %706, %707 : vector<8x32xf32>
    %709 = arith.negf %708 : vector<8x32xf32>
    %710 = math.exp %709 : vector<8x32xf32>
    %cst_157 = arith.constant 1.000000e+00 : f32
    %711 = vector.broadcast %cst_157 : f32 to vector<8x32xf32>
    %712 = arith.addf %711, %710 : vector<8x32xf32>
    %713 = arith.divf %711, %712 : vector<8x32xf32>
    %714 = vector.extract_strided_slice %703 {offsets = [0, 128], sizes = [8, 32], strides = [1, 1]} : vector<8x384xf32> to vector<8x32xf32>
    %715 = vector.extract_strided_slice %705 {offsets = [0, 128], sizes = [8, 32], strides = [1, 1]} : vector<8x384xf32> to vector<8x32xf32>
    %716 = arith.addf %714, %715 : vector<8x32xf32>
    %717 = arith.negf %716 : vector<8x32xf32>
    %718 = math.exp %717 : vector<8x32xf32>
    %cst_158 = arith.constant 1.000000e+00 : f32
    %719 = vector.broadcast %cst_158 : f32 to vector<8x32xf32>
    %720 = arith.addf %719, %718 : vector<8x32xf32>
    %721 = arith.divf %719, %720 : vector<8x32xf32>
    %722 = vector.extract_strided_slice %703 {offsets = [0, 256], sizes = [8, 32], strides = [1, 1]} : vector<8x384xf32> to vector<8x32xf32>
    %723 = vector.extract_strided_slice %705 {offsets = [0, 256], sizes = [8, 32], strides = [1, 1]} : vector<8x384xf32> to vector<8x32xf32>
    %724 = arith.addf %723, %391 : vector<8x32xf32>
    %725 = arith.mulf %713, %724 : vector<8x32xf32>
    %726 = arith.addf %722, %725 : vector<8x32xf32>
    %727 = math.tanh %726 : vector<8x32xf32>
    %728 = arith.subf %694, %727 : vector<8x32xf32>
    %729 = arith.mulf %721, %728 : vector<8x32xf32>
    %730 = arith.addf %727, %729 : vector<8x32xf32>
    %731 = vector.broadcast %c7_i32_153 : i32 to vector<8x1xi32>
    %732 = arith.cmpi sgt, %1, %731 : vector<8x1xi32>
    %733 = arith.extui %732 : vector<8x1xi1> to vector<8x1xi32>
    %734 = arith.sitofp %733 : vector<8x1xi32> to vector<8x1xf32>
    %735 = arith.subf %730, %694 : vector<8x32xf32>
    %736 = vector.broadcast %734 : vector<8x1xf32> to vector<8x32xf32>
    %737 = arith.mulf %736, %735 : vector<8x32xf32>
    %738 = arith.addf %694, %737 : vector<8x32xf32>
    %739 = vector.broadcast %734 : vector<8x1xf32> to vector<8x32xf32>
    %740 = arith.mulf %739, %738 : vector<8x32xf32>
    %741 = arith.index_cast %c7_i32_153 : i32 to index
    %c0_159 = arith.constant 0 : index
    %c0_160 = arith.constant 0 : index
    %742 = vector.load %arg10[%741, %c0_159, %c0_160] : memref<8x8x32xf32, #tpu.memory_space<vmem>>, vector<1x8x32xf32>
    %743 = vector.shape_cast %742 : vector<1x8x32xf32> to vector<8x32xf32>
    %744 = vector.shape_cast %740 : vector<8x32xf32> to vector<1x8x32xf32>
    tpu.vector_store %arg10[%741, %c0_159, %c0_160], %744 {strides = array<i32>} : memref<8x8x32xf32, #tpu.memory_space<vmem>>, vector<1x8x32xf32>,
    %c8_i32_161 = arith.constant 8 : i32
    %c0_162 = arith.constant 0 : index
    %c0_163 = arith.constant 0 : index
    %c0_164 = arith.constant 0 : index
    %745 = vector.load %arg10[%c0_162, %c0_163, %c0_164] : memref<8x8x32xf32, #tpu.memory_space<vmem>>, vector<8x8x32xf32>
    %746 = vector.shape_cast %745 : vector<8x8x32xf32> to vector<64x32xf32>
    %c0_165 = arith.constant 0 : index
    %c0_166 = arith.constant 0 : index
    %747 = vector.load %arg7[%c0_165, %c0_166] : memref<32x128xbf16, #tpu.memory_space<vmem>>, vector<32x128xbf16>
    %748 = arith.truncf %746 : vector<64x32xf32> to vector<64x32xbf16>
    %cst_167 = arith.constant dense<0.000000e+00> : vector<64x128xf32>
    %749 = tpu.matmul %748, %747, %cst_167 {dimension_numbers = #tpu.dot_dimension_numbers<[1], [0], [0], [1], [0, 0, 1, 1], [], []>} : vector<64x32xbf16>, vector<32x128xbf16>, vector<64x128xf32> -> vector<64x128xf32>
    %c0_168 = arith.constant 0 : index
    %c0_169 = arith.constant 0 : index
    %750 = vector.load %arg8[%c0_168, %c0_169] : memref<1x128xf32, #tpu.memory_space<vmem>>, vector<1x128xf32>
    %751 = vector.broadcast %750 : vector<1x128xf32> to vector<64x128xf32>
    %752 = arith.addf %749, %751 : vector<64x128xf32>
    %753 = vector.shape_cast %752 : vector<64x128xf32> to vector<8x8x128xf32>
    %c0_170 = arith.constant 0 : index
    %c0_171 = arith.constant 0 : index
    %c0_172 = arith.constant 0 : index
    %c0_173 = arith.constant 0 : index
    %754 = vector.load %arg9[%c0_170, %c0_171, %c0_172, %c0_173] : memref<1x8x8x128xf32, #tpu.memory_space<vmem>>, vector<1x8x8x128xf32>
    %755 = vector.shape_cast %754 : vector<1x8x8x128xf32> to vector<8x8x128xf32>
    %756 = vector.shape_cast %753 : vector<8x8x128xf32> to vector<1x8x8x128xf32>
    tpu.vector_store %arg9[%c0_170, %c0_171, %c0_172, %c0_173], %756 {strides = array<i32>} : memref<1x8x8x128xf32, #tpu.memory_space<vmem>>, vector<1x8x8x128xf32>,
    return
  }
  func.func @transform_0(%arg0: i32) -> (i32, i32, i32, i32) {
    %c0_i32 = arith.constant 0 : i32
    %c0_i32_0 = arith.constant 0 : i32
    %c0_i32_1 = arith.constant 0 : i32
    %c0_i32_2 = arith.constant 0 : i32
    return %arg0, %c0_i32, %c0_i32_0, %c0_i32_1 : i32, i32, i32, i32
  }
  func.func @transform_1(%arg0: i32) -> (i32, i32, i32) {
    %c0_i32 = arith.constant 0 : i32
    %c0_i32_0 = arith.constant 0 : i32
    %c0_i32_1 = arith.constant 0 : i32
    return %arg0, %c0_i32, %c0_i32_0 : i32, i32, i32
  }
  func.func @transform_2(%arg0: i32) -> (i32, i32, i32) {
    %c0_i32 = arith.constant 0 : i32
    %c0_i32_0 = arith.constant 0 : i32
    %c0_i32_1 = arith.constant 0 : i32
    %c0_i32_2 = arith.constant 0 : i32
    return %c0_i32, %c0_i32_0, %c0_i32_1 : i32, i32, i32
  }
  func.func @transform_3(%arg0: i32) -> (i32, i32, i32) {
    %c0_i32 = arith.constant 0 : i32
    %c0_i32_0 = arith.constant 0 : i32
    %c0_i32_1 = arith.constant 0 : i32
    %c0_i32_2 = arith.constant 0 : i32
    return %c0_i32, %c0_i32_0, %c0_i32_1 : i32, i32, i32
  }
  func.func @transform_4(%arg0: i32) -> (i32, i32, i32) {
    %c0_i32 = arith.constant 0 : i32
    %c0_i32_0 = arith.constant 0 : i32
    %c0_i32_1 = arith.constant 0 : i32
    %c0_i32_2 = arith.constant 0 : i32
    return %c0_i32, %c0_i32_0, %c0_i32_1 : i32, i32, i32
  }
  func.func @transform_5(%arg0: i32) -> (i32, i32, i32) {
    %c0_i32 = arith.constant 0 : i32
    %c0_i32_0 = arith.constant 0 : i32
    %c0_i32_1 = arith.constant 0 : i32
    %c0_i32_2 = arith.constant 0 : i32
    return %c0_i32, %c0_i32_0, %c0_i32_1 : i32, i32, i32
  }
  func.func @transform_6(%arg0: i32) -> (i32, i32) {
    %c0_i32 = arith.constant 0 : i32
    %c0_i32_0 = arith.constant 0 : i32
    %c0_i32_1 = arith.constant 0 : i32
    return %c0_i32, %c0_i32_0 : i32, i32
  }
  func.func @transform_7(%arg0: i32) -> (i32, i32) {
    %c0_i32 = arith.constant 0 : i32
    %c0_i32_0 = arith.constant 0 : i32
    %c0_i32_1 = arith.constant 0 : i32
    return %c0_i32, %c0_i32_0 : i32, i32
  }
  func.func @transform_8(%arg0: i32) -> (i32, i32, i32, i32) {
    %c0_i32 = arith.constant 0 : i32
    %c0_i32_0 = arith.constant 0 : i32
    %c0_i32_1 = arith.constant 0 : i32
    %c0_i32_2 = arith.constant 0 : i32
    return %arg0, %c0_i32, %c0_i32_0, %c0_i32_1 : i32, i32, i32, i32
  }
}

</mosaic_0001>

<bundles_post_ra>
// kernel: tpu_custom_call.1
= control target key start
LH: loop header
LB: loop body
LE: loop exit
PB: predicated region body
PF: predicated region fallthrough
CT: control target
= control target key end

     0   :  { %13 = vsyncpa [#allocation5], 0  ;;  %s3579_s0 = inlined_call_operand.hbm [shape: f32[1,8,8,32], index: 0, kind: input, shape index: {}]   ;;  %s3580_s1 = inlined_call_operand.vmem [shape: s32[1,8,1], index: 1, kind: input, shape index: {}]   ;;  %s3581_s2 = inlined_call_operand.hbm [shape: bf16[2,32,384], index: 2, kind: input, shape index: {}]   ;;  %s3582_s3 = inlined_call_operand.hbm [shape: bf16[2,32,384], index: 3, kind: input, shape index: {}]   ;;  %s3583_s4 = inlined_call_operand.vmem [shape: f32[2,1,384], index: 4, kind: input, shape index: {}]   ;;  %s3584_s5 = inlined_call_operand.vmem [shape: f32[2,1,32], index: 5, kind: input, shape index: {}]   ;;  %s3585_s6 = inlined_call_operand.hbm [shape: bf16[32,128], index: 6, kind: input, shape index: {}]   ;;  %s3586_s7 = inlined_call_operand.vmem [shape: f32[1,128], index: 7, kind: input, shape index: {}]   ;;  %s3587_s8 = inlined_call_operand.hbm [shape: f32[1,8,8,128], index: 8, kind: output, shape index: {}]  }
   0x1   :  { %14 = vsyncpa [#allocation8], 0 }
   0x2   :  { %15 = vsyncpa [#allocation11], 0  ;;  %s36_s29 = sshll.u32 %s3581_s2, 4  ;;  %s37_s29 = int_to_ptr.hbm [resolvable:$true] %s36_s29 }
   0x3   :  { %16 = vsyncpa [#allocation6], 0  ;;  %s2852_s30 = smov [#allocation7]   ;;  %s21_s12 = sshll.u32 %s3579_s0, 4  ;;  %s22_s12 = int_to_ptr.hbm [resolvable:$true] %s21_s12 }
   0x4   :  { %s38_s9 = sshll.u32 %s2852_s30, 4  ;;  %s2853_s13 = smov 192   ;;  %s39_s9 = int_to_ptr.vmem [resolvable:$true] %s38_s9 }
   0x5   :  { %s2854_s14 = smov 12   ;;  %s2855_s15 = smov [#allocation4]  }
   0x6   :  { %44 = dma.hbm_to_vmem [thread:$0]  %s37_s29, 1536, %s39_s9, [#allocation8], %s2853_s13, %s2853_s13, %s2854_s14  }
   0x7   :  { %s23_s16 = sshll.u32 %s2855_s15, 4  ;;  %s2856_s17 = smov 128   ;;  %s24_s16 = int_to_ptr.vmem [resolvable:$true] %s23_s16 }
   0x8   :  { %s2857_s18 = smov 8   ;;  %s49_s20 = sshll.u32 %s3582_s3, 4  ;;  %s50_s20 = int_to_ptr.hbm [resolvable:$true] %s49_s20 }
   0x9   :  { %29 = dma.hbm_to_vmem [thread:$0]  %s22_s12, 1024, %s24_s16, [#allocation5], %s2856_s17, %s2856_s17, %s2857_s18  }
   0xa   :  { %s2858_s21 = smov [#allocation9]   ;;  %s66_s24 = sshll.u32 %s3585_s6, 4  ;;  %s67_s24 = int_to_ptr.hbm [resolvable:$true] %s66_s24 }
   0xb   :  { %s51_s0 = sshll.u32 %s2858_s21, 4  ;;  %s2859_s25 = smov [#allocation10]   ;;  %s52_s0 = int_to_ptr.vmem [resolvable:$true] %s51_s0 }
   0xc   :  { %57 = dma.hbm_to_vmem [thread:$0]  %s50_s20, 1536, %s52_s0, [#allocation8], %s2853_s13, %s2853_s13, %s2854_s14  }
   0xd   :  { %s68_s26 = sshll.u32 %s2859_s25, 4  ;;  %s2860_s27 = smov 64   ;;  %s69_s26 = int_to_ptr.vmem [resolvable:$true] %s68_s26 }
   0xe   :  { %s2861_s28 = smov 4  }
   0xf   :  { %74 = dma.hbm_to_vmem [thread:$0]  %s67_s24, 256, %s69_s26, [#allocation11], %s2860_s27, %s2860_s27, %s2861_s28  }
  0x10   :  { %2844 = dma.done.wait [#allocation5], 1024  }
  0x11   :  { %2845 = vsyncadd [#allocation5], 4294966272 }
  0x12   :  { %2846 = dma.done.wait [#allocation8], 3072  }
  0x13   :  { %2847 = vsyncadd [#allocation8], 4294964224 }
  0x14   :  { %2848 = dma.done.wait [#allocation11], 256  }
  0x15   :  { %2849 = vsyncadd [#allocation11], 4294967040  ;;  %v2862_v0 = vmov 0   ;;  %v2309_v1 = vld [vmem:[#allocation7 + $0x18] sm:$0xf]  ;;  %v101_v6 = vld [vmem:[#allocation4 + $0x30] sm:$0xff] }
  0x16   :  { %2556 = vset.pattern.permute.xlu0 %v2862_v0  ;;  %2557 = vset.pattern.permute.xlu1 %v2862_v0  ;;  %v2515_v2 = vld [vmem:[#allocation7 + $0x20] sm:$0xf0]  ;;  %v2297_v3 = vld [vmem:[#allocation7] sm:$0xf]  ;;  %v2512_v5 = vld [vmem:[#allocation7 + $0x8] sm:$0xf0] }
  0x17   :  { %2558 = vset.pattern.permute.xlu2 %v2862_v0  ;;  %v2310_v4 = vor.u32 %v2515_v2, %v2309_v1  ;;  %v2345_v7 = vld [vmem:[#allocation9 + $0x18] sm:$0xf]  ;;  %v2521_v8 = vld [vmem:[#allocation9 + $0x20] sm:$0xf0]  ;;  %v2298_v9 = vor.u32 %v2512_v5, %v2297_v3  ;;  %v97_v11 = vld [vmem:[#allocation4 + $0x10] sm:$0xff]  ;;  %vm155_vm0 = vcmask 261120  }
  0x18   :  { %v102_v10 = vld [vmem:[#allocation4 + $0x38] sm:$0xff]  ;;  %v2928_v13 = vor.u32 %v2521_v8, %v2345_v7  ;;  %v2333_v14 = vld [vmem:[#allocation9] sm:$0xf]  ;;  %v96_v16 = vld [vmem:[#allocation4 + $0x8] sm:$0xff]  ;;  %v2863_v50 = vmov 0.0   ;;  %s2280_s0 = sshll.u32 %s3587_s8, 4  ;;  %s2281_s0 = int_to_ptr.hbm [resolvable:$true] %s2280_s0 }
  0x19   :  { %2539 = vmatpush.bf16.msra.mxu3 %v2310_v4  ;;  %2537 = vmatpush.bf16.msra.mxu1 %v2310_v4  ;;  %v98_v12 = vld [vmem:[#allocation4 + $0x18] sm:$0xff]  ;;  %v95_v15 = vld [vmem:[#allocation4] sm:$0xff]  ;;  %v2518_v17 = vld [vmem:[#allocation9 + $0x8] sm:$0xf0]  ;;  %v2930_v20 = vpack.c.bf16 %v102_v10, %v101_v6 }
  0x1a   :  { %174 = vmatpush.bf16.msra.mxu0 %v2310_v4  ;;  %2538 = vmatpush.bf16.msra.mxu2 %v2310_v4  ;;  %v2514_v18 = vld [vmem:[#allocation7 + $0x1c] sm:$0xf]  ;;  %v2311_v19 = vld [vmem:[#allocation7 + $0x24] sm:$0xf0]  ;;  %v2932_v21 = vpack.c.bf16 %v98_v12, %v97_v11  ;;  %v99_v25 = vld [vmem:[#allocation4 + $0x20] sm:$0xff]  ;;  %v111_v26 = vpack.c.bf16 %v96_v16, %v95_v15  ;;  %v2935_v30 = vor.u32 %v2518_v17, %v2333_v14 }
  0x1b   :  { %v2520_v22 = vld [vmem:[#allocation9 + $0x1c] sm:$0xf]  ;;  %v2347_v23 = vld [vmem:[#allocation9 + $0x24] sm:$0xf0]  ;;  %v2314_v24 = vor.u32 %v2514_v18, %v2311_v19  ;;  %v2511_v28 = vld [vmem:[#allocation7 + $0x4] sm:$0xf] }
  0x1c   :  { %v100_v27 = vld [vmem:[#allocation4 + $0x28] sm:$0xff]  ;;  %v2299_v29 = vld [vmem:[#allocation7 + $0xc] sm:$0xf0]  ;;  %v2939_v32 = vor.u32 %v2520_v22, %v2347_v23  ;;  %v2517_v33 = vld [vmem:[#allocation9 + $0x4] sm:$0xf] }
  0x1d   :  { %2542 = vmatpush.bf16.msra.mxu3 %v2298_v9  ;;  %2540 = vmatpush.bf16.msra.mxu1 %v2298_v9  ;;  %v2937_v31 = vpack.c.bf16 %v100_v27, %v99_v25  ;;  %v2335_v34 = vld [vmem:[#allocation9 + $0xc] sm:$0xf0]  ;;  %v2302_v35 = vor.u32 %v2511_v28, %v2299_v29  ;;  %v2353_v36 = vld [vmem:[#allocation9 + $0x20] sm:$0xf]  ;;  %v2522_v37 = vld [vmem:[#allocation9 + $0x28] sm:$0xf0] }
  0x1e   :  { %175 = vmatpush.bf16.msra.mxu0 %v2298_v9  ;;  %2541 = vmatpush.bf16.msra.mxu2 %v2298_v9  ;;  %v2317_v38 = vld [vmem:[#allocation7 + $0x20] sm:$0xf]  ;;  %v2516_v39 = vld [vmem:[#allocation7 + $0x28] sm:$0xf0]  ;;  %v2305_v40 = vld [vmem:[#allocation7 + $0x8] sm:$0xf]  ;;  %v2949_v42 = vor.u32 %v2522_v37, %v2353_v36  ;;  %v2952_v44 = vor.u32 %v2517_v33, %v2335_v34 }
  0x1f   :  { %v2513_v41 = vld [vmem:[#allocation7 + $0x10] sm:$0xf0]  ;;  %v2318_v43 = vor.u32 %v2516_v39, %v2317_v38  ;;  %v2341_v45 = vld [vmem:[#allocation9 + $0x8] sm:$0xf]  ;;  %v2970_v49 = vld [vmem:[%s3580_s1] sm:$0xff] }
  0x20   :  { %2322 = vmatmul.msk.bf16.vlgmr.msra.gmra.mxu3 %vm155_vm0, %v2930_v20  ;;  %2320 = vmatmul.msk.bf16.vlgmr.msra.gmra.mxu1 %vm155_vm0, %v2932_v21  ;;  %v2519_v46 = vld [vmem:[#allocation9 + $0x10] sm:$0xf0]  ;;  %v2306_v47 = vor.u32 %v2513_v41, %v2305_v40  ;;  %vm415_vm1 = vcmp.gt.s32.totalorder %v2970_v49, 0  ;;  %vm521_vm2 = vcmp.gt.s32.totalorder %v2970_v49, 1  ;;  %vm1061_vm3 = vcmp.gt.s32.totalorder %v2970_v49, 6 }
  0x21   :  { %335 = vmatpush.bf16.msrb.mxu3 %v2928_v13  ;;  %203 = vmatpush.bf16.msrb.mxu1 %v2314_v24  ;;  %v2956_v48 = vor.u32 %v2519_v46, %v2341_v45  ;;  %v2357_v51 = vsel %vm415_vm1, 1.0, %v2863_v50  ;;  %v2363_v52 = vsel %vm521_vm2, 1.0, %v2863_v50  ;;  %v2393_v53 = vsel %vm1061_vm3, 1.0, %v2863_v50  ;;  %v115_v54 = vld [vmem:[%s3583_s4] sm:$0x7] }
  0x22   :  { %2319 = vmatmul.msk.bf16.vlgmr.msra.gmra.mxu0 %vm155_vm0, %v111_v26  ;;  %2321 = vmatmul.msk.bf16.vlgmr.msra.gmra.mxu2 %vm155_vm0, %v2937_v31  ;;  %v3006_v55 = vperm.slane %v115_v54, 0  ;;  %v3022_v7 = vperm.slane %v115_v54, 1  ;;  %v3032_v27 = vld [vmem:[%s3584_s5] ss:$0 sm:$0xff]  ;;  %vm629_vm13 = vcmp.gt.s32.totalorder %v2970_v49, 2  ;;  %vm737_vm2 = vcmp.gt.s32.totalorder %v2970_v49, 3 }
  0x23   :  { %232 = vmatpush.bf16.msrb.mxu2 %v2318_v43  ;;  %454 = vmatpush.bf16.msrb.mxu0 %v2939_v32 }
  0x24   :  { %420 = vperm.xlu0 %2556, %v2357_v51  }
  0x25   :  { %336 = vmatpush.bf16.msrb.mxu3 %v2935_v30  ;;  %204 = vmatpush.bf16.msrb.mxu1 %v2302_v35 }
  0x27   :  { %233 = vmatpush.bf16.msrb.mxu2 %v2306_v47  ;;  %455 = vmatpush.bf16.msrb.mxu0 %v2952_v44 }
  0x29   :  { %348 = vmatpush.bf16.msra.mxu3 %v2939_v32  ;;  %467 = vmatpush.bf16.msra.mxu1 %v2949_v42 }
  0x2b   :  { %549 = vmatpush.bf16.msra.mxu2 %v2928_v13  ;;  %575 = vmatpush.bf16.msra.mxu0 %v2949_v42 }
  0x2c   :  { %527 = vperm.xlu0 %2556, %v2363_v52  }
  0x2d   :  { %349 = vmatpush.bf16.msra.mxu3 %v2952_v44  ;;  %468 = vmatpush.bf16.msra.mxu1 %v2956_v48 }
  0x2f   :  { %550 = vmatpush.bf16.msra.mxu2 %v2935_v30  ;;  %576 = vmatpush.bf16.msra.mxu0 %v2956_v48 }
  0x30   :  { %337 = vmatmul.bf16.vlgmr.msrb.gmra.mxu3 %v2862_v0  ;;  %2323 = vmatmul.msk.bf16.vlgmr.msrb.gmra.mxu1 %vm155_vm0, %v111_v26 }
  0x31   :  { %361 = vmatpush.bf16.msrb.mxu3 %v2949_v42  ;;  %657 = vmatpush.bf16.msrb.mxu1 %v2928_v13 }
  0x32   :  { %2327 = vmatmul.msk.bf16.vlgmr.msrb.gmra.mxu2 %vm155_vm0, %v111_v26  ;;  %v3027_v26 = vperm.slane %v115_v54, 2 }
  0x33   :  { %670 = vmatpush.bf16.msrb.mxu2 %v2939_v32 }
  0x34   :  { %1067 = vperm.xlu0 %2556, %v2393_v53  }
  0x35   :  { %362 = vmatpush.bf16.msrb.mxu3 %v2956_v48  ;;  %658 = vmatpush.bf16.msrb.mxu1 %v2935_v30 }
  0x37   :  { %671 = vmatpush.bf16.msrb.mxu2 %v2952_v44 }
  0x40   :  { %350 = vmatmul.bf16.vlgmr.msra.gmra.mxu3 %v2862_v0  ;;  %2324 = vmatmul.msk.bf16.gmra.mxu1 %vm155_vm0, %v2932_v21 }
  0x41   :  { %441 = vmatpush.bf16.msra.mxu3 %v2928_v13 }
  0x42   :  { %2328 = vmatmul.msk.bf16.gmra.mxu2 %vm155_vm0, %v2932_v21 }
  0x45   :  { %442 = vmatpush.bf16.msra.mxu3 %v2935_v30 }
  0x50   :  { %363 = vmatmul.bf16.vlgmr.msrb.gmra.mxu3 %v2862_v0  ;;  %2325 = vmatmul.msk.bf16.gmra.mxu1 %vm155_vm0, %v2937_v31 }
  0x51   :  { %562 = vmatpush.bf16.msrb.mxu3 %v2939_v32 }
  0x52   :  { %2329 = vmatmul.msk.bf16.gmra.mxu2 %vm155_vm0, %v2937_v31 }
  0x55   :  { %563 = vmatpush.bf16.msrb.mxu3 %v2952_v44 }
  0x60   :  { %2326 = vmatmul.msk.bf16.gmra.mxu1 %vm155_vm0, %v2930_v20 }
  0x62   :  { %2330 = vmatmul.msk.bf16.gmra.mxu2 %vm155_vm0, %v2930_v20 }
  0x9d   :  { %v182_v56 = vpop.f32.mrf.mxu1 }
  0x9e   :  { %v3009_v57 = vadd.f32 %v182_v56, %v3006_v55 }
  0x9f   :  { %v177_v63 = vpop.f32.mrf.mxu0 }
  0xa0   :  { %v178_v1 = vadd.f32 %v177_v63, %v3006_v55 }
  0xa3   :  { %v192_v58 = vpop.f32.mrf.mxu3 }
  0xa4   :  { %v3012_v59 = vadd.f32 %v192_v58, %v3006_v55 }
  0xa5   :  { %v187_v60 = vpop.f32.mrf.mxu2  ;;  %v3020_v4 = vpop.f32.mrf.mxu1 }
  0xa6   :  { %v3015_v61 = vadd.f32 %v187_v60, %v3006_v55 }
  0xab   :  { %v3017_v62 = vpop.f32.mrf.mxu3 }
  0xad   :  { %v206_v10 = vpop.f32.mrf.mxu1  ;;  %v3025_v18 = vpop.f32.mrf.mxu2 }
  0xae   :  { %v207_v11 = vadd.f32 %v206_v10, %v3022_v7 }
  0xb3   :  { %v338_v2 = vpop.f32.mrf.mxu3 }
  0xb4   :  { %v368_v3 = vadd.f32 %v338_v2, %v178_v1  ;;  %v3036_v2 = vpop.permute.xlu0 %420 }
  0xb5   :  { %v235_v31 = vpop.f32.mrf.mxu2 }
  0xb6   :  { %v2355_v5 = vmul.f32 -1.442695, %v368_v3  ;;  %v236_v35 = vadd.f32 %v235_v31, %v3027_v26 }
  0xb8   :  { %2562 = vpow2.f32 %v2355_v5 }
  0xbb   :  { %v340_v6 = vpop.f32.mrf.mxu3 }
  0xbe   :  { %v2563_v8 = vpop.eup %2562 }
  0xbf   :  { %v372_v9 = vadd.f32 1.0, %v2563_v8  ;;  %v208_v8 = vpop.f32.mrf.mxu1 }
  0xc1   :  { %2564 = vrcp.f32 %v372_v9  ;;  %v384_v25 = vand.u32 2147483648, %v372_v9  ;;  %vm378_vm5 = vweird.f32 %v372_v9  ;;  %v382_v28 = vand.u32 2147483647, %v372_v9 }
  0xc3   :  { %v351_v12 = vpop.f32.mrf.mxu3  ;;  %v385_v34 = vor.u32 1.1754944e-38, %v384_v25  ;;  %vm383_vm7 = vcmp.eq.f32.partialorder %v382_v28, 8.507059e+37 }
  0xc4   :  { %v388_v14 = vadd.f32 %v351_v12, %v207_v11 }
  0xc6   :  { %v2356_v15 = vmul.f32 -1.442695, %v388_v14 }
  0xc7   :  { %v2565_v16 = vpop.eup %2564 }
  0xc8   :  { %2566 = vpow2.f32 %v2356_v15  ;;  %v374_v17 = vmul.f32 %v2565_v16, %v372_v9  ;;  %vm379_vm4 = vweird.f32 %v2565_v16  ;;  %v3055_v9 = vpop.f32.mrf.mxu1 }
  0xc9   :  { %vm380_vm6 = vmor %vm378_vm5, %vm379_vm4  ;;  %vm1169_vm4 = vcmp.gt.s32.totalorder %v2970_v49, 7 }
  0xca   :  { %v375_v19 = vsub.f32 1.0, %v374_v17  ;;  %v209_v17 = vadd.f32 %v208_v8, %v3022_v7  ;;  %v2375_v8 = vsel %vm737_vm2, 1.0, %v2863_v50  ;;  %vm845_vm2 = vcmp.gt.s32.totalorder %v2970_v49, 4 }
  0xcb   :  { %v353_v20 = vpop.f32.mrf.mxu3 }
  0xcc   :  { %v376_v21 = vmul.f32 %v2565_v16, %v375_v19 }
  0xce   :  { %v2567_v22 = vpop.eup %2566  ;;  %v377_v23 = vadd.f32 %v2565_v16, %v376_v21 }
  0xcf   :  { %v392_v24 = vadd.f32 1.0, %v2567_v22 }
  0xd0   :  { %v381_v29 = vsel %vm380_vm6, %v2565_v16, %v377_v23  ;;  %v3057_v10 = vpop.f32.mrf.mxu1  ;;  %v179_v16 = vpop.f32.mrf.mxu0 }
  0xd1   :  { %2568 = vrcp.f32 %v392_v24  ;;  %v386_v37 = vsel %vm383_vm7, %v385_v34, %v381_v29  ;;  %v404_v45 = vand.u32 2147483648, %v392_v24  ;;  %v402_v51 = vand.u32 2147483647, %v392_v24 }
  0xd2   :  { %vm398_vm9 = vweird.f32 %v392_v24  ;;  %v180_v23 = vadd.f32 %v179_v16, %v3006_v55 }
  0xd3   :  { %v364_v33 = vpop.f32.mrf.mxu3  ;;  %v405_v53 = vor.u32 1.1754944e-38, %v404_v45  ;;  %vm403_vm11 = vcmp.eq.f32.partialorder %v402_v51, 8.507059e+37  ;;  %v2369_v51 = vsel %vm629_vm13, 1.0, %v2863_v50 }
  0xd4   :  { %v408_v36 = vadd.f32 %v3032_v27, %v364_v33  ;;  %635 = vperm.xlu1 %2557, %v2369_v51  }
  0xd6   :  { %v409_v38 = vmul.f32 %v408_v36, %v386_v37 }
  0xd7   :  { %v2569_v39 = vpop.eup %2568 }
  0xd8   :  { %v394_v40 = vmul.f32 %v2569_v39, %v392_v24  ;;  %v410_v41 = vadd.f32 %v409_v38, %v236_v35  ;;  %vm399_vm8 = vweird.f32 %v2569_v39  ;;  %v3059_v11 = vpop.f32.mrf.mxu1 }
  0xd9   :  { %vm400_vm10 = vmor %vm398_vm9, %vm399_vm8 }
  0xda   :  { %v395_v43 = vsub.f32 1.0, %v394_v40  ;;  %2570 = vtanh.f32 %v410_v41 }
  0xdb   :  { %v366_v46 = vpop.f32.mrf.mxu3 }
  0xdc   :  { %v396_v47 = vmul.f32 %v2569_v39, %v395_v43  ;;  %743 = vperm.xlu1 %2557, %v2375_v8  }
  0xde   :  { %v397_v52 = vadd.f32 %v2569_v39, %v396_v47 }
  0xe0   :  { %v2571_v54 = vpop.eup %2570  ;;  %v401_v56 = vsel %vm400_vm10, %v2569_v39, %v397_v52  ;;  %v3061_v12 = vpop.f32.mrf.mxu1 }
  0xe1   :  { %v406_v58 = vsel %vm403_vm11, %v405_v53, %v401_v56  ;;  %v412_v60 = vsub.f32 0.0, %v2571_v54  ;;  %v237_v53 = vpop.f32.mrf.mxu2 }
  0xe3   :  { %v413_v63 = vmul.f32 %v412_v60, %v406_v58 }
  0xe5   :  { %v414_v1 = vadd.f32 %v2571_v54, %v413_v63 }
  0xe7   :  { %v3039_v3 = vmul.f32 %v3036_v2, %v414_v1  ;;  %v238_v1 = vadd.f32 %v237_v53, %v3027_v26 }
  0xe8   :  { %v3063_v14 = vpop.f32.mrf.mxu1 }
  0xe9   :  { %v425_v5 = vmul.f32 %v3039_v3, %v3036_v2  ;;  %v431_v6 = vpack.c.bf16 %v3039_v3, %v3039_v3 }
  0xeb   :  { %426 = vst.msk [vmem:[#allocation2] sm:$0xff] %vm155_vm0, %v425_v5  ;;  %2358 = vmatmul.msk.bf16.vlgmr.msra.gmra.mxu3 %vm155_vm0, %v431_v6  ;;  %2359 = vmatmul.msk.bf16.vlgmr.msrb.gmra.mxu0 %vm155_vm0, %v431_v6 }
  0xec   :  { %2360 = vmatmul.msk.bf16.vlgmr.msra.gmra.mxu1 %vm155_vm0, %v431_v6  ;;  %683 = vmatpush.bf16.msra.mxu3 %v2949_v42 }
  0xed   :  { %765 = vmatpush.bf16.msrb.mxu0 %v2928_v13  ;;  %778 = vmatpush.bf16.msra.mxu1 %v2939_v32 }
  0xf0   :  { %684 = vmatpush.bf16.msra.mxu3 %v2956_v48  ;;  %v3065_v15 = vpop.f32.mrf.mxu1 }
  0xf1   :  { %766 = vmatpush.bf16.msrb.mxu0 %v2935_v30  ;;  %779 = vmatpush.bf16.msra.mxu1 %v2952_v44 }
 0x168   :  { %v457_v19 = vpop.f32.mrf.mxu0 }
 0x169   :  { %v494_v20 = vadd.f32 %v457_v19, %v209_v17  ;;  %v470_v21 = vpop.f32.mrf.mxu1 }
 0x16a   :  { %v514_v58 = vadd.f32 %v3032_v27, %v470_v21 }
 0x16b   :  { %v2362_v22 = vmul.f32 -1.442695, %v494_v20 }
 0x16d   :  { %2572 = vpow2.f32 %v2362_v22  ;;  %v2399_v22 = vsel %vm1169_vm4, 1.0, %v2863_v50 }
 0x16e   :  { %v444_v24 = vpop.f32.mrf.mxu3  ;;  %1175 = vperm.xlu1 %2557, %v2399_v22  }
 0x16f   :  { %v474_v25 = vadd.f32 %v444_v24, %v180_v23 }
 0x170   :  { %v459_v28 = vpop.f32.mrf.mxu0 }
 0x171   :  { %v2361_v29 = vmul.f32 -1.442695, %v474_v25  ;;  %v472_v31 = vpop.f32.mrf.mxu1 }
 0x173   :  { %2574 = vpow2.f32 %v2361_v29  ;;  %v2573_v33 = vpop.eup %2572 }
 0x174   :  { %v498_v36 = vadd.f32 1.0, %v2573_v33 }
 0x176   :  { %v446_v34 = vpop.f32.mrf.mxu3  ;;  %v510_v19 = vand.u32 2147483648, %v498_v36  ;;  %vm504_vm5 = vweird.f32 %v498_v36  ;;  %v508_v20 = vand.u32 2147483647, %v498_v36 }
 0x177   :  { %v3079_v34 = vpop.permute.xlu0 %527 }
 0x178   :  { %v511_v24 = vor.u32 1.1754944e-38, %v510_v19  ;;  %vm509_vm7 = vcmp.eq.f32.partialorder %v508_v20, 8.507059e+37 }
 0x179   :  { %v2575_v35 = vpop.eup %2574 }
 0x17a   :  { %v478_v37 = vadd.f32 1.0, %v2575_v35 }
 0x17c   :  { %2576 = vrcp.f32 %v478_v37  ;;  %v490_v45 = vand.u32 2147483648, %v478_v37  ;;  %v488_v47 = vand.u32 2147483647, %v478_v37  ;;  %vm484_vm14 = vweird.f32 %v478_v37 }
 0x17d   :  { %2578 = vrcp.f32 %v498_v36 }
 0x17e   :  { %v491_v56 = vor.u32 1.1754944e-38, %v490_v45  ;;  %vm489_vm1 = vcmp.eq.f32.partialorder %v488_v47, 8.507059e+37  ;;  %v212_v47 = vadd.f32 %v3055_v9, %v3022_v7 }
 0x182   :  { %v2577_v38 = vpop.eup %2576 }
 0x183   :  { %v2579_v39 = vpop.eup %2578  ;;  %v480_v40 = vmul.f32 %v2577_v38, %v478_v37  ;;  %vm485_vm12 = vweird.f32 %v2577_v38 }
 0x184   :  { %v500_v43 = vmul.f32 %v2579_v39, %v498_v36  ;;  %vm486_vm15 = vmor %vm484_vm14, %vm485_vm12  ;;  %vm505_vm3 = vweird.f32 %v2579_v39 }
 0x185   :  { %v481_v41 = vsub.f32 1.0, %v480_v40  ;;  %vm506_vm6 = vmor %vm504_vm5, %vm505_vm3 }
 0x186   :  { %v501_v54 = vsub.f32 1.0, %v500_v43 }
 0x187   :  { %v482_v46 = vmul.f32 %v2577_v38, %v481_v41 }
 0x188   :  { %v502_v6 = vmul.f32 %v2579_v39, %v501_v54 }
 0x189   :  { %v483_v52 = vadd.f32 %v2577_v38, %v482_v46 }
 0x18a   :  { %v503_v17 = vadd.f32 %v2579_v39, %v502_v6 }
 0x18b   :  { %v487_v60 = vsel %vm486_vm15, %v2577_v38, %v483_v52 }
 0x18c   :  { %v492_v63 = vsel %vm489_vm1, %v491_v56, %v487_v60  ;;  %v507_v21 = vsel %vm506_vm6, %v2579_v39, %v503_v17  ;;  %vm953_vm6 = vcmp.gt.s32.totalorder %v2970_v49, 5 }
 0x18d   :  { %v515_v5 = vmul.f32 %v514_v58, %v492_v63  ;;  %v512_v28 = vsel %vm509_vm7, %v511_v24, %v507_v21 }
 0x18f   :  { %v516_v16 = vadd.f32 %v515_v5, %v238_v1 }
 0x191   :  { %2580 = vtanh.f32 %v516_v16 }
 0x197   :  { %v2581_v23 = vpop.eup %2580 }
 0x198   :  { %v518_v25 = vsub.f32 %v3039_v3, %v2581_v23 }
 0x19a   :  { %v519_v29 = vmul.f32 %v518_v25, %v512_v28 }
 0x19c   :  { %v520_v31 = vadd.f32 %v2581_v23, %v519_v29 }
 0x19e   :  { %v524_v33 = vsub.f32 %v520_v31, %v3039_v3 }
 0x1a0   :  { %v530_v35 = vmul.f32 %v3079_v34, %v524_v33 }
 0x1a2   :  { %v3083_v36 = vadd.f32 %v530_v35, %v3039_v3  ;;  %v240_v3 = vpop.f32.mrf.mxu2 }
 0x1a3   :  { %v241_v35 = vadd.f32 %v240_v3, %v3027_v26 }
 0x1a4   :  { %v532_v37 = vmul.f32 %v3083_v36, %v3079_v34  ;;  %v539_v38 = vpack.c.bf16 %v3083_v36, %v3083_v36 }
 0x1a6   :  { %534 = vst.msk [vmem:[#allocation2 + $0x8] sm:$0xff] %vm155_vm0, %v532_v37  ;;  %2364 = vmatmul.msk.bf16.vlgmr.msra.gmra.mxu2 %vm155_vm0, %v539_v38  ;;  %2365 = vmatmul.msk.bf16.vlgmr.msrb.gmra.mxu3 %vm155_vm0, %v539_v38 }
 0x1a7   :  { %2366 = vmatmul.msk.bf16.vlgmr.msra.gmra.mxu0 %vm155_vm0, %v539_v38  ;;  %791 = vmatpush.bf16.msra.mxu2 %v2949_v42 }
 0x1a8   :  { %873 = vmatpush.bf16.msrb.mxu3 %v2928_v13  ;;  %886 = vmatpush.bf16.msra.mxu0 %v2939_v32 }
 0x1aa   :  { %v3099_v39 = vpop.f32.mrf.mxu2 }
 0x1ab   :  { %792 = vmatpush.bf16.msra.mxu2 %v2956_v48 }
 0x1ac   :  { %874 = vmatpush.bf16.msrb.mxu3 %v2935_v30  ;;  %887 = vmatpush.bf16.msra.mxu0 %v2952_v44 }
 0x1b2   :  { %v3101_v40 = vpop.f32.mrf.mxu2 }
 0x1ba   :  { %v3103_v41 = vpop.f32.mrf.mxu2 }
 0x1c2   :  { %v3105_v43 = vpop.f32.mrf.mxu2 }
 0x1ca   :  { %v3107_v45 = vpop.f32.mrf.mxu2 }
 0x224   :  { %v578_v46 = vpop.f32.mrf.mxu0 }
 0x225   :  { %v622_v29 = vadd.f32 %v3032_v27, %v578_v46 }
 0x229   :  { %v552_v51 = vpop.f32.mrf.mxu2  ;;  %v565_v52 = vpop.f32.mrf.mxu3 }
 0x22a   :  { %v582_v53 = vadd.f32 %v552_v51, %v3009_v57  ;;  %v602_v54 = vadd.f32 %v565_v52, %v212_v47 }
 0x22c   :  { %v2367_v56 = vmul.f32 -1.442695, %v582_v53  ;;  %v2368_v58 = vmul.f32 -1.442695, %v602_v54  ;;  %v580_v60 = vpop.f32.mrf.mxu0 }
 0x22e   :  { %2582 = vpow2.f32 %v2367_v56 }
 0x22f   :  { %2584 = vpow2.f32 %v2368_v58 }
 0x231   :  { %v554_v63 = vpop.f32.mrf.mxu2  ;;  %v567_v1 = vpop.f32.mrf.mxu3 }
 0x234   :  { %v2583_v5 = vpop.eup %2582 }
 0x235   :  { %v2585_v6 = vpop.eup %2584  ;;  %v586_v8 = vadd.f32 1.0, %v2583_v5  ;;  %v3116_v5 = vpop.permute.xlu1 %635 }
 0x236   :  { %v606_v16 = vadd.f32 1.0, %v2585_v6 }
 0x237   :  { %2586 = vrcp.f32 %v586_v8  ;;  %v598_v21 = vand.u32 2147483648, %v586_v8  ;;  %v596_v23 = vand.u32 2147483647, %v586_v8  ;;  %vm592_vm9 = vweird.f32 %v586_v8 }
 0x238   :  { %2588 = vrcp.f32 %v606_v16  ;;  %v618_v52 = vand.u32 2147483648, %v606_v16  ;;  %vm612_vm13 = vweird.f32 %v606_v16  ;;  %v616_v53 = vand.u32 2147483647, %v606_v16 }
 0x239   :  { %v599_v25 = vor.u32 1.1754944e-38, %v598_v21  ;;  %vm597_vm11 = vcmp.eq.f32.partialorder %v596_v23, 8.507059e+37  ;;  %v214_v21 = vadd.f32 %v3057_v10, %v3022_v7 }
 0x23a   :  { %v619_v58 = vor.u32 1.1754944e-38, %v618_v52  ;;  %vm617_vm15 = vcmp.eq.f32.partialorder %v616_v53, 8.507059e+37 }
 0x23d   :  { %v2587_v17 = vpop.eup %2586 }
 0x23e   :  { %v2589_v9 = vpop.eup %2588  ;;  %v588_v19 = vmul.f32 %v2587_v17, %v586_v8  ;;  %vm593_vm8 = vweird.f32 %v2587_v17 }
 0x23f   :  { %v608_v57 = vmul.f32 %v2589_v9, %v606_v16  ;;  %vm594_vm10 = vmor %vm592_vm9, %vm593_vm8  ;;  %vm613_vm12 = vweird.f32 %v2589_v9 }
 0x240   :  { %v589_v20 = vsub.f32 1.0, %v588_v19  ;;  %vm614_vm14 = vmor %vm612_vm13, %vm613_vm12 }
 0x241   :  { %v609_v28 = vsub.f32 1.0, %v608_v57 }
 0x242   :  { %v590_v22 = vmul.f32 %v2587_v17, %v589_v20 }
 0x243   :  { %v610_v38 = vmul.f32 %v2589_v9, %v609_v28 }
 0x244   :  { %v591_v24 = vadd.f32 %v2587_v17, %v590_v22 }
 0x245   :  { %v611_v51 = vadd.f32 %v2589_v9, %v610_v38 }
 0x246   :  { %v595_v31 = vsel %vm594_vm10, %v2587_v17, %v591_v24 }
 0x247   :  { %v600_v33 = vsel %vm597_vm11, %v599_v25, %v595_v31  ;;  %v615_v54 = vsel %vm614_vm14, %v2589_v9, %v611_v51 }
 0x248   :  { %v623_v37 = vmul.f32 %v622_v29, %v600_v33  ;;  %v620_v60 = vsel %vm617_vm15, %v619_v58, %v615_v54  ;;  %v2381_v54 = vsel %vm845_vm2, 1.0, %v2863_v50 }
 0x249   :  { %851 = vperm.xlu2 %2558, %v2381_v54  }
 0x24a   :  { %v624_v47 = vadd.f32 %v623_v37, %v241_v35 }
 0x24c   :  { %2590 = vtanh.f32 %v624_v47 }
 0x252   :  { %v2591_v56 = vpop.eup %2590 }
 0x253   :  { %v626_v46 = vsub.f32 %v3083_v36, %v2591_v56 }
 0x255   :  { %v627_v63 = vmul.f32 %v626_v46, %v620_v60 }
 0x257   :  { %v628_v1 = vadd.f32 %v2591_v56, %v627_v63 }
 0x259   :  { %v632_v3 = vsub.f32 %v628_v1, %v3083_v36 }
 0x25b   :  { %v638_v6 = vmul.f32 %v3116_v5, %v632_v3 }
 0x25d   :  { %v3120_v8 = vadd.f32 %v638_v6, %v3083_v36  ;;  %v185_v36 = vadd.f32 %v3020_v4, %v3006_v55  ;;  %v243_v6 = vadd.f32 %v3099_v39, %v3027_v26 }
 0x25f   :  { %v640_v16 = vmul.f32 %v3120_v8, %v3116_v5  ;;  %v647_v17 = vpack.c.bf16 %v3120_v8, %v3120_v8 }
 0x261   :  { %642 = vst.msk [vmem:[#allocation2 + $0x10] sm:$0xff] %vm155_vm0, %v640_v16  ;;  %2370 = vmatmul.msk.bf16.vlgmr.msrb.gmra.mxu1 %vm155_vm0, %v647_v17  ;;  %2371 = vmatmul.msk.bf16.vlgmr.msrb.gmra.mxu2 %vm155_vm0, %v647_v17 }
 0x262   :  { %2372 = vmatmul.msk.bf16.vlgmr.msra.gmra.mxu3 %vm155_vm0, %v647_v17  ;;  %899 = vmatpush.bf16.msrb.mxu1 %v2949_v42 }
 0x263   :  { %981 = vmatpush.bf16.msrb.mxu2 %v2928_v13  ;;  %994 = vmatpush.bf16.msra.mxu3 %v2939_v32 }
 0x266   :  { %900 = vmatpush.bf16.msrb.mxu1 %v2956_v48 }
 0x267   :  { %982 = vmatpush.bf16.msrb.mxu2 %v2935_v30  ;;  %995 = vmatpush.bf16.msra.mxu3 %v2952_v44 }
 0x2de   :  { %v660_v9 = vpop.f32.mrf.mxu1 }
 0x2df   :  { %v690_v19 = vadd.f32 %v660_v9, %v185_v36  ;;  %v2387_v36 = vsel %vm953_vm6, 1.0, %v2863_v50 }
 0x2e0   :  { %959 = vperm.xlu2 %2558, %v2387_v36  }
 0x2e1   :  { %v2373_v20 = vmul.f32 -1.442695, %v690_v19 }
 0x2e3   :  { %2592 = vpow2.f32 %v2373_v20 }
 0x2e4   :  { %v673_v57 = vpop.f32.mrf.mxu2 }
 0x2e5   :  { %v710_v22 = vadd.f32 %v673_v57, %v214_v21  ;;  %v686_v23 = vpop.f32.mrf.mxu3 }
 0x2e6   :  { %v662_v24 = vpop.f32.mrf.mxu1  ;;  %v730_v60 = vadd.f32 %v3032_v27, %v686_v23 }
 0x2e7   :  { %v2374_v25 = vmul.f32 -1.442695, %v710_v22 }
 0x2e9   :  { %v2593_v28 = vpop.eup %2592  ;;  %2594 = vpow2.f32 %v2374_v25 }
 0x2ea   :  { %v694_v29 = vadd.f32 1.0, %v2593_v28  ;;  %v3149_v28 = vpop.permute.xlu1 %743 }
 0x2ec   :  { %2596 = vrcp.f32 %v694_v29  ;;  %v675_v31 = vpop.f32.mrf.mxu2  ;;  %v706_v51 = vand.u32 2147483648, %v694_v29  ;;  %v704_v52 = vand.u32 2147483647, %v694_v29  ;;  %vm700_vm3 = vweird.f32 %v694_v29 }
 0x2ed   :  { %v688_v33 = vpop.f32.mrf.mxu3 }
 0x2ee   :  { %v707_v46 = vor.u32 1.1754944e-38, %v706_v51  ;;  %vm705_vm5 = vcmp.eq.f32.partialorder %v704_v52, 8.507059e+37 }
 0x2ef   :  { %v2595_v35 = vpop.eup %2594 }
 0x2f0   :  { %v714_v4 = vadd.f32 1.0, %v2595_v35 }
 0x2f2   :  { %v2597_v37 = vpop.eup %2596  ;;  %2598 = vrcp.f32 %v714_v4  ;;  %v726_v20 = vand.u32 2147483648, %v714_v4  ;;  %vm720_vm8 = vweird.f32 %v714_v4  ;;  %v724_v21 = vand.u32 2147483647, %v714_v4 }
 0x2f3   :  { %v696_v38 = vmul.f32 %v2597_v37, %v694_v29  ;;  %vm701_vm1 = vweird.f32 %v2597_v37 }
 0x2f4   :  { %vm702_vm4 = vmor %vm700_vm3, %vm701_vm1  ;;  %v727_v49 = vor.u32 1.1754944e-38, %v726_v20  ;;  %vm725_vm10 = vcmp.eq.f32.partialorder %v724_v21, 8.507059e+37  ;;  %v246_v20 = vadd.f32 %v3101_v40, %v3027_v26 }
 0x2f5   :  { %v697_v47 = vsub.f32 1.0, %v696_v38 }
 0x2f7   :  { %v698_v10 = vmul.f32 %v2597_v37, %v697_v47 }
 0x2f8   :  { %v2599_v53 = vpop.eup %2598 }
 0x2f9   :  { %v716_v56 = vmul.f32 %v2599_v53, %v714_v4  ;;  %v699_v58 = vadd.f32 %v2597_v37, %v698_v10  ;;  %vm721_vm7 = vweird.f32 %v2599_v53 }
 0x2fa   :  { %vm722_vm9 = vmor %vm720_vm8, %vm721_vm7 }
 0x2fb   :  { %v717_v63 = vsub.f32 1.0, %v716_v56  ;;  %v703_v1 = vsel %vm702_vm4, %v2597_v37, %v699_v58 }
 0x2fc   :  { %v708_v3 = vsel %vm705_vm5, %v707_v46, %v703_v1 }
 0x2fd   :  { %v731_v16 = vmul.f32 %v730_v60, %v708_v3  ;;  %v718_v17 = vmul.f32 %v2599_v53, %v717_v63 }
 0x2ff   :  { %v732_v9 = vadd.f32 %v731_v16, %v243_v6  ;;  %v719_v19 = vadd.f32 %v2599_v53, %v718_v17 }
 0x301   :  { %2600 = vtanh.f32 %v732_v9  ;;  %v723_v57 = vsel %vm722_vm9, %v2599_v53, %v719_v19 }
 0x302   :  { %v728_v39 = vsel %vm725_vm10, %v727_v49, %v723_v57 }
 0x307   :  { %v2601_v22 = vpop.eup %2600 }
 0x308   :  { %v734_v23 = vsub.f32 %v3120_v8, %v2601_v22 }
 0x30a   :  { %v735_v24 = vmul.f32 %v734_v23, %v728_v39 }
 0x30c   :  { %v736_v25 = vadd.f32 %v2601_v22, %v735_v24 }
 0x30e   :  { %v740_v50 = vsub.f32 %v736_v25, %v3120_v8 }
 0x310   :  { %v746_v29 = vmul.f32 %v3149_v28, %v740_v50 }
 0x312   :  { %v3153_v31 = vadd.f32 %v746_v29, %v3120_v8  ;;  %v217_v8 = vadd.f32 %v3059_v11, %v3022_v7 }
 0x314   :  { %v748_v33 = vmul.f32 %v3153_v31, %v3149_v28  ;;  %v755_v35 = vpack.c.bf16 %v3153_v31, %v3153_v31 }
 0x316   :  { %750 = vst.msk [vmem:[#allocation2 + $0x18] sm:$0xff] %vm155_vm0, %v748_v33  ;;  %2376 = vmatmul.msk.bf16.vlgmr.msrb.gmra.mxu0 %vm155_vm0, %v755_v35  ;;  %2377 = vmatmul.msk.bf16.vlgmr.msra.gmra.mxu1 %vm155_vm0, %v755_v35 }
 0x317   :  { %2378 = vmatmul.msk.bf16.vlgmr.msra.gmra.mxu2 %vm155_vm0, %v755_v35  ;;  %1007 = vmatpush.bf16.msrb.mxu0 %v2949_v42 }
 0x318   :  { %1089 = vmatpush.bf16.msra.mxu1 %v2928_v13  ;;  %1102 = vmatpush.bf16.msra.mxu2 %v2939_v32 }
 0x31b   :  { %1008 = vmatpush.bf16.msrb.mxu0 %v2956_v48 }
 0x31c   :  { %1090 = vmatpush.bf16.msra.mxu1 %v2935_v30  ;;  %1103 = vmatpush.bf16.msra.mxu2 %v2952_v44 }
 0x393   :  { %v768_v4 = vpop.f32.mrf.mxu0  ;;  %v781_v37 = vpop.f32.mrf.mxu1 }
 0x394   :  { %v798_v38 = vadd.f32 %v768_v4, %v3015_v61  ;;  %v818_v47 = vadd.f32 %v781_v37, %v217_v8  ;;  %v3177_v4 = vpop.permute.xlu2 %851 }
 0x396   :  { %v2379_v51 = vmul.f32 -1.442695, %v798_v38  ;;  %v2380_v10 = vmul.f32 -1.442695, %v818_v47 }
 0x398   :  { %2602 = vpow2.f32 %v2379_v51 }
 0x399   :  { %2604 = vpow2.f32 %v2380_v10 }
 0x39a   :  { %v794_v13 = vpop.f32.mrf.mxu2 }
 0x39b   :  { %v770_v32 = vpop.f32.mrf.mxu0  ;;  %v783_v52 = vpop.f32.mrf.mxu1  ;;  %v838_v9 = vadd.f32 %v3032_v27, %v794_v13 }
 0x39e   :  { %v2603_v53 = vpop.eup %2602 }
 0x39f   :  { %v2605_v54 = vpop.eup %2604  ;;  %v802_v30 = vadd.f32 1.0, %v2603_v53  ;;  %v190_v53 = vadd.f32 %v3025_v18, %v3006_v55 }
 0x3a0   :  { %v822_v56 = vadd.f32 1.0, %v2605_v54 }
 0x3a1   :  { %2606 = vrcp.f32 %v802_v30  ;;  %v814_v63 = vand.u32 2147483648, %v802_v30  ;;  %v812_v3 = vand.u32 2147483647, %v802_v30  ;;  %vm808_vm12 = vweird.f32 %v802_v30 }
 0x3a2   :  { %2608 = vrcp.f32 %v822_v56  ;;  %v796_v44 = vpop.f32.mrf.mxu2  ;;  %v834_v23 = vand.u32 2147483648, %v822_v56  ;;  %vm828_vm1 = vweird.f32 %v822_v56  ;;  %v832_v39 = vand.u32 2147483647, %v822_v56 }
 0x3a3   :  { %v815_v17 = vor.u32 1.1754944e-38, %v814_v63  ;;  %vm813_vm14 = vcmp.eq.f32.partialorder %v812_v3, 8.507059e+37 }
 0x3a4   :  { %v835_v50 = vor.u32 1.1754944e-38, %v834_v23  ;;  %vm833_vm3 = vcmp.eq.f32.partialorder %v832_v39, 8.507059e+37 }
 0x3a7   :  { %v2607_v11 = vpop.eup %2606 }
 0x3a8   :  { %v2609_v58 = vpop.eup %2608  ;;  %v804_v46 = vmul.f32 %v2607_v11, %v802_v30  ;;  %vm809_vm11 = vweird.f32 %v2607_v11 }
 0x3a9   :  { %v824_v61 = vmul.f32 %v2609_v58, %v822_v56  ;;  %vm810_vm13 = vmor %vm808_vm12, %vm809_vm11  ;;  %vm829_vm15 = vweird.f32 %v2609_v58 }
 0x3aa   :  { %v805_v60 = vsub.f32 1.0, %v804_v46  ;;  %vm830_vm2 = vmor %vm828_vm1, %vm829_vm15 }
 0x3ab   :  { %v825_v16 = vsub.f32 1.0, %v824_v61 }
 0x3ac   :  { %v806_v1 = vmul.f32 %v2607_v11, %v805_v60 }
 0x3ad   :  { %v826_v57 = vmul.f32 %v2609_v58, %v825_v16 }
 0x3ae   :  { %v807_v6 = vadd.f32 %v2607_v11, %v806_v1 }
 0x3af   :  { %v827_v49 = vadd.f32 %v2609_v58, %v826_v57 }
 0x3b0   :  { %v811_v36 = vsel %vm810_vm13, %v2607_v11, %v807_v6 }
 0x3b1   :  { %v816_v19 = vsel %vm813_vm14, %v815_v17, %v811_v36  ;;  %v831_v24 = vsel %vm830_vm2, %v2609_v58, %v827_v49  ;;  %v2415_v17 = vld [vmem:[#allocation7 + $0x48] sm:$0xf]  ;;  %v2527_v36 = vld [vmem:[#allocation7 + $0x50] sm:$0xf0] }
 0x3b2   :  { %v839_v21 = vmul.f32 %v838_v9, %v816_v19  ;;  %v836_v33 = vsel %vm833_vm3, %v835_v50, %v831_v24  ;;  %v2403_v9 = vld [vmem:[#allocation7 + $0x30] sm:$0xf]  ;;  %v2416_v19 = vor.u32 %v2527_v36, %v2415_v17 }
 0x3b4   :  { %v840_v22 = vadd.f32 %v839_v21, %v246_v20  ;;  %v2524_v20 = vld [vmem:[#allocation7 + $0x38] sm:$0xf0] }
 0x3b5   :  { %v2404_v49 = vor.u32 %v2524_v20, %v2403_v9 }
 0x3b6   :  { %2610 = vtanh.f32 %v840_v22 }
 0x3bc   :  { %v2611_v25 = vpop.eup %2610 }
 0x3bd   :  { %v842_v29 = vsub.f32 %v3153_v31, %v2611_v25 }
 0x3bf   :  { %v843_v35 = vmul.f32 %v842_v29, %v836_v33 }
 0x3c1   :  { %v844_v8 = vadd.f32 %v2611_v25, %v843_v35  ;;  %v248_v25 = vadd.f32 %v3103_v41, %v3027_v26 }
 0x3c3   :  { %v848_v40 = vsub.f32 %v844_v8, %v3153_v31 }
 0x3c5   :  { %v854_v37 = vmul.f32 %v3177_v4, %v848_v40 }
 0x3c7   :  { %v3181_v38 = vadd.f32 %v854_v37, %v3153_v31  ;;  %v219_v31 = vadd.f32 %v3061_v12, %v3022_v7 }
 0x3c9   :  { %v856_v47 = vmul.f32 %v3181_v38, %v3177_v4  ;;  %v863_v51 = vpack.c.bf16 %v3181_v38, %v3181_v38 }
 0x3cb   :  { %858 = vst.msk [vmem:[#allocation2 + $0x20] sm:$0xff] %vm155_vm0, %v856_v47  ;;  %2382 = vmatmul.msk.bf16.vlgmr.msrb.gmra.mxu3 %vm155_vm0, %v863_v51  ;;  %2383 = vmatmul.msk.bf16.vlgmr.msra.gmra.mxu0 %vm155_vm0, %v863_v51 }
 0x3cc   :  { %2384 = vmatmul.msk.bf16.vlgmr.msrb.gmra.mxu1 %vm155_vm0, %v863_v51  ;;  %1115 = vmatpush.bf16.msrb.mxu3 %v2949_v42 }
 0x3cd   :  { %1263 = vmatpush.bf16.msra.mxu0 %v2416_v19 }
 0x3d0   :  { %1116 = vmatpush.bf16.msrb.mxu3 %v2956_v48 }
 0x3d1   :  { %1264 = vmatpush.bf16.msra.mxu0 %v2404_v49 }
 0x448   :  { %v889_v10 = vpop.f32.mrf.mxu0 }
 0x449   :  { %v926_v13 = vadd.f32 %v889_v10, %v219_v31  ;;  %v902_v32 = vpop.f32.mrf.mxu1 }
 0x44a   :  { %v946_v23 = vadd.f32 %v3032_v27, %v902_v32 }
 0x44b   :  { %v2386_v52 = vmul.f32 -1.442695, %v926_v13 }
 0x44d   :  { %2612 = vpow2.f32 %v2386_v52  ;;  %v3202_v52 = vpop.permute.xlu2 %959 }
 0x44e   :  { %v876_v54 = vpop.f32.mrf.mxu3 }
 0x44f   :  { %v906_v30 = vadd.f32 %v876_v54, %v190_v53 }
 0x450   :  { %v891_v56 = vpop.f32.mrf.mxu0 }
 0x451   :  { %v2385_v44 = vmul.f32 -1.442695, %v906_v30  ;;  %v904_v11 = vpop.f32.mrf.mxu1 }
 0x452   :  { %v1183_v11 = vld [vmem:[#allocation2] sm:$0xff] }
 0x453   :  { %2614 = vpow2.f32 %v2385_v44  ;;  %v2613_v42 = vpop.eup %2612  ;;  %v1184_v44 = vld [vmem:[#allocation2 + $0x8] sm:$0xff] }
 0x454   :  { %v930_v46 = vadd.f32 1.0, %v2613_v42  ;;  %v3216_v42 = vpack.c.bf16 %v1184_v44, %v1183_v11  ;;  %v2405_v11 = vld [vmem:[#allocation7 + $0x3c] sm:$0xf0] }
 0x456   :  { %v878_v58 = vpop.f32.mrf.mxu3  ;;  %v942_v8 = vand.u32 2147483648, %v930_v46  ;;  %vm936_vm9 = vweird.f32 %v930_v46  ;;  %v940_v40 = vand.u32 2147483647, %v930_v46 }
 0x457   :  { %v1185_v58 = vld [vmem:[#allocation2 + $0x10] sm:$0xff] }
 0x458   :  { %v943_v51 = vor.u32 1.1754944e-38, %v942_v8  ;;  %vm941_vm11 = vcmp.eq.f32.partialorder %v940_v40, 8.507059e+37  ;;  %v2452_v8 = vld [vmem:[#allocation9 + $0x48] sm:$0xf]  ;;  %v2533_v40 = vld [vmem:[#allocation9 + $0x50] sm:$0xf0] }
 0x459   :  { %v2615_v48 = vpop.eup %2614 }
 0x45a   :  { %v910_v60 = vadd.f32 1.0, %v2615_v48 }
 0x45c   :  { %2616 = vrcp.f32 %v910_v60  ;;  %v920_v18 = vand.u32 2147483647, %v910_v60  ;;  %v922_v6 = vand.u32 2147483648, %v910_v60  ;;  %vm916_vm5 = vweird.f32 %v910_v60 }
 0x45d   :  { %2618 = vrcp.f32 %v930_v46 }
 0x45e   :  { %v923_v22 = vor.u32 1.1754944e-38, %v922_v6  ;;  %vm921_vm7 = vcmp.eq.f32.partialorder %v920_v18, 8.507059e+37 }
 0x462   :  { %v2617_v12 = vpop.eup %2616 }
 0x463   :  { %v2619_v61 = vpop.eup %2618  ;;  %v912_v63 = vmul.f32 %v2617_v12, %v910_v60  ;;  %vm917_vm4 = vweird.f32 %v2617_v12  ;;  %v1187_v60 = vld [vmem:[#allocation2 + $0x20] sm:$0xff] }
 0x464   :  { %v932_v3 = vmul.f32 %v2619_v61, %v930_v46  ;;  %vm918_vm6 = vmor %vm916_vm5, %vm917_vm4  ;;  %vm937_vm8 = vweird.f32 %v2619_v61 }
 0x465   :  { %v913_v1 = vsub.f32 1.0, %v912_v63  ;;  %vm938_vm10 = vmor %vm936_vm9, %vm937_vm8  ;;  %v222_v63 = vadd.f32 %v3063_v14, %v3022_v7 }
 0x466   :  { %v933_v57 = vsub.f32 1.0, %v932_v3 }
 0x467   :  { %v914_v16 = vmul.f32 %v2617_v12, %v913_v1 }
 0x468   :  { %v934_v29 = vmul.f32 %v2619_v61, %v933_v57 }
 0x469   :  { %v915_v21 = vadd.f32 %v2617_v12, %v914_v16 }
 0x46a   :  { %v935_v35 = vadd.f32 %v2619_v61, %v934_v29 }
 0x46b   :  { %v919_v39 = vsel %vm918_vm6, %v2617_v12, %v915_v21 }
 0x46c   :  { %v924_v24 = vsel %vm921_vm7, %v923_v22, %v919_v39  ;;  %v939_v37 = vsel %vm938_vm10, %v2619_v61, %v935_v35 }
 0x46d   :  { %v947_v50 = vmul.f32 %v946_v23, %v924_v24  ;;  %v944_v10 = vsel %vm941_vm11, %v943_v51, %v939_v37  ;;  %v2440_v37 = vld [vmem:[#allocation9 + $0x30] sm:$0xf]  ;;  %v2530_v51 = vld [vmem:[#allocation9 + $0x38] sm:$0xf0] }
 0x46f   :  { %v948_v33 = vadd.f32 %v947_v50, %v248_v25 }
 0x471   :  { %2620 = vtanh.f32 %v948_v33 }
 0x477   :  { %v2621_v47 = vpop.eup %2620 }
 0x478   :  { %v950_v31 = vsub.f32 %v3181_v38, %v2621_v47 }
 0x47a   :  { %v951_v13 = vmul.f32 %v950_v31, %v944_v10  ;;  %v2526_v31 = vld [vmem:[#allocation7 + $0x4c] sm:$0xf]  ;;  %v2417_v10 = vld [vmem:[#allocation7 + $0x54] sm:$0xf0] }
 0x47c   :  { %v952_v41 = vadd.f32 %v2621_v47, %v951_v13  ;;  %v3235_v47 = vor.u32 %v2533_v40, %v2452_v8  ;;  %v2460_v40 = vld [vmem:[#allocation9 + $0x50] sm:$0xf] }
 0x47e   :  { %v956_v32 = vsub.f32 %v952_v41, %v3181_v38  ;;  %v2420_v41 = vor.u32 %v2526_v31, %v2417_v10  ;;  %v2531_v31 = vld [vmem:[#allocation9 + $0x40] sm:$0xf0] }
 0x480   :  { %v962_v53 = vmul.f32 %v3202_v52, %v956_v32  ;;  %v2423_v32 = vld [vmem:[#allocation7 + $0x50] sm:$0xf]  ;;  %1292 = vmatpush.bf16.msrb.mxu1 %v2420_v41 }
 0x482   :  { %v3206_v54 = vadd.f32 %v962_v53, %v3181_v38  ;;  %v1186_v38 = vld [vmem:[#allocation2 + $0x18] sm:$0xff] }
 0x483   :  { %v3220_v48 = vpack.c.bf16 %v1186_v38, %v1185_v58  ;;  %v2528_v53 = vld [vmem:[#allocation7 + $0x58] sm:$0xf0]  ;;  %v2411_v38 = vld [vmem:[#allocation7 + $0x38] sm:$0xf]  ;;  %v2525_v58 = vld [vmem:[#allocation7 + $0x40] sm:$0xf0] }
 0x484   :  { %v964_v30 = vmul.f32 %v3206_v54, %v3202_v52  ;;  %v971_v56 = vpack.c.bf16 %v3206_v54, %v3206_v54  ;;  %v2424_v44 = vor.u32 %v2528_v53, %v2423_v32  ;;  %v224_v32 = vadd.f32 %v3065_v15, %v3022_v7 }
 0x486   :  { %2388 = vmatmul.msk.bf16.vlgmr.msrb.gmra.mxu2 %vm155_vm0, %v971_v56  ;;  %966 = vst.msk [vmem:[#allocation2 + $0x28] sm:$0xff] %vm155_vm0, %v964_v30  ;;  %2389 = vmatmul.msk.bf16.vlgmr.msra.gmra.mxu3 %vm155_vm0, %v971_v56  ;;  %v2523_v30 = vld [vmem:[#allocation7 + $0x34] sm:$0xf] }
 0x487   :  { %2390 = vmatmul.msk.bf16.vlgmr.msrb.gmra.mxu0 %vm155_vm0, %v971_v56  ;;  %1423 = vmatpush.bf16.msra.mxu3 %v3235_v47  ;;  %v3238_v56 = vor.u32 %v2530_v51, %v2440_v37  ;;  %v2534_v37 = vld [vmem:[#allocation9 + $0x58] sm:$0xf0]  ;;  %v2448_v51 = vld [vmem:[#allocation9 + $0x38] sm:$0xf] }
 0x488   :  { %1321 = vmatpush.bf16.msrb.mxu2 %v2424_v44  ;;  %v3276_v10 = vor.u32 %v2531_v31, %v2448_v51 }
 0x48b   :  { %1424 = vmatpush.bf16.msra.mxu3 %v3238_v56 }
 0x48d   :  { %v1188_v46 = vld [vmem:[#allocation2 + $0x28] sm:$0xff] }
 0x48e   :  { %v3224_v12 = vpack.c.bf16 %v1188_v46, %v1187_v60 }
 0x497   :  { %2425 = vmatmul.msk.bf16.vlgmr.msra.gmra.mxu0 %vm155_vm0, %v3216_v42 }
 0x4a7   :  { %2426 = vmatmul.msk.bf16.gmra.mxu0 %vm155_vm0, %v3220_v48 }
 0x4b7   :  { %2427 = vmatmul.msk.bf16.gmra.mxu0 %vm155_vm0, %v3224_v12 }
 0x504   :  { %v1010_v61 = vpop.f32.mrf.mxu0 }
 0x505   :  { %v1054_v46 = vadd.f32 %v3032_v27, %v1010_v61 }
 0x509   :  { %v984_v1 = vpop.f32.mrf.mxu2  ;;  %v997_v3 = vpop.f32.mrf.mxu3 }
 0x50a   :  { %v1014_v18 = vadd.f32 %v984_v1, %v3012_v59  ;;  %v1034_v6 = vadd.f32 %v997_v3, %v222_v63  ;;  %v2408_v63 = vor.u32 %v2523_v30, %v2405_v11  ;;  %v2412_v3 = vor.u32 %v2525_v58, %v2411_v38 }
 0x50c   :  { %v2391_v16 = vmul.f32 -1.442695, %v1014_v18  ;;  %v2392_v17 = vmul.f32 -1.442695, %v1034_v6  ;;  %v1012_v36 = vpop.f32.mrf.mxu0  ;;  %v251_v18 = vadd.f32 %v3105_v43, %v3027_v26  ;;  %1293 = vmatpush.bf16.msrb.mxu1 %v2408_v63  ;;  %1322 = vmatpush.bf16.msrb.mxu2 %v2412_v3 }
 0x50e   :  { %2622 = vpow2.f32 %v2391_v16 }
 0x50f   :  { %2624 = vpow2.f32 %v2392_v17 }
 0x511   :  { %v986_v9 = vpop.f32.mrf.mxu2  ;;  %v999_v19 = vpop.f32.mrf.mxu3 }
 0x514   :  { %v2623_v20 = vpop.eup %2622 }
 0x515   :  { %v2625_v21 = vpop.eup %2624  ;;  %v1018_v57 = vadd.f32 1.0, %v2623_v20 }
 0x516   :  { %v1038_v22 = vadd.f32 1.0, %v2625_v21  ;;  %v2532_v21 = vld [vmem:[#allocation9 + $0x4c] sm:$0xf] }
 0x517   :  { %2626 = vrcp.f32 %v1018_v57  ;;  %v1030_v14 = vand.u32 2147483648, %v1018_v57  ;;  %vm1024_vm13 = vweird.f32 %v1018_v57  ;;  %v1028_v50 = vand.u32 2147483647, %v1018_v57 }
 0x518   :  { %2628 = vrcp.f32 %v1038_v22  ;;  %v1050_v61 = vand.u32 2147483648, %v1038_v22  ;;  %vm1044_vm2 = vweird.f32 %v1038_v22  ;;  %v1048_v36 = vand.u32 2147483647, %v1038_v22 }
 0x519   :  { %v1031_v29 = vor.u32 1.1754944e-38, %v1030_v14  ;;  %vm1029_vm15 = vcmp.eq.f32.partialorder %v1028_v50, 8.507059e+37 }
 0x51a   :  { %v1051_v20 = vor.u32 1.1754944e-38, %v1050_v61  ;;  %vm1049_vm4 = vcmp.eq.f32.partialorder %v1048_v36, 8.507059e+37 }
 0x51d   :  { %v2627_v49 = vpop.eup %2626 }
 0x51e   :  { %v2629_v23 = vpop.eup %2628  ;;  %v1020_v39 = vmul.f32 %v2627_v49, %v1018_v57  ;;  %vm1025_vm12 = vweird.f32 %v2627_v49  ;;  %v2454_v57 = vld [vmem:[#allocation9 + $0x54] sm:$0xf0] }
 0x51f   :  { %v1040_v59 = vmul.f32 %v2629_v23, %v1038_v22  ;;  %vm3231_vm14 = vmor %vm1024_vm13, %vm1025_vm12  ;;  %vm1045_vm1 = vweird.f32 %v2629_v23 }
 0x520   :  { %v1021_v24 = vsub.f32 1.0, %v1020_v39  ;;  %vm1046_vm3 = vmor %vm1044_vm2, %vm1045_vm1  ;;  %v2529_v39 = vld [vmem:[#allocation9 + $0x34] sm:$0xf] }
 0x521   :  { %v1041_v33 = vsub.f32 1.0, %v1040_v59  ;;  %v2442_v59 = vld [vmem:[#allocation9 + $0x3c] sm:$0xf0] }
 0x522   :  { %v1022_v35 = vmul.f32 %v2627_v49, %v1021_v24  ;;  %v3250_v50 = vor.u32 %v2529_v39, %v2442_v59 }
 0x523   :  { %v1042_v16 = vmul.f32 %v2629_v23, %v1041_v33 }
 0x524   :  { %v1023_v13 = vadd.f32 %v2627_v49, %v1022_v35 }
 0x525   :  { %v1043_v27 = vadd.f32 %v2629_v23, %v1042_v16 }
 0x526   :  { %v1027_v60 = vsel %vm3231_vm14, %v2627_v49, %v1023_v13  ;;  %v3247_v49 = vor.u32 %v2532_v21, %v2454_v57 }
 0x527   :  { %v1032_v1 = vsel %vm1029_vm15, %v1031_v29, %v1027_v60  ;;  %v1047_v9 = vsel %vm1046_vm3, %v2629_v23, %v1043_v27  ;;  %v3254_v23 = vpop.permute.xlu0 %1067  ;;  %v1266_v60 = vpop.f32.mrf.mxu0 }
 0x528   :  { %v1055_v6 = vmul.f32 %v1054_v46, %v1032_v1  ;;  %v1052_v14 = vsel %vm1049_vm4, %v1051_v20, %v1047_v9  ;;  %1533 = vmatpush.bf16.msrb.mxu0 %v3247_v49 }
 0x52a   :  { %v1056_v17 = vadd.f32 %v1055_v6, %v251_v18 }
 0x52c   :  { %2630 = vtanh.f32 %v1056_v17  ;;  %1534 = vmatpush.bf16.msrb.mxu0 %v3250_v50 }
 0x532   :  { %v2631_v19 = vpop.eup %2630 }
 0x533   :  { %v1058_v43 = vsub.f32 %v3206_v54, %v2631_v19 }
 0x535   :  { %v1059_v24 = vmul.f32 %v1058_v43, %v1052_v14  ;;  %v2722_v14 = vld [vmem:[%s3584_s5] ss:$0 sm:$0xff] }
 0x537   :  { %v1060_v25 = vadd.f32 %v2631_v19, %v1059_v24  ;;  %v253_v24 = vadd.f32 %v3107_v45, %v3027_v26 }
 0x539   :  { %v1064_v22 = vsub.f32 %v1060_v25, %v3206_v54 }
 0x53b   :  { %v1070_v29 = vmul.f32 %v3254_v23, %v1064_v22 }
 0x53d   :  { %v3258_v33 = vadd.f32 %v1070_v29, %v3206_v54  ;;  %v3270_v54 = vor.u32 %v2534_v37, %v2460_v40 }
 0x53f   :  { %v1072_v35 = vmul.f32 %v3258_v33, %v3254_v23  ;;  %v1079_v8 = vpack.c.bf16 %v3258_v33, %v3258_v33  ;;  %1644 = vmatpush.bf16.msra.mxu0 %v3270_v54 }
 0x541   :  { %2394 = vmatmul.msk.bf16.vlgmr.msra.gmra.mxu1 %vm155_vm0, %v1079_v8  ;;  %1074 = vst.msk [vmem:[#allocation2 + $0x30] sm:$0xff] %vm155_vm0, %v1072_v35  ;;  %2395 = vmatmul.msk.bf16.vlgmr.msra.gmra.mxu2 %vm155_vm0, %v1079_v8 }
 0x542   :  { %2396 = vmatmul.msk.bf16.vlgmr.msrb.gmra.mxu3 %vm155_vm0, %v1079_v8  ;;  %1618 = vmatpush.bf16.msra.mxu2 %v3235_v47 }
 0x543   :  { %1436 = vmatpush.bf16.msrb.mxu3 %v3247_v49  ;;  %1546 = vmatpush.bf16.msra.mxu1 %v3270_v54 }
 0x544   :  { %1645 = vmatpush.bf16.msra.mxu0 %v3276_v10 }
 0x546   :  { %1619 = vmatpush.bf16.msra.mxu2 %v3238_v56 }
 0x547   :  { %1437 = vmatpush.bf16.msrb.mxu3 %v3250_v50  ;;  %1547 = vmatpush.bf16.msra.mxu1 %v3276_v10 }
 0x551   :  { %2429 = vmatmul.msk.bf16.vlgmr.msrb.gmra.mxu1 %vm155_vm0, %v3216_v42  ;;  %2433 = vmatmul.msk.bf16.vlgmr.msrb.gmra.mxu2 %vm155_vm0, %v3216_v42  ;;  %v195_v42 = vadd.f32 %v3017_v62, %v3006_v55  ;;  %v3312_v55 = vld [vmem:[%s3583_s4 + $0x3] sm:$0x7] }
 0x552   :  { %1425 = vmatmul.bf16.vlgmr.msra.gmra.mxu3 %v2862_v0  ;;  %1716 = vmatpush.bf16.msrb.mxu1 %v3235_v47  ;;  %v3315_v7 = vperm.slane %v3312_v55, 0  ;;  %v3324_v40 = vperm.slane %v3312_v55, 1 }
 0x553   :  { %1449 = vmatpush.bf16.msra.mxu3 %v3270_v54  ;;  %1729 = vmatpush.bf16.msrb.mxu2 %v3247_v49 }
 0x554   :  { %v1267_v3 = vadd.f32 %v1266_v60, %v3315_v7 }
 0x556   :  { %1717 = vmatpush.bf16.msrb.mxu1 %v3238_v56 }
 0x557   :  { %1450 = vmatpush.bf16.msra.mxu3 %v3276_v10  ;;  %1730 = vmatpush.bf16.msrb.mxu2 %v3250_v50 }
 0x561   :  { %2430 = vmatmul.msk.bf16.gmra.mxu1 %vm155_vm0, %v3220_v48  ;;  %2434 = vmatmul.msk.bf16.gmra.mxu2 %vm155_vm0, %v3220_v48 }
 0x562   :  { %1438 = vmatmul.bf16.vlgmr.msrb.gmra.mxu3 %v2862_v0 }
 0x563   :  { %1520 = vmatpush.bf16.msrb.mxu3 %v3235_v47 }
 0x567   :  { %1521 = vmatpush.bf16.msrb.mxu3 %v3238_v56 }
 0x571   :  { %2431 = vmatmul.msk.bf16.gmra.mxu1 %vm155_vm0, %v3224_v12  ;;  %2435 = vmatmul.msk.bf16.gmra.mxu2 %vm155_vm0, %v3224_v12 }
 0x572   :  { %1451 = vmatmul.bf16.vlgmr.msra.gmra.mxu3 %v2862_v0 }
 0x573   :  { %1631 = vmatpush.bf16.msra.mxu3 %v3247_v49 }
 0x577   :  { %1632 = vmatpush.bf16.msra.mxu3 %v3250_v50 }
 0x5be   :  { %v1092_v48 = vpop.f32.mrf.mxu1 }
 0x5bf   :  { %v1122_v13 = vadd.f32 %v1092_v48, %v195_v42 }
 0x5c1   :  { %v2397_v41 = vmul.f32 -1.442695, %v1122_v13 }
 0x5c3   :  { %2632 = vpow2.f32 %v2397_v41 }
 0x5c4   :  { %v1105_v53 = vpop.f32.mrf.mxu2 }
 0x5c5   :  { %v1142_v30 = vadd.f32 %v1105_v53, %v224_v32  ;;  %v1118_v44 = vpop.f32.mrf.mxu3 }
 0x5c6   :  { %v1094_v12 = vpop.f32.mrf.mxu1  ;;  %v1162_v39 = vadd.f32 %v2722_v14, %v1118_v44 }
 0x5c7   :  { %v2398_v11 = vmul.f32 -1.442695, %v1142_v30 }
 0x5c9   :  { %v2633_v0 = vpop.eup %2632  ;;  %2634 = vpow2.f32 %v2398_v11 }
 0x5ca   :  { %v1126_v38 = vadd.f32 1.0, %v2633_v0 }
 0x5cc   :  { %2636 = vrcp.f32 %v1126_v38  ;;  %v1107_v58 = vpop.f32.mrf.mxu2  ;;  %v1138_v16 = vand.u32 2147483648, %v1126_v38  ;;  %v1136_v61 = vand.u32 2147483647, %v1126_v38  ;;  %vm1132_vm6 = vweird.f32 %v1126_v38 }
 0x5cd   :  { %v1120_v62 = vpop.f32.mrf.mxu3 }
 0x5ce   :  { %v1139_v21 = vor.u32 1.1754944e-38, %v1138_v16  ;;  %vm1137_vm8 = vcmp.eq.f32.partialorder %v1136_v61, 8.507059e+37  ;;  %v1295_v37 = vpop.f32.mrf.mxu1 }
 0x5cf   :  { %v2635_v46 = vpop.eup %2634  ;;  %v1296_v13 = vadd.f32 %v1295_v37, %v3324_v40 }
 0x5d0   :  { %v1146_v15 = vadd.f32 1.0, %v2635_v46 }
 0x5d2   :  { %v2637_v63 = vpop.eup %2636  ;;  %2638 = vrcp.f32 %v1146_v15  ;;  %v1158_v42 = vand.u32 2147483648, %v1146_v15  ;;  %vm1152_vm10 = vweird.f32 %v1146_v15  ;;  %v1156_v48 = vand.u32 2147483647, %v1146_v15 }
 0x5d3   :  { %v1128_v1 = vmul.f32 %v2637_v63, %v1126_v38  ;;  %vm1133_vm5 = vweird.f32 %v2637_v63 }
 0x5d4   :  { %vm1134_vm7 = vmor %vm1132_vm6, %vm1133_vm5  ;;  %v1159_v53 = vor.u32 1.1754944e-38, %v1158_v42  ;;  %vm1157_vm12 = vcmp.eq.f32.partialorder %v1156_v48, 8.507059e+37 }
 0x5d5   :  { %v1129_v18 = vsub.f32 1.0, %v1128_v1  ;;  %v1426_v6 = vpop.f32.mrf.mxu3 }
 0x5d6   :  { %v1456_v17 = vadd.f32 %v1426_v6, %v1267_v3 }
 0x5d7   :  { %v1130_v27 = vmul.f32 %v2637_v63, %v1129_v18 }
 0x5d8   :  { %v2639_v36 = vpop.eup %2638  ;;  %v2462_v9 = vmul.f32 -1.442695, %v1456_v17 }
 0x5d9   :  { %v1148_v19 = vmul.f32 %v2639_v36, %v1146_v15  ;;  %v1131_v20 = vadd.f32 %v2637_v63, %v1130_v27  ;;  %vm1153_vm9 = vweird.f32 %v2639_v36  ;;  %v3336_v27 = vld [vmem:[%s3584_s5 + $0x1] ss:$0 sm:$0xff] }
 0x5da   :  { %2640 = vpow2.f32 %v2462_v9  ;;  %vm1154_vm11 = vmor %vm1152_vm10, %vm1153_vm9  ;;  %v3340_v9 = vperm.slane %v3312_v55, 2 }
 0x5db   :  { %v1149_v57 = vsub.f32 1.0, %v1148_v19  ;;  %v1135_v43 = vsel %vm1134_vm7, %v2637_v63, %v1131_v20  ;;  %v3329_v63 = vpop.permute.xlu1 %1175  ;;  %v1324_v20 = vpop.f32.mrf.mxu2 }
 0x5dc   :  { %v1140_v59 = vsel %vm1137_vm8, %v1139_v21, %v1135_v43  ;;  %v1325_v14 = vadd.f32 %v1324_v20, %v3340_v9 }
 0x5dd   :  { %v1163_v25 = vmul.f32 %v1162_v39, %v1140_v59  ;;  %v1428_v22 = vpop.f32.mrf.mxu3  ;;  %v1150_v29 = vmul.f32 %v2639_v36, %v1149_v57 }
 0x5df   :  { %v1164_v35 = vadd.f32 %v1163_v25, %v253_v24  ;;  %v1151_v31 = vadd.f32 %v2639_v36, %v1150_v29 }
 0x5e0   :  { %v2641_v8 = vpop.eup %2640 }
 0x5e1   :  { %2642 = vtanh.f32 %v1164_v35  ;;  %v1460_v51 = vadd.f32 1.0, %v2641_v8  ;;  %v1155_v45 = vsel %vm1154_vm11, %v2639_v36, %v1151_v31  ;;  %v1189_v35 = vld [vmem:[#allocation2 + $0x30] sm:$0xff] }
 0x5e2   :  { %v1160_v11 = vsel %vm1157_vm12, %v1159_v53, %v1155_v45 }
 0x5e3   :  { %2644 = vrcp.f32 %v1460_v51  ;;  %v1472_v16 = vand.u32 2147483648, %v1460_v51  ;;  %vm1466_vm14 = vweird.f32 %v1460_v51  ;;  %v1470_v61 = vand.u32 2147483647, %v1460_v51 }
 0x5e5   :  { %v1439_v26 = vpop.f32.mrf.mxu3  ;;  %v1473_v57 = vor.u32 1.1754944e-38, %v1472_v16  ;;  %vm1471_vm1 = vcmp.eq.f32.partialorder %v1470_v61, 8.507059e+37 }
 0x5e6   :  { %v1476_v41 = vadd.f32 %v1439_v26, %v1296_v13 }
 0x5e7   :  { %v2643_v32 = vpop.eup %2642 }
 0x5e8   :  { %v1166_v30 = vsub.f32 %v3258_v33, %v2643_v32  ;;  %v2463_v44 = vmul.f32 -1.442695, %v1476_v41 }
 0x5e9   :  { %v2645_v12 = vpop.eup %2644 }
 0x5ea   :  { %v1167_v0 = vmul.f32 %v1166_v30, %v1160_v11  ;;  %2646 = vpow2.f32 %v2463_v44  ;;  %v1462_v38 = vmul.f32 %v2645_v12, %v1460_v51  ;;  %vm1467_vm13 = vweird.f32 %v2645_v12  ;;  %v1297_v11 = vpop.f32.mrf.mxu1 }
 0x5eb   :  { %vm1468_vm15 = vmor %vm1466_vm14, %vm1467_vm13 }
 0x5ec   :  { %v1168_v58 = vadd.f32 %v2643_v32, %v1167_v0  ;;  %v1463_v62 = vsub.f32 1.0, %v1462_v38 }
 0x5ed   :  { %v1441_v46 = vpop.f32.mrf.mxu3 }
 0x5ee   :  { %v1172_v15 = vsub.f32 %v1168_v58, %v3258_v33  ;;  %v1464_v60 = vmul.f32 %v2645_v12, %v1463_v62 }
 0x5f0   :  { %v2647_v1 = vpop.eup %2646  ;;  %v1178_v3 = vmul.f32 %v3329_v63, %v1172_v15  ;;  %v1465_v18 = vadd.f32 %v2645_v12, %v1464_v60 }
 0x5f1   :  { %v1480_v6 = vadd.f32 1.0, %v2647_v1 }
 0x5f2   :  { %v1179_v17 = vadd.f32 %v1178_v3, %v3258_v33  ;;  %v1469_v19 = vsel %vm1468_vm15, %v2645_v12, %v1465_v18  ;;  %v3367_v38 = vpop.f32.mrf.mxu1 }
 0x5f3   :  { %2648 = vrcp.f32 %v1480_v6  ;;  %v1474_v43 = vsel %vm1471_vm1, %v1473_v57, %v1469_v19  ;;  %v1492_v55 = vand.u32 2147483648, %v1480_v6  ;;  %v1490_v51 = vand.u32 2147483647, %v1480_v6 }
 0x5f4   :  { %v1180_v36 = vmul.f32 %v1179_v17, %v3329_v63  ;;  %vm1486_vm3 = vweird.f32 %v1480_v6  ;;  %v1298_v17 = vadd.f32 %v1297_v11, %v3324_v40 }
 0x5f5   :  { %v1452_v21 = vpop.f32.mrf.mxu3  ;;  %v1493_v48 = vor.u32 1.1754944e-38, %v1492_v55  ;;  %vm1491_vm5 = vcmp.eq.f32.partialorder %v1490_v51, 8.507059e+37 }
 0x5f6   :  { %1182 = vst.msk [vmem:[#allocation2 + $0x38] sm:$0xff] %vm155_vm0, %v1180_v36  ;;  %v1496_v33 = vadd.f32 %v3336_v27, %v1452_v21 }
 0x5f8   :  { %v1497_v39 = vmul.f32 %v1496_v33, %v1474_v43 }
 0x5f9   :  { %v2649_v59 = vpop.eup %2648 }
 0x5fa   :  { %v1482_v24 = vmul.f32 %v2649_v59, %v1480_v6  ;;  %v1498_v25 = vadd.f32 %v1497_v39, %v1325_v14  ;;  %vm1487_vm2 = vweird.f32 %v2649_v59  ;;  %v3371_v62 = vpop.f32.mrf.mxu1 }
 0x5fb   :  { %vm1488_vm4 = vmor %vm1486_vm3, %vm1487_vm2 }
 0x5fc   :  { %v1483_v22 = vsub.f32 1.0, %v1482_v24  ;;  %2650 = vtanh.f32 %v1498_v25 }
 0x5fd   :  { %v1454_v29 = vpop.f32.mrf.mxu3  ;;  %v1190_v8 = vld [vmem:[#allocation2 + $0x38] sm:$0xff] }
 0x5fe   :  { %v1484_v37 = vmul.f32 %v2649_v59, %v1483_v22  ;;  %v1203_v31 = vpack.c.bf16 %v1190_v8, %v1189_v35 }
 0x600   :  { %v1485_v42 = vadd.f32 %v2649_v59, %v1484_v37  ;;  %2428 = vmatmul.msk.bf16.gmra.mxu0 %vm155_vm0, %v1203_v31  ;;  %2432 = vmatmul.msk.bf16.gmra.mxu1 %vm155_vm0, %v1203_v31 }
 0x601   :  { %2436 = vmatmul.msk.bf16.gmra.mxu2 %vm155_vm0, %v1203_v31 }
 0x602   :  { %v2651_v13 = vpop.eup %2650  ;;  %v1489_v26 = vsel %vm1488_vm4, %v2649_v59, %v1485_v42  ;;  %v3375_v15 = vpop.f32.mrf.mxu1 }
 0x603   :  { %v1494_v45 = vsel %vm1491_vm5, %v1493_v48, %v1489_v26  ;;  %v1500_v41 = vsub.f32 0.0, %v2651_v13  ;;  %v1326_v26 = vpop.f32.mrf.mxu2 }
 0x605   :  { %v1501_v32 = vmul.f32 %v1500_v41, %v1494_v45 }
 0x607   :  { %v1502_v53 = vadd.f32 %v2651_v13, %v1501_v32 }
 0x609   :  { %v3349_v30 = vmul.f32 %v1502_v53, %v3036_v2 }
 0x60a   :  { %v3379_v1 = vpop.f32.mrf.mxu1 }
 0x60b   :  { %v1505_v44 = vmul.f32 %v3349_v30, %v3036_v2  ;;  %v1510_v12 = vpack.c.bf16 %v3349_v30, %v3349_v30  ;;  %v1268_v2 = vpop.f32.mrf.mxu0 }
 0x60c   :  { %v1269_v20 = vadd.f32 %v1268_v2, %v3315_v7 }
 0x60d   :  { %1506 = vst.msk [vmem:[#allocation2] sm:$0xff] %vm155_vm0, %v1505_v44  ;;  %2464 = vmatmul.msk.bf16.vlgmr.msrb.gmra.mxu3 %vm155_vm0, %v1510_v12 }
 0x60e   :  { %1742 = vmatpush.bf16.msrb.mxu3 %v3270_v54 }
 0x610   :  { %2465 = vmatmul.msk.bf16.vlgmr.msrb.gmra.mxu0 %vm155_vm0, %v1510_v12  ;;  %2466 = vmatmul.msk.bf16.vlgmr.msra.gmra.mxu1 %vm155_vm0, %v1510_v12  ;;  %v1327_v12 = vadd.f32 %v1326_v26, %v3340_v9 }
 0x611   :  { %1814 = vmatpush.bf16.msrb.mxu0 %v3235_v47  ;;  %1827 = vmatpush.bf16.msra.mxu1 %v3247_v49 }
 0x612   :  { %1743 = vmatpush.bf16.msrb.mxu3 %v3276_v10 }
 0x613   :  { %v3365_v0 = vpop.f32.mrf.mxu0 }
 0x615   :  { %1815 = vmatpush.bf16.msrb.mxu0 %v3238_v56  ;;  %1828 = vmatpush.bf16.msra.mxu1 %v3250_v50 }
 0x61b   :  { %v3369_v58 = vpop.f32.mrf.mxu0 }
 0x623   :  { %v3373_v46 = vpop.f32.mrf.mxu0 }
 0x62b   :  { %v3377_v60 = vpop.f32.mrf.mxu0 }
 0x67d   :  { %v3381_v3 = vpop.f32.mrf.mxu0  ;;  %v3383_v18 = vpop.f32.mrf.mxu1 }
 0x685   :  { %v3385_v6 = vpop.f32.mrf.mxu0  ;;  %v3387_v16 = vpop.f32.mrf.mxu1 }
 0x68d   :  { %v1536_v61 = vpop.f32.mrf.mxu0  ;;  %v1549_v36 = vpop.f32.mrf.mxu1 }
 0x68e   :  { %v1573_v19 = vadd.f32 %v1536_v61, %v1298_v17  ;;  %v1593_v32 = vadd.f32 %v3336_v27, %v1549_v36 }
 0x690   :  { %v2468_v21 = vmul.f32 -1.442695, %v1573_v19  ;;  %v1523_v57 = vpop.f32.mrf.mxu3 }
 0x691   :  { %v1553_v33 = vadd.f32 %v1523_v57, %v1269_v20 }
 0x692   :  { %2652 = vpow2.f32 %v2468_v21 }
 0x693   :  { %v2467_v43 = vmul.f32 -1.442695, %v1553_v33 }
 0x695   :  { %2654 = vpow2.f32 %v2467_v43  ;;  %v1538_v14 = vpop.f32.mrf.mxu0  ;;  %v1551_v39 = vpop.f32.mrf.mxu1 }
 0x698   :  { %v2653_v59 = vpop.eup %2652  ;;  %v1525_v24 = vpop.f32.mrf.mxu3 }
 0x699   :  { %v1577_v22 = vadd.f32 1.0, %v2653_v59 }
 0x69b   :  { %v2655_v25 = vpop.eup %2654  ;;  %v1589_v19 = vand.u32 2147483648, %v1577_v22  ;;  %vm1583_vm11 = vweird.f32 %v1577_v22  ;;  %v1587_v20 = vand.u32 2147483647, %v1577_v22 }
 0x69c   :  { %v1557_v55 = vadd.f32 1.0, %v2655_v25 }
 0x69d   :  { %v1590_v33 = vor.u32 1.1754944e-38, %v1589_v19  ;;  %vm1588_vm13 = vcmp.eq.f32.partialorder %v1587_v20, 8.507059e+37 }
 0x69e   :  { %2656 = vrcp.f32 %v1557_v55  ;;  %v1569_v31 = vand.u32 2147483648, %v1557_v55  ;;  %v1567_v48 = vand.u32 2147483647, %v1557_v55  ;;  %vm1563_vm7 = vweird.f32 %v1557_v55 }
 0x69f   :  { %2658 = vrcp.f32 %v1577_v22 }
 0x6a0   :  { %v1570_v41 = vor.u32 1.1754944e-38, %v1569_v31  ;;  %vm1568_vm9 = vcmp.eq.f32.partialorder %v1567_v48, 8.507059e+37  ;;  %v1272_v31 = vadd.f32 %v3365_v0, %v3315_v7 }
 0x6a4   :  { %v2657_v29 = vpop.eup %2656 }
 0x6a5   :  { %v2659_v35 = vpop.eup %2658  ;;  %v1559_v8 = vmul.f32 %v2657_v29, %v1557_v55  ;;  %vm1564_vm6 = vweird.f32 %v2657_v29 }
 0x6a6   :  { %v1579_v51 = vmul.f32 %v2659_v35, %v1577_v22  ;;  %vm1565_vm8 = vmor %vm1563_vm7, %vm1564_vm6  ;;  %vm1584_vm10 = vweird.f32 %v2659_v35 }
 0x6a7   :  { %v1560_v37 = vsub.f32 1.0, %v1559_v8  ;;  %vm1585_vm12 = vmor %vm1583_vm11, %vm1584_vm10 }
 0x6a8   :  { %v1580_v45 = vsub.f32 1.0, %v1579_v51 }
 0x6a9   :  { %v1561_v42 = vmul.f32 %v2657_v29, %v1560_v37 }
 0x6aa   :  { %v1581_v11 = vmul.f32 %v2659_v35, %v1580_v45 }
 0x6ab   :  { %v1562_v13 = vadd.f32 %v2657_v29, %v1561_v42  ;;  %v1301_v42 = vadd.f32 %v3367_v38, %v3324_v40 }
 0x6ac   :  { %v1582_v61 = vadd.f32 %v2659_v35, %v1581_v11 }
 0x6ad   :  { %v1566_v53 = vsel %vm1565_vm8, %v2657_v29, %v1562_v13 }
 0x6ae   :  { %v1571_v44 = vsel %vm1568_vm9, %v1570_v41, %v1566_v53  ;;  %v1586_v21 = vsel %vm1585_vm12, %v2659_v35, %v1582_v61 }
 0x6af   :  { %v1594_v2 = vmul.f32 %v1593_v32, %v1571_v44  ;;  %v1591_v43 = vsel %vm1588_vm13, %v1590_v33, %v1586_v21 }
 0x6b1   :  { %v1595_v17 = vadd.f32 %v1594_v2, %v1327_v12 }
 0x6b3   :  { %2660 = vtanh.f32 %v1595_v17 }
 0x6b9   :  { %v2661_v57 = vpop.eup %2660 }
 0x6ba   :  { %v1597_v36 = vsub.f32 %v3349_v30, %v2661_v57 }
 0x6bc   :  { %v1598_v14 = vmul.f32 %v1597_v36, %v1591_v43 }
 0x6be   :  { %v1599_v39 = vadd.f32 %v2661_v57, %v1598_v14 }
 0x6c0   :  { %v1600_v59 = vsub.f32 %v1599_v39, %v3349_v30 }
 0x6c2   :  { %v1601_v24 = vmul.f32 %v1600_v59, %v3079_v34 }
 0x6c4   :  { %v3397_v25 = vadd.f32 %v1601_v24, %v3349_v30 }
 0x6c6   :  { %v1603_v22 = vmul.f32 %v3397_v25, %v3079_v34  ;;  %v1608_v55 = vpack.c.bf16 %v3397_v25, %v3397_v25  ;;  %v1329_v34 = vpop.f32.mrf.mxu2 }
 0x6c8   :  { %2469 = vmatmul.msk.bf16.vlgmr.msra.gmra.mxu2 %vm155_vm0, %v1608_v55  ;;  %1604 = vst.msk [vmem:[#allocation2 + $0x8] sm:$0xff] %vm155_vm0, %v1603_v22  ;;  %2470 = vmatmul.msk.bf16.vlgmr.msra.gmra.mxu3 %vm155_vm0, %v1608_v55 }
 0x6c9   :  { %2471 = vmatmul.msk.bf16.vlgmr.msra.gmra.mxu0 %vm155_vm0, %v1608_v55  ;;  %1840 = vmatpush.bf16.msra.mxu2 %v3270_v54  ;;  %v1330_v55 = vadd.f32 %v1329_v34, %v3340_v9 }
 0x6ca   :  { %1912 = vmatpush.bf16.msra.mxu3 %v3235_v47  ;;  %1925 = vmatpush.bf16.msra.mxu0 %v3247_v49 }
 0x6cd   :  { %1841 = vmatpush.bf16.msra.mxu2 %v3276_v10 }
 0x6ce   :  { %1913 = vmatpush.bf16.msra.mxu3 %v3238_v56  ;;  %1926 = vmatpush.bf16.msra.mxu0 %v3250_v50  ;;  %v3413_v30 = vpop.f32.mrf.mxu2 }
 0x6d6   :  { %v3415_v29 = vpop.f32.mrf.mxu2 }
 0x6de   :  { %v3417_v35 = vpop.f32.mrf.mxu2 }
 0x6e6   :  { %v3419_v8 = vpop.f32.mrf.mxu2 }
 0x6ee   :  { %v3421_v37 = vpop.f32.mrf.mxu2 }
 0x746   :  { %v1647_v51 = vpop.f32.mrf.mxu0 }
 0x747   :  { %v1691_v59 = vadd.f32 %v3336_v27, %v1647_v51 }
 0x74b   :  { %v1621_v48 = vpop.f32.mrf.mxu2  ;;  %v1634_v13 = vpop.f32.mrf.mxu3 }
 0x74c   :  { %v1651_v26 = vadd.f32 %v1621_v48, %v1272_v31  ;;  %v1671_v45 = vadd.f32 %v1634_v13, %v1301_v42 }
 0x74e   :  { %v2472_v41 = vmul.f32 -1.442695, %v1651_v26  ;;  %v2473_v32 = vmul.f32 -1.442695, %v1671_v45  ;;  %v1649_v53 = vpop.f32.mrf.mxu0 }
 0x750   :  { %2662 = vpow2.f32 %v2472_v41 }
 0x751   :  { %2664 = vpow2.f32 %v2473_v32 }
 0x753   :  { %v1623_v44 = vpop.f32.mrf.mxu2  ;;  %v1636_v12 = vpop.f32.mrf.mxu3 }
 0x756   :  { %v2663_v2 = vpop.eup %2662 }
 0x757   :  { %v2665_v11 = vpop.eup %2664  ;;  %v1655_v17 = vadd.f32 1.0, %v2663_v2 }
 0x758   :  { %v1675_v61 = vadd.f32 1.0, %v2665_v11 }
 0x759   :  { %2666 = vrcp.f32 %v1655_v17  ;;  %v1667_v21 = vand.u32 2147483648, %v1655_v17  ;;  %v1665_v36 = vand.u32 2147483647, %v1655_v17  ;;  %vm1661_vm15 = vweird.f32 %v1655_v17 }
 0x75a   :  { %2668 = vrcp.f32 %v1675_v61  ;;  %v1687_v26 = vand.u32 2147483648, %v1675_v61  ;;  %vm1681_vm4 = vweird.f32 %v1675_v61  ;;  %v1685_v45 = vand.u32 2147483647, %v1675_v61 }
 0x75b   :  { %v1668_v14 = vor.u32 1.1754944e-38, %v1667_v21  ;;  %vm1666_vm2 = vcmp.eq.f32.partialorder %v1665_v36, 8.507059e+37 }
 0x75c   :  { %v1688_v53 = vor.u32 1.1754944e-38, %v1687_v26  ;;  %vm1686_vm6 = vcmp.eq.f32.partialorder %v1685_v45, 8.507059e+37 }
 0x75f   :  { %v2667_v0 = vpop.eup %2666 }
 0x760   :  { %v2669_v19 = vpop.eup %2668  ;;  %v1657_v38 = vmul.f32 %v2667_v0, %v1655_v17  ;;  %vm1662_vm14 = vweird.f32 %v2667_v0 }
 0x761   :  { %v1677_v57 = vmul.f32 %v2669_v19, %v1675_v61  ;;  %vm1663_vm1 = vmor %vm1661_vm15, %vm1662_vm14  ;;  %vm1682_vm3 = vweird.f32 %v2669_v19 }
 0x762   :  { %v1658_v20 = vsub.f32 1.0, %v1657_v38  ;;  %vm1683_vm5 = vmor %vm1681_vm4, %vm1682_vm3 }
 0x763   :  { %v1678_v39 = vsub.f32 1.0, %v1677_v57 }
 0x764   :  { %v1659_v33 = vmul.f32 %v2667_v0, %v1658_v20  ;;  %v1303_v20 = vadd.f32 %v3371_v62, %v3324_v40 }
 0x765   :  { %v1679_v42 = vmul.f32 %v2669_v19, %v1678_v39 }
 0x766   :  { %v1660_v43 = vadd.f32 %v2667_v0, %v1659_v33 }
 0x767   :  { %v1680_v13 = vadd.f32 %v2669_v19, %v1679_v42 }
 0x768   :  { %v1664_v24 = vsel %vm1663_vm1, %v2667_v0, %v1660_v43 }
 0x769   :  { %v1669_v22 = vsel %vm1666_vm2, %v1668_v14, %v1664_v24  ;;  %v1684_v41 = vsel %vm1683_vm5, %v2669_v19, %v1680_v13 }
 0x76a   :  { %v1692_v31 = vmul.f32 %v1691_v59, %v1669_v22  ;;  %v1689_v44 = vsel %vm1686_vm6, %v1688_v53, %v1684_v41 }
 0x76c   :  { %v1693_v48 = vadd.f32 %v1692_v31, %v1330_v55 }
 0x76e   :  { %2670 = vtanh.f32 %v1693_v48 }
 0x774   :  { %v2671_v32 = vpop.eup %2670 }
 0x775   :  { %v1695_v51 = vsub.f32 %v3397_v25, %v2671_v32 }
 0x777   :  { %v1696_v12 = vmul.f32 %v1695_v51, %v1689_v44 }
 0x779   :  { %v1697_v2 = vadd.f32 %v2671_v32, %v1696_v12 }
 0x77b   :  { %v1698_v34 = vsub.f32 %v1697_v2, %v3397_v25  ;;  %v1332_v2 = vadd.f32 %v3413_v30, %v3340_v9 }
 0x77d   :  { %v1699_v11 = vmul.f32 %v1698_v34, %v3116_v5 }
 0x77f   :  { %v3433_v17 = vadd.f32 %v1699_v11, %v3397_v25 }
 0x781   :  { %v1701_v61 = vmul.f32 %v3433_v17, %v3116_v5  ;;  %v1706_v0 = vpack.c.bf16 %v3433_v17, %v3433_v17  ;;  %v1274_v5 = vadd.f32 %v3369_v58, %v3315_v7 }
 0x783   :  { %1702 = vst.msk [vmem:[#allocation2 + $0x10] sm:$0xff] %vm155_vm0, %v1701_v61  ;;  %2474 = vmatmul.msk.bf16.vlgmr.msrb.gmra.mxu1 %vm155_vm0, %v1706_v0  ;;  %2475 = vmatmul.msk.bf16.vlgmr.msrb.gmra.mxu2 %vm155_vm0, %v1706_v0 }
 0x784   :  { %2476 = vmatmul.msk.bf16.vlgmr.msrb.gmra.mxu3 %vm155_vm0, %v1706_v0  ;;  %1938 = vmatpush.bf16.msrb.mxu1 %v3270_v54 }
 0x785   :  { %2010 = vmatpush.bf16.msrb.mxu2 %v3235_v47  ;;  %2023 = vmatpush.bf16.msrb.mxu3 %v3247_v49 }
 0x788   :  { %1939 = vmatpush.bf16.msrb.mxu1 %v3276_v10 }
 0x789   :  { %2011 = vmatpush.bf16.msrb.mxu2 %v3238_v56  ;;  %2024 = vmatpush.bf16.msrb.mxu3 %v3250_v50 }
 0x800   :  { %v1719_v25 = vpop.f32.mrf.mxu1 }
 0x801   :  { %v1749_v19 = vadd.f32 %v1719_v25, %v1274_v5 }
 0x803   :  { %v2477_v38 = vmul.f32 -1.442695, %v1749_v19 }
 0x805   :  { %2672 = vpow2.f32 %v2477_v38 }
 0x806   :  { %v1732_v21 = vpop.f32.mrf.mxu2 }
 0x807   :  { %v1769_v57 = vadd.f32 %v1732_v21, %v1303_v20  ;;  %v1745_v33 = vpop.f32.mrf.mxu3 }
 0x808   :  { %v1721_v36 = vpop.f32.mrf.mxu1  ;;  %v1789_v44 = vadd.f32 %v3336_v27, %v1745_v33 }
 0x809   :  { %v2478_v43 = vmul.f32 -1.442695, %v1769_v57 }
 0x80b   :  { %v2673_v14 = vpop.eup %2672  ;;  %2674 = vpow2.f32 %v2478_v43 }
 0x80c   :  { %v1753_v39 = vadd.f32 1.0, %v2673_v14 }
 0x80e   :  { %2676 = vrcp.f32 %v1753_v39  ;;  %v1734_v59 = vpop.f32.mrf.mxu2  ;;  %v1765_v48 = vand.u32 2147483648, %v1753_v39  ;;  %v1763_v13 = vand.u32 2147483647, %v1753_v39  ;;  %vm1759_vm8 = vweird.f32 %v1753_v39 }
 0x80f   :  { %v1747_v24 = vpop.f32.mrf.mxu3 }
 0x810   :  { %v1766_v32 = vor.u32 1.1754944e-38, %v1765_v48  ;;  %vm1764_vm10 = vcmp.eq.f32.partialorder %v1763_v13, 8.507059e+37 }
 0x811   :  { %v2675_v22 = vpop.eup %2674 }
 0x812   :  { %v1773_v58 = vadd.f32 1.0, %v2675_v22 }
 0x814   :  { %v2677_v55 = vpop.eup %2676  ;;  %2678 = vrcp.f32 %v1773_v58  ;;  %v1785_v5 = vand.u32 2147483648, %v1773_v58  ;;  %vm1779_vm12 = vweird.f32 %v1773_v58  ;;  %v1783_v25 = vand.u32 2147483647, %v1773_v58 }
 0x815   :  { %v1755_v31 = vmul.f32 %v2677_v55, %v1753_v39  ;;  %vm1760_vm7 = vweird.f32 %v2677_v55 }
 0x816   :  { %vm1761_vm9 = vmor %vm1759_vm8, %vm1760_vm7  ;;  %v1786_v20 = vor.u32 1.1754944e-38, %v1785_v5  ;;  %vm1784_vm14 = vcmp.eq.f32.partialorder %v1783_v25, 8.507059e+37  ;;  %v1335_v5 = vadd.f32 %v3415_v29, %v3340_v9 }
 0x817   :  { %v1756_v42 = vsub.f32 1.0, %v1755_v31 }
 0x819   :  { %v1757_v62 = vmul.f32 %v2677_v55, %v1756_v42 }
 0x81a   :  { %v2679_v26 = vpop.eup %2678 }
 0x81b   :  { %v1775_v45 = vmul.f32 %v2679_v26, %v1773_v58  ;;  %v1758_v41 = vadd.f32 %v2677_v55, %v1757_v62  ;;  %vm1780_vm11 = vweird.f32 %v2679_v26 }
 0x81c   :  { %vm1781_vm13 = vmor %vm1779_vm12, %vm1780_vm11 }
 0x81d   :  { %v1776_v53 = vsub.f32 1.0, %v1775_v45  ;;  %v1762_v51 = vsel %vm1761_vm9, %v2677_v55, %v1758_v41 }
 0x81e   :  { %v1767_v12 = vsel %vm1764_vm10, %v1766_v32, %v1762_v51 }
 0x81f   :  { %v1790_v34 = vmul.f32 %v1789_v44, %v1767_v12  ;;  %v1777_v11 = vmul.f32 %v2679_v26, %v1776_v53 }
 0x821   :  { %v1791_v61 = vadd.f32 %v1790_v34, %v1332_v2  ;;  %v1778_v0 = vadd.f32 %v2679_v26, %v1777_v11 }
 0x823   :  { %2680 = vtanh.f32 %v1791_v61  ;;  %v1782_v19 = vsel %vm1781_vm13, %v2679_v26, %v1778_v0 }
 0x824   :  { %v1787_v57 = vsel %vm1784_vm14, %v1786_v20, %v1782_v19 }
 0x829   :  { %v2681_v38 = vpop.eup %2680 }
 0x82a   :  { %v1793_v21 = vsub.f32 %v3433_v17, %v2681_v38 }
 0x82c   :  { %v1794_v33 = vmul.f32 %v1793_v21, %v1787_v57 }
 0x82e   :  { %v1795_v36 = vadd.f32 %v2681_v38, %v1794_v33 }
 0x830   :  { %v1796_v30 = vsub.f32 %v1795_v36, %v3433_v17 }
 0x832   :  { %v1797_v43 = vmul.f32 %v1796_v30, %v3149_v28 }
 0x834   :  { %v3460_v14 = vadd.f32 %v1797_v43, %v3433_v17  ;;  %v1306_v17 = vadd.f32 %v3375_v15, %v3324_v40 }
 0x836   :  { %v1799_v39 = vmul.f32 %v3460_v14, %v3149_v28  ;;  %v1804_v59 = vpack.c.bf16 %v3460_v14, %v3460_v14  ;;  %v1277_v28 = vadd.f32 %v3373_v46, %v3315_v7 }
 0x838   :  { %1800 = vst.msk [vmem:[#allocation2 + $0x18] sm:$0xff] %vm155_vm0, %v1799_v39  ;;  %2479 = vmatmul.msk.bf16.vlgmr.msrb.gmra.mxu0 %vm155_vm0, %v1804_v59  ;;  %2480 = vmatmul.msk.bf16.vlgmr.msra.gmra.mxu1 %vm155_vm0, %v1804_v59 }
 0x839   :  { %2481 = vmatmul.msk.bf16.vlgmr.msra.gmra.mxu2 %vm155_vm0, %v1804_v59  ;;  %2036 = vmatpush.bf16.msrb.mxu0 %v3270_v54 }
 0x83a   :  { %2108 = vmatpush.bf16.msra.mxu1 %v3235_v47  ;;  %2121 = vmatpush.bf16.msra.mxu2 %v3247_v49 }
 0x83d   :  { %2037 = vmatpush.bf16.msrb.mxu0 %v3276_v10 }
 0x83e   :  { %2109 = vmatpush.bf16.msra.mxu1 %v3238_v56  ;;  %2122 = vmatpush.bf16.msra.mxu2 %v3250_v50 }
 0x8b5   :  { %v1817_v24 = vpop.f32.mrf.mxu0  ;;  %v1830_v22 = vpop.f32.mrf.mxu1 }
 0x8b6   :  { %v1847_v58 = vadd.f32 %v1817_v24, %v1277_v28  ;;  %v1867_v55 = vadd.f32 %v1830_v22, %v1306_v17 }
 0x8b8   :  { %v2482_v31 = vmul.f32 -1.442695, %v1847_v58  ;;  %v2483_v47 = vmul.f32 -1.442695, %v1867_v55 }
 0x8ba   :  { %2682 = vpow2.f32 %v2482_v31 }
 0x8bb   :  { %2684 = vpow2.f32 %v2483_v47 }
 0x8bc   :  { %v1843_v49 = vpop.f32.mrf.mxu2 }
 0x8bd   :  { %v1819_v42 = vpop.f32.mrf.mxu0  ;;  %v1832_v48 = vpop.f32.mrf.mxu1  ;;  %v1887_v61 = vadd.f32 %v3336_v27, %v1843_v49  ;;  %v1279_v49 = vadd.f32 %v3377_v60, %v3315_v7 }
 0x8c0   :  { %v2683_v56 = vpop.eup %2682 }
 0x8c1   :  { %v2685_v62 = vpop.eup %2684  ;;  %v1851_v50 = vadd.f32 1.0, %v2683_v56 }
 0x8c2   :  { %v1871_v13 = vadd.f32 1.0, %v2685_v62 }
 0x8c3   :  { %2686 = vrcp.f32 %v1851_v50  ;;  %v1863_v53 = vand.u32 2147483648, %v1851_v50  ;;  %v1861_v44 = vand.u32 2147483647, %v1851_v50  ;;  %vm1857_vm1 = vweird.f32 %v1851_v50 }
 0x8c4   :  { %2688 = vrcp.f32 %v1871_v13  ;;  %v1845_v46 = vpop.f32.mrf.mxu2  ;;  %v1883_v21 = vand.u32 2147483648, %v1871_v13  ;;  %vm1877_vm5 = vweird.f32 %v1871_v13  ;;  %v1881_v57 = vand.u32 2147483647, %v1871_v13 }
 0x8c5   :  { %v1864_v34 = vor.u32 1.1754944e-38, %v1863_v53  ;;  %vm1862_vm3 = vcmp.eq.f32.partialorder %v1861_v44, 8.507059e+37  ;;  %v2536_v44 = vld [vmem:[#allocation10 + $0x8] sm:$0xff] }
 0x8c6   :  { %v1884_v30 = vor.u32 1.1754944e-38, %v1883_v21  ;;  %vm1882_vm7 = vcmp.eq.f32.partialorder %v1881_v57, 8.507059e+37 }
 0x8c9   :  { %v2687_v26 = vpop.eup %2686 }
 0x8ca   :  { %v2689_v15 = vpop.eup %2688  ;;  %v1853_v45 = vmul.f32 %v2687_v26, %v1851_v50  ;;  %vm1858_vm15 = vweird.f32 %v2687_v26 }
 0x8cb   :  { %v1873_v32 = vmul.f32 %v2689_v15, %v1871_v13  ;;  %vm1859_vm2 = vmor %vm1857_vm1, %vm1858_vm15  ;;  %vm1878_vm4 = vweird.f32 %v2689_v15 }
 0x8cc   :  { %v1854_v41 = vsub.f32 1.0, %v1853_v45  ;;  %vm1879_vm6 = vmor %vm1877_vm5, %vm1878_vm4 }
 0x8cd   :  { %v1874_v2 = vsub.f32 1.0, %v1873_v32 }
 0x8ce   :  { %v1855_v51 = vmul.f32 %v2687_v26, %v1854_v41 }
 0x8cf   :  { %v1875_v19 = vmul.f32 %v2689_v15, %v1874_v2  ;;  %v2535_v2 = vld [vmem:[#allocation10] sm:$0xff] }
 0x8d0   :  { %v1856_v12 = vadd.f32 %v2687_v26, %v1855_v51 }
 0x8d1   :  { %v1876_v20 = vadd.f32 %v2689_v15, %v1875_v19 }
 0x8d2   :  { %v1860_v11 = vsel %vm1859_vm2, %v2687_v26, %v1856_v12 }
 0x8d3   :  { %v1865_v0 = vsel %vm1862_vm3, %v1864_v34, %v1860_v11  ;;  %v1880_v33 = vsel %vm1879_vm6, %v2689_v15, %v1876_v20 }
 0x8d4   :  { %v1888_v25 = vmul.f32 %v1887_v61, %v1865_v0  ;;  %v1885_v39 = vsel %vm1882_vm7, %v1884_v30, %v1880_v33 }
 0x8d6   :  { %v1889_v38 = vadd.f32 %v1888_v25, %v1335_v5  ;;  %v1337_v25 = vadd.f32 %v3417_v35, %v3340_v9 }
 0x8d8   :  { %2690 = vtanh.f32 %v1889_v38 }
 0x8de   :  { %v2691_v36 = vpop.eup %2690 }
 0x8df   :  { %v1891_v43 = vsub.f32 %v3460_v14, %v2691_v36 }
 0x8e1   :  { %v1892_v59 = vmul.f32 %v1891_v43, %v1885_v39 }
 0x8e3   :  { %v1893_v28 = vadd.f32 %v2691_v36, %v1892_v59 }
 0x8e5   :  { %v1894_v29 = vsub.f32 %v1893_v28, %v3460_v14 }
 0x8e7   :  { %v1895_v17 = vmul.f32 %v1894_v29, %v3177_v4 }
 0x8e9   :  { %v3487_v24 = vadd.f32 %v1895_v17, %v3460_v14  ;;  %v1308_v14 = vadd.f32 %v3379_v1, %v3324_v40 }
 0x8eb   :  { %v1897_v22 = vmul.f32 %v3487_v24, %v3177_v4  ;;  %v1902_v58 = vpack.c.bf16 %v3487_v24, %v3487_v24 }
 0x8ed   :  { %1898 = vst.msk [vmem:[#allocation2 + $0x20] sm:$0xff] %vm155_vm0, %v1897_v22  ;;  %2484 = vmatmul.msk.bf16.vlgmr.msra.gmra.mxu3 %vm155_vm0, %v1902_v58  ;;  %2485 = vmatmul.msk.bf16.vlgmr.msra.gmra.mxu0 %vm155_vm0, %v1902_v58 }
 0x8ee   :  { %2486 = vmatmul.msk.bf16.vlgmr.msrb.gmra.mxu1 %vm155_vm0, %v1902_v58  ;;  %2134 = vmatpush.bf16.msra.mxu3 %v3270_v54 }
 0x8ef   :  { %2243 = vmatpush.bf16.msra.mxu0 %v2536_v44 }
 0x8f2   :  { %2135 = vmatpush.bf16.msra.mxu3 %v3276_v10 }
 0x8f3   :  { %2244 = vmatpush.bf16.msra.mxu0 %v2535_v2 }
 0x96a   :  { %v1928_v55 = vpop.f32.mrf.mxu0 }
 0x96b   :  { %v1965_v4 = vadd.f32 %v1928_v55, %v1308_v14  ;;  %v1941_v31 = vpop.f32.mrf.mxu1  ;;  %v2194_v55 = vld [vmem:[#allocation2 + $0x8] sm:$0xff] }
 0x96c   :  { %v1985_v61 = vadd.f32 %v3336_v27, %v1941_v31 }
 0x96d   :  { %v2488_v47 = vmul.f32 -1.442695, %v1965_v4  ;;  %v2193_v4 = vld [vmem:[#allocation2] sm:$0xff] }
 0x96e   :  { %v2205_v31 = vpack.c.bf16 %v2194_v55, %v2193_v4 }
 0x96f   :  { %2692 = vpow2.f32 %v2488_v47  ;;  %v2195_v47 = vld [vmem:[#allocation2 + $0x10] sm:$0xff] }
 0x970   :  { %v1915_v42 = vpop.f32.mrf.mxu3 }
 0x971   :  { %v1945_v48 = vadd.f32 %v1915_v42, %v1279_v49  ;;  %v2197_v42 = vld [vmem:[#allocation2 + $0x20] sm:$0xff] }
 0x972   :  { %v1930_v56 = vpop.f32.mrf.mxu0 }
 0x973   :  { %v2487_v62 = vmul.f32 -1.442695, %v1945_v48  ;;  %v1943_v50 = vpop.f32.mrf.mxu1 }
 0x974   :  { %v1311_v50 = vadd.f32 %v3383_v18, %v3324_v40 }
 0x975   :  { %2694 = vpow2.f32 %v2487_v62  ;;  %v2693_v54 = vpop.eup %2692  ;;  %v1282_v62 = vadd.f32 %v3381_v3, %v3315_v7 }
 0x976   :  { %v1969_v46 = vadd.f32 1.0, %v2693_v54 }
 0x978   :  { %v1917_v13 = vpop.f32.mrf.mxu3  ;;  %v1981_v57 = vand.u32 2147483648, %v1969_v46  ;;  %vm1975_vm13 = vweird.f32 %v1969_v46  ;;  %v1979_v33 = vand.u32 2147483647, %v1969_v46 }
 0x97a   :  { %v1982_v43 = vor.u32 1.1754944e-38, %v1981_v57  ;;  %vm1980_vm15 = vcmp.eq.f32.partialorder %v1979_v33, 8.507059e+37 }
 0x97b   :  { %v2695_v10 = vpop.eup %2694 }
 0x97c   :  { %v1949_v26 = vadd.f32 1.0, %v2695_v10 }
 0x97e   :  { %2696 = vrcp.f32 %v1949_v26  ;;  %v1961_v60 = vand.u32 2147483648, %v1949_v26  ;;  %v1959_v51 = vand.u32 2147483647, %v1949_v26  ;;  %vm1955_vm9 = vweird.f32 %v1949_v26 }
 0x97f   :  { %2698 = vrcp.f32 %v1969_v46 }
 0x980   :  { %v1962_v11 = vor.u32 1.1754944e-38, %v1961_v60  ;;  %vm1960_vm11 = vcmp.eq.f32.partialorder %v1959_v51, 8.507059e+37 }
 0x984   :  { %v2697_v1 = vpop.eup %2696 }
 0x985   :  { %v2699_v15 = vpop.eup %2698  ;;  %v1951_v45 = vmul.f32 %v2697_v1, %v1949_v26  ;;  %vm1956_vm8 = vweird.f32 %v2697_v1 }
 0x986   :  { %v1971_v32 = vmul.f32 %v2699_v15, %v1969_v46  ;;  %vm1957_vm10 = vmor %vm1955_vm9, %vm1956_vm8  ;;  %vm1976_vm12 = vweird.f32 %v2699_v15 }
 0x987   :  { %v1952_v41 = vsub.f32 1.0, %v1951_v45  ;;  %vm1977_vm14 = vmor %vm1975_vm13, %vm1976_vm12 }
 0x988   :  { %v1972_v34 = vsub.f32 1.0, %v1971_v32  ;;  %v3530_v32 = vld [vmem:[%s3586_s7] ss:$0 sm:$0xff] }
 0x989   :  { %v1953_v53 = vmul.f32 %v2697_v1, %v1952_v41 }
 0x98a   :  { %v1973_v38 = vmul.f32 %v2699_v15, %v1972_v34 }
 0x98b   :  { %v1954_v12 = vadd.f32 %v2697_v1, %v1953_v53 }
 0x98c   :  { %v1974_v21 = vadd.f32 %v2699_v15, %v1973_v38 }
 0x98d   :  { %v1958_v0 = vsel %vm1957_vm10, %v2697_v1, %v1954_v12 }
 0x98e   :  { %v1963_v5 = vsel %vm1960_vm11, %v1962_v11, %v1958_v0  ;;  %v1978_v36 = vsel %vm1977_vm14, %v2699_v15, %v1974_v21 }
 0x98f   :  { %v1986_v19 = vmul.f32 %v1985_v61, %v1963_v5  ;;  %v1983_v59 = vsel %vm1980_vm15, %v1982_v43, %v1978_v36 }
 0x991   :  { %v1987_v20 = vadd.f32 %v1986_v19, %v1337_v25 }
 0x993   :  { %2700 = vtanh.f32 %v1987_v20 }
 0x999   :  { %v2701_v30 = vpop.eup %2700 }
 0x99a   :  { %v1989_v39 = vsub.f32 %v3487_v24, %v2701_v30 }
 0x99c   :  { %v1990_v28 = vmul.f32 %v1989_v39, %v1983_v59  ;;  %v1340_v59 = vadd.f32 %v3419_v8, %v3340_v9 }
 0x99e   :  { %v1991_v35 = vadd.f32 %v2701_v30, %v1990_v28 }
 0x9a0   :  { %v1992_v29 = vsub.f32 %v1991_v35, %v3487_v24 }
 0x9a2   :  { %v1993_v17 = vmul.f32 %v1992_v29, %v3202_v52 }
 0x9a4   :  { %v3510_v22 = vadd.f32 %v1993_v17, %v3487_v24  ;;  %v2196_v24 = vld [vmem:[#allocation2 + $0x18] sm:$0xff] }
 0x9a5   :  { %v2206_v49 = vpack.c.bf16 %v2196_v24, %v2195_v47 }
 0x9a6   :  { %v1995_v58 = vmul.f32 %v3510_v22, %v3202_v52  ;;  %v2000_v14 = vpack.c.bf16 %v3510_v22, %v3510_v22 }
 0x9a8   :  { %2489 = vmatmul.msk.bf16.vlgmr.msrb.gmra.mxu2 %vm155_vm0, %v2000_v14  ;;  %1996 = vst.msk [vmem:[#allocation2 + $0x28] sm:$0xff] %vm155_vm0, %v1995_v58  ;;  %2490 = vmatmul.msk.bf16.vlgmr.msrb.gmra.mxu3 %vm155_vm0, %v2000_v14 }
 0x9a9   :  { %2491 = vmatmul.msk.bf16.vlgmr.msrb.gmra.mxu0 %vm155_vm0, %v2000_v14 }
 0x9af   :  { %v2198_v52 = vld [vmem:[#allocation2 + $0x28] sm:$0xff] }
 0x9b0   :  { %v2207_v48 = vpack.c.bf16 %v2198_v52, %v2197_v42 }
 0x9b9   :  { %2507 = vmatmul.msk.bf16.vlgmr.msra.gmra.mxu0 %vm155_vm0, %v2205_v31 }
 0x9c9   :  { %2508 = vmatmul.msk.bf16.gmra.mxu0 %vm155_vm0, %v2206_v49 }
 0x9d9   :  { %2509 = vmatmul.msk.bf16.gmra.mxu0 %vm155_vm0, %v2207_v48 }
 0xa26   :  { %v2039_v56 = vpop.f32.mrf.mxu0 }
 0xa27   :  { %v2083_v30 = vadd.f32 %v3336_v27, %v2039_v56 }
 0xa2b   :  { %v2013_v54 = vpop.f32.mrf.mxu2  ;;  %v2026_v13 = vpop.f32.mrf.mxu3 }
 0xa2c   :  { %v2043_v10 = vadd.f32 %v2013_v54, %v1282_v62  ;;  %v2063_v46 = vadd.f32 %v2026_v13, %v1311_v50 }
 0xa2e   :  { %v2492_v26 = vmul.f32 -1.442695, %v2043_v10  ;;  %v2493_v1 = vmul.f32 -1.442695, %v2063_v46  ;;  %v2041_v15 = vpop.f32.mrf.mxu0 }
 0xa30   :  { %2702 = vpow2.f32 %v2492_v26 }
 0xa31   :  { %2704 = vpow2.f32 %v2493_v1 }
 0xa33   :  { %v2015_v45 = vpop.f32.mrf.mxu2  ;;  %v2028_v41 = vpop.f32.mrf.mxu3 }
 0xa36   :  { %v2703_v3 = vpop.eup %2702  ;;  %v2246_v60 = vpop.f32.mrf.mxu0 }
 0xa37   :  { %v2705_v53 = vpop.eup %2704  ;;  %v2047_v18 = vadd.f32 1.0, %v2703_v3  ;;  %v2247_v51 = vadd.f32 %v3530_v32, %v2246_v60 }
 0xa38   :  { %v2067_v44 = vadd.f32 1.0, %v2705_v53 }
 0xa39   :  { %2706 = vrcp.f32 %v2047_v18  ;;  %2266 = vst [vmem:[#allocation12] sm:$0xff] %v2247_v51  ;;  %v2059_v5 = vand.u32 2147483648, %v2047_v18  ;;  %v2057_v38 = vand.u32 2147483647, %v2047_v18  ;;  %vm2053_vm2 = vweird.f32 %v2047_v18 }
 0xa3a   :  { %2708 = vrcp.f32 %v2067_v44  ;;  %v2079_v55 = vand.u32 2147483648, %v2067_v44  ;;  %vm2073_vm6 = vweird.f32 %v2067_v44  ;;  %v2077_v4 = vand.u32 2147483647, %v2067_v44 }
 0xa3b   :  { %v2060_v57 = vor.u32 1.1754944e-38, %v2059_v5  ;;  %vm2058_vm4 = vcmp.eq.f32.partialorder %v2057_v38, 8.507059e+37 }
 0xa3c   :  { %v2080_v24 = vor.u32 1.1754944e-38, %v2079_v55  ;;  %vm2078_vm8 = vcmp.eq.f32.partialorder %v2077_v4, 8.507059e+37 }
 0xa3e   :  { %v2248_v12 = vpop.f32.mrf.mxu0 }
 0xa3f   :  { %v2707_v2 = vpop.eup %2706  ;;  %v2249_v34 = vadd.f32 %v3530_v32, %v2248_v12 }
 0xa40   :  { %v2709_v11 = vpop.eup %2708  ;;  %v2049_v61 = vmul.f32 %v2707_v2, %v2047_v18  ;;  %vm2054_vm1 = vweird.f32 %v2707_v2 }
 0xa41   :  { %2267 = vst [vmem:[#allocation12 + $0x8] sm:$0xff] %v2249_v34  ;;  %v2069_v25 = vmul.f32 %v2709_v11, %v2067_v44  ;;  %vm2055_vm3 = vmor %vm2053_vm2, %vm2054_vm1  ;;  %vm2074_vm5 = vweird.f32 %v2709_v11 }
 0xa42   :  { %v2050_v0 = vsub.f32 1.0, %v2049_v61  ;;  %vm2075_vm7 = vmor %vm2073_vm6, %vm2074_vm5 }
 0xa43   :  { %v2070_v33 = vsub.f32 1.0, %v2069_v25 }
 0xa44   :  { %v2051_v19 = vmul.f32 %v2707_v2, %v2050_v0 }
 0xa45   :  { %v2071_v35 = vmul.f32 %v2709_v11, %v2070_v33 }
 0xa46   :  { %v2052_v20 = vadd.f32 %v2707_v2, %v2051_v19  ;;  %v2251_v21 = vpop.f32.mrf.mxu0 }
 0xa47   :  { %v2252_v36 = vadd.f32 %v3530_v32, %v2251_v21  ;;  %v2072_v58 = vadd.f32 %v2709_v11, %v2071_v35  ;;  %v2723_v21 = vld [vmem:[%s3584_s5 + $0x1] ss:$0 sm:$0xff]  ;;  %s2864_s5 = smov [#allocation12]  }
 0xa48   :  { %v2056_v43 = vsel %vm2055_vm3, %v2707_v2, %v2052_v20  ;;  %s2278_s19 = sshll.u32 %s2864_s5, 4  ;;  %s2279_s19 = int_to_ptr.vmem [resolvable:$true] %s2278_s19 }
 0xa49   :  { %v2061_v39 = vsel %vm2058_vm4, %v2060_v57, %v2056_v43  ;;  %2268 = vst [vmem:[#allocation12 + $0x10] sm:$0xff] %v2252_v36  ;;  %v2076_v27 = vsel %vm2075_vm7, %v2709_v11, %v2072_v58  ;;  %v1342_v36 = vadd.f32 %v3421_v37, %v3340_v9 }
 0xa4a   :  { %v2084_v28 = vmul.f32 %v2083_v30, %v2061_v39  ;;  %v2081_v47 = vsel %vm2078_vm8, %v2080_v24, %v2076_v27 }
 0xa4c   :  { %v2085_v29 = vadd.f32 %v2084_v28, %v1340_v59 }
 0xa4e   :  { %2710 = vtanh.f32 %v2085_v29  ;;  %v2253_v17 = vpop.f32.mrf.mxu0 }
 0xa4f   :  { %v2254_v14 = vadd.f32 %v3530_v32, %v2253_v17 }
 0xa51   :  { %2269 = vst [vmem:[#allocation12 + $0x18] sm:$0xff] %v2254_v14 }
 0xa54   :  { %v2711_v31 = vpop.eup %2710 }
 0xa55   :  { %v2087_v8 = vsub.f32 %v3510_v22, %v2711_v31 }
 0xa56   :  { %v2256_v49 = vpop.f32.mrf.mxu0 }
 0xa57   :  { %v2088_v52 = vmul.f32 %v2087_v8, %v2081_v47  ;;  %v2257_v42 = vadd.f32 %v3530_v32, %v2256_v49 }
 0xa59   :  { %v2089_v48 = vadd.f32 %v2711_v31, %v2088_v52  ;;  %2270 = vst [vmem:[#allocation12 + $0x20] sm:$0xff] %v2257_v42 }
 0xa5b   :  { %v2090_v56 = vsub.f32 %v2089_v48, %v3510_v22 }
 0xa5d   :  { %v2091_v62 = vmul.f32 %v2090_v56, %v3254_v23 }
 0xa5e   :  { %v2258_v50 = vpop.f32.mrf.mxu0 }
 0xa5f   :  { %v3544_v54 = vadd.f32 %v2091_v62, %v3510_v22  ;;  %v2259_v13 = vadd.f32 %v3530_v32, %v2258_v50  ;;  %v1284_v22 = vadd.f32 %v3385_v6, %v3315_v7 }
 0xa61   :  { %v2093_v10 = vmul.f32 %v3544_v54, %v3254_v23  ;;  %2271 = vst [vmem:[#allocation12 + $0x28] sm:$0xff] %v2259_v13  ;;  %v2098_v46 = vpack.c.bf16 %v3544_v54, %v3544_v54  ;;  %v1313_v23 = vadd.f32 %v3387_v16, %v3324_v40 }
 0xa63   :  { %2094 = vst.msk [vmem:[#allocation2 + $0x30] sm:$0xff] %vm155_vm0, %v2093_v10  ;;  %2494 = vmatmul.msk.bf16.vlgmr.msra.gmra.mxu1 %vm155_vm0, %v2098_v46  ;;  %2495 = vmatmul.msk.bf16.vlgmr.msra.gmra.mxu2 %vm155_vm0, %v2098_v46 }
 0xa64   :  { %2496 = vmatmul.msk.bf16.vlgmr.msra.gmra.mxu3 %vm155_vm0, %v2098_v46 }
 0xa6a   :  { %v2199_v8 = vld [vmem:[#allocation2 + $0x30] sm:$0xff] }
 0xae0   :  { %v2111_v26 = vpop.f32.mrf.mxu1 }
 0xae1   :  { %v2141_v1 = vadd.f32 %v2111_v26, %v1284_v22 }
 0xae3   :  { %v2497_v15 = vmul.f32 -1.442695, %v2141_v1 }
 0xae5   :  { %2712 = vpow2.f32 %v2497_v15 }
 0xae6   :  { %v2124_v45 = vpop.f32.mrf.mxu2 }
 0xae7   :  { %v2161_v41 = vadd.f32 %v2124_v45, %v1313_v23  ;;  %v2137_v3 = vpop.f32.mrf.mxu3 }
 0xae8   :  { %v2113_v60 = vpop.f32.mrf.mxu1  ;;  %v2181_v57 = vadd.f32 %v2723_v21, %v2137_v3 }
 0xae9   :  { %v2498_v53 = vmul.f32 -1.442695, %v2161_v41 }
 0xaeb   :  { %v2713_v18 = vpop.eup %2712  ;;  %2714 = vpow2.f32 %v2498_v53 }
 0xaec   :  { %v2145_v51 = vadd.f32 1.0, %v2713_v18 }
 0xaee   :  { %2716 = vrcp.f32 %v2145_v51  ;;  %v2126_v44 = vpop.f32.mrf.mxu2  ;;  %v2157_v61 = vand.u32 2147483648, %v2145_v51  ;;  %v2155_v16 = vand.u32 2147483647, %v2145_v51  ;;  %vm2151_vm10 = vweird.f32 %v2145_v51 }
 0xaef   :  { %v2139_v12 = vpop.f32.mrf.mxu3 }
 0xaf0   :  { %v2158_v19 = vor.u32 1.1754944e-38, %v2157_v61  ;;  %vm2156_vm12 = vcmp.eq.f32.partialorder %v2155_v16, 8.507059e+37 }
 0xaf1   :  { %v2715_v2 = vpop.eup %2714 }
 0xaf2   :  { %v2165_v7 = vadd.f32 1.0, %v2715_v2 }
 0xaf4   :  { %v2717_v6 = vpop.eup %2716  ;;  %2718 = vrcp.f32 %v2165_v7  ;;  %v2177_v28 = vand.u32 2147483648, %v2165_v7  ;;  %vm2171_vm14 = vweird.f32 %v2165_v7  ;;  %v2175_v35 = vand.u32 2147483647, %v2165_v7 }
 0xaf5   :  { %v2147_v34 = vmul.f32 %v2717_v6, %v2145_v51  ;;  %vm2152_vm9 = vweird.f32 %v2717_v6 }
 0xaf6   :  { %vm2153_vm11 = vmor %vm2151_vm10, %vm2152_vm9  ;;  %v2178_v58 = vor.u32 1.1754944e-38, %v2177_v28  ;;  %vm2176_vm1 = vcmp.eq.f32.partialorder %v2175_v35, 8.507059e+37 }
 0xaf7   :  { %v2148_v11 = vsub.f32 1.0, %v2147_v34 }
 0xaf9   :  { %v2149_v40 = vmul.f32 %v2717_v6, %v2148_v11 }
 0xafa   :  { %v2719_v0 = vpop.eup %2718 }
 0xafb   :  { %v2167_v5 = vmul.f32 %v2719_v0, %v2165_v7  ;;  %v2150_v25 = vadd.f32 %v2717_v6, %v2149_v40  ;;  %vm2172_vm13 = vweird.f32 %v2719_v0 }
 0xafc   :  { %vm2173_vm15 = vmor %vm2171_vm14, %vm2172_vm13 }
 0xafd   :  { %v2168_v38 = vsub.f32 1.0, %v2167_v5  ;;  %v2154_v20 = vsel %vm2153_vm11, %v2717_v6, %v2150_v25 }
 0xafe   :  { %v2159_v33 = vsel %vm2156_vm12, %v2158_v19, %v2154_v20 }
 0xaff   :  { %v2182_v30 = vmul.f32 %v2181_v57, %v2159_v33  ;;  %v2169_v43 = vmul.f32 %v2719_v0, %v2168_v38 }
 0xb01   :  { %v2183_v39 = vadd.f32 %v2182_v30, %v1342_v36  ;;  %v2170_v59 = vadd.f32 %v2719_v0, %v2169_v43 }
 0xb03   :  { %2720 = vtanh.f32 %v2183_v39  ;;  %v2174_v29 = vsel %vm2173_vm15, %v2719_v0, %v2170_v59 }
 0xb04   :  { %v2179_v55 = vsel %vm2176_vm1, %v2178_v58, %v2174_v29 }
 0xb09   :  { %v2721_v17 = vpop.eup %2720 }
 0xb0a   :  { %v2185_v14 = vsub.f32 %v3544_v54, %v2721_v17 }
 0xb0c   :  { %v2186_v4 = vmul.f32 %v2185_v14, %v2179_v55 }
 0xb0e   :  { %v2187_v27 = vadd.f32 %v2721_v17, %v2186_v4 }
 0xb10   :  { %v2188_v9 = vsub.f32 %v2187_v27, %v3544_v54 }
 0xb12   :  { %v2189_v37 = vmul.f32 %v2188_v9, %v3329_v63 }
 0xb14   :  { %v2190_v31 = vadd.f32 %v2189_v37, %v3544_v54 }
 0xb16   :  { %v2191_v24 = vmul.f32 %v2190_v31, %v3329_v63 }
 0xb18   :  { %2192 = vst.msk [vmem:[#allocation2 + $0x38] sm:$0xff] %vm155_vm0, %v2191_v24 }
 0xb1f   :  { %v2200_v47 = vld [vmem:[#allocation2 + $0x38] sm:$0xff] }
 0xb20   :  { %v2208_v49 = vpack.c.bf16 %v2200_v47, %v2199_v8 }
 0xb22   :  { %2510 = vmatmul.msk.bf16.gmra.mxu0 %vm155_vm0, %v2208_v49 }
 0xb9f   :  { %v2261_v52 = vpop.f32.mrf.mxu0 }
 0xba0   :  { %v2262_v42 = vadd.f32 %v3530_v32, %v2261_v52 }
 0xba2   :  { %2272 = vst [vmem:[#allocation12 + $0x30] sm:$0xff] %v2262_v42 }
 0xba7   :  { %v2263_v48 = vpop.f32.mrf.mxu0 }
 0xba8   :  { %v2264_v63 = vadd.f32 %v3530_v32, %v2263_v48 }
 0xbaa   :  { %2273 = vst [vmem:[#allocation12 + $0x38] sm:$0xff] %v2264_v63 }
 0xbab   :  { %2286 = dma.vmem_to_hbm [thread:$0]  %s2279_s19, 1024, %s2281_s0, [#allocation6], %s2856_s17, %s2856_s17, %s2857_s18  }
 0xbac   :  { %2850 = dma.done.wait [#allocation6], 1024  }
 0xbad   :  { %2851 = vsyncadd [#allocation6], 4294966272 }
 0xbae   :  { %2291 = vsyncpa [#allocation5], 1 }
 0xbaf   :  { %2292 = vsyncpa [#allocation8], 1 }
 0xbb0   :  { %2293 = vsyncpa [#allocation11], 1 }
 0xbb1   :  { %2294 = vsyncpa [#allocation6], 1 }

</bundles_post_ra>
